<compile_context>
chip_gen: v6e
topology: v6e:2x2x1
jax: 0.10.0
libtpu: 0.0.40
codegen_flags: <defaults>
</compile_context>

<pallas_src>
import functools
import math

import jax
import jax.numpy as jnp
import numpy as np
from jax.experimental import pallas as pl
from jax.experimental.pallas import tpu as pltpu


# ----------------------------------------------------------------------------
# helpers
# ----------------------------------------------------------------------------
_NEG_INF = float(np.finfo(np.float32).min) / 2.0      # dtype-aware mask constant
_SQRT_2_OVER_PI = math.sqrt(2.0 / math.pi)

_LAYER_ORDER = ["ln1_w", "ln1_b", "wqkv", "bqkv", "wo", "bo",
                "ln2_w", "ln2_b", "w1", "b1", "w2", "b2"]


def _round_up(v, m):
    return -(-v // m) * m


def _seq_pad(s):
    # lane-dense (128) padding when S is production-sized; 8-sublane otherwise.
    return _round_up(s, 128) if s > 64 else _round_up(s, 8)


def _layernorm(x, w, b, eps=1e-5):
    mu = jnp.mean(x, axis=-1, keepdims=True)
    var = jnp.mean((x - mu) ** 2, axis=-1, keepdims=True)   # biased, like torch
    return (x - mu) * jax.lax.rsqrt(var + eps) * w + b


def _gelu_tanh(x):
    # tanh-approximate GELU (maps to the EUP on all TPU generations).
    return 0.5 * x * (1.0 + jnp.tanh(_SQRT_2_OVER_PI * (x + 0.044715 * x * x * x)))


def _vmem_limit_bytes():
    try:
        cap = int(pltpu.get_tpu_info().vmem_capacity_bytes)
    except Exception:                                        # pragma: no cover
        cap = 64 * 1024 * 1024
    return max(32 * 1024 * 1024, min(int(cap * 0.85), 100 * 1024 * 1024))


# ----------------------------------------------------------------------------
# fused ViT kernel: one grid step = (batch tile, encoder layer)
# ----------------------------------------------------------------------------
def vit_kernel(patches_ref, convw_ref, add_ref,
               ln1w_ref, ln1b_ref, wqkv_ref, bqkv_ref, wo_ref, bo_ref,
               ln2w_ref, ln2b_ref, w1_ref, b1_ref, w2_ref, b2_ref,
               normw_ref, normb_ref, projw_ref, projb_ref,
               out_ref, seq_ref, ctx_ref,
               *, num_heads, valid_len, bblk, s_pad):
    d = pl.program_id(1)
    E = seq_ref.shape[-1]
    hd = E // num_heads
    P = patches_ref.shape[1]

    # ---- d == 0: fused patch embed (conv-as-matmul + cls + pos + pad) ----
    @pl.when(d == 0)
    def _init():
        pad_rows = s_pad - 1 - P
        for b in range(bblk):
            proj = jnp.dot(patches_ref[b], convw_ref[...],
                           preferred_element_type=jnp.float32)      # (P, E)
            pieces = [jnp.zeros((1, E), jnp.float32), proj]
            if pad_rows:
                pieces.append(jnp.zeros((pad_rows, E), jnp.float32))
            # add_ref: row0 = cls + pos[0]; rows 1..P = conv_b + pos[1:]; pad = 0
            seq_ref[b * s_pad:(b + 1) * s_pad, :] = (
                jnp.concatenate(pieces, axis=0) + add_ref[...])

    # ---- encoder layer d on the VMEM-resident activations ----
    x = seq_ref[...]                                   # (R, E) f32, R = bblk*s_pad

    n1 = _layernorm(x, ln1w_ref[...], ln1b_ref[...]).astype(jnp.bfloat16)
    qkv = (jnp.dot(n1, wqkv_ref[...], preferred_element_type=jnp.float32)
           + bqkv_ref[...])                            # (R, 3E) f32
    q = qkv[:, 0:E]                                    # scale pre-folded into wqkv/bqkv
    k = qkv[:, E:2 * E]
    v = qkv[:, 2 * E:3 * E]

    # mask padded key rows (sequence padded to s_pad)
    key_mask = jax.lax.broadcasted_iota(jnp.int32, (1, s_pad), 1) < valid_len

    # per-(batch, head) attention; contexts land in ctx scratch at lane offset
    # h*hd, then ONE (R, E) @ (E, E) matmul applies the output projection.
    for b in range(bblk):
        r0 = b * s_pad
        for h in range(num_heads):
            c0 = h * hd
            qh = q[r0:r0 + s_pad, c0:c0 + hd].astype(jnp.bfloat16)
            kh = k[r0:r0 + s_pad, c0:c0 + hd].astype(jnp.bfloat16)
            vh = v[r0:r0 + s_pad, c0:c0 + hd].astype(jnp.bfloat16)
            s = jnp.einsum("qd,kd->qk", qh, kh,
                           preferred_element_type=jnp.float32)       # (s_pad, s_pad)
            s = jnp.where(key_mask, s, _NEG_INF)
            m = jnp.max(s, axis=-1, keepdims=True)
            p = jnp.exp(s - m)
            p = p * pl.reciprocal(jnp.sum(p, axis=-1, keepdims=True), approx=True)
            ctx_ref[r0:r0 + s_pad, c0:c0 + hd] = jnp.dot(
                p.astype(jnp.bfloat16), vh, preferred_element_type=jnp.float32)

    attn = (jnp.dot(ctx_ref[...].astype(jnp.bfloat16), wo_ref[...],
                    preferred_element_type=jnp.float32) + bo_ref[...])
    x = x + attn

    n2 = _layernorm(x, ln2w_ref[...], ln2b_ref[...]).astype(jnp.bfloat16)
    hmid = (jnp.dot(n2, w1_ref[...], preferred_element_type=jnp.float32)
            + b1_ref[...])
    hmid = _gelu_tanh(hmid).astype(jnp.bfloat16)
    x = x + (jnp.dot(hmid, w2_ref[...], preferred_element_type=jnp.float32)
             + b2_ref[...])
    seq_ref[...] = x

    # ---- d == depth-1: final LayerNorm + feature_proj on the CLS rows only ----
    @pl.when(d == pl.num_programs(1) - 1)
    def _head():
        for b in range(bblk):
            cls = x[b * s_pad:b * s_pad + 1, :]                       # (1, E)
            n = _layernorm(cls, normw_ref[...], normb_ref[...]).astype(jnp.bfloat16)
            out_ref[b] = (jnp.dot(n, projw_ref[...],
                                  preferred_element_type=jnp.float32)
                          + projb_ref[...])


# ----------------------------------------------------------------------------
# pallas_call wrapper
# ----------------------------------------------------------------------------
def vision_transformer_forward(x, params, *, patch_size, num_heads):
    """Forward pass.  `params` must come from prepare_params (Q-scale folded)."""
    B, C, H, W = x.shape
    p = patch_size
    gh, gw = H // p, W // p
    P = gh * gw
    K = C * p * p
    E = params["pos"].shape[-1]
    S = P + 1
    S_pad = _seq_pad(S)
    out_dim = params["proj_w"].shape[1]
    L = params["layers"]
    depth = L["wqkv"].shape[0]

    bblk = next(n for n in (8, 4, 2, 1) if B % n == 0)
    n_btiles = B // bblk

    # im2col for the stride==kernel Conv2d (row order matches torch's
    # weight.reshape(E, C*p*p) flattening and flatten(2).transpose(1,2)); cast to
    # bf16 in the wrapper so the only activation-sized HBM read is half width.
    patches = (x.reshape(B, C, gh, p, gw, p)
                 .transpose(0, 2, 4, 1, 3, 5)
                 .reshape(B, P, K)).astype(jnp.bfloat16)

    # additive row table folding conv bias, CLS token, positional embedding and
    # pad rows into a single (S_pad, E) constant (tiny, weight-sized).
    add = jnp.concatenate(
        [params["cls"] + params["pos"][0:1],
         params["conv_b"] + params["pos"][1:],
         jnp.zeros((S_pad - S, E), jnp.float32)], axis=0)

    layer_ws = [L[name] for name in _LAYER_ORDER]

    def stacked_spec(a):   # (depth, X, Y): stream layer d, squeeze depth in-kernel
        return pl.BlockSpec((None,) + tuple(a.shape[1:]), lambda i, d: (d, 0, 0))

    def const_spec(a):     # fetched once (block index never changes)
        nd = a.ndim
        return pl.BlockSpec(tuple(a.shape), lambda i, d, _n=nd: (0,) * _n)

    kernel = functools.partial(vit_kernel, num_heads=num_heads, valid_len=S,
                               bblk=bblk, s_pad=S_pad)

    # megacore-shard the batch axis only when each core gets >= 1 full tile.
    sem = ("parallel" if n_btiles >= 2 else "arbitrary", "arbitrary")

    out = pl.pallas_call(
        kernel,
        out_shape=jax.ShapeDtypeStruct((B, 1, out_dim), jnp.float32),
        grid=(n_btiles, depth),
        in_specs=[pl.BlockSpec((bblk, P, K), lambda i, d: (i, 0, 0)),
                  const_spec(params["conv_w"]),
                  const_spec(add)]
                 + [stacked_spec(w) for w in layer_ws]
                 + [const_spec(params["norm_w"]), const_spec(params["norm_b"]),
                    const_spec(params["proj_w"]), const_spec(params["proj_b"])],
        out_specs=pl.BlockSpec((bblk, 1, out_dim), lambda i, d: (i, 0, 0)),
        scratch_shapes=[pltpu.VMEM((bblk * S_pad, E), jnp.float32),   # activations
                        pltpu.VMEM((bblk * S_pad, E), jnp.float32)],  # attn contexts
        compiler_params=pltpu.CompilerParams(
            dimension_semantics=sem,
            vmem_limit_bytes=_vmem_limit_bytes()),
    )(patches, params["conv_w"], add, *layer_ws,
      params["norm_w"], params["norm_b"], params["proj_w"], params["proj_b"])
    return out[:, 0, :]


# ----------------------------------------------------------------------------
# parameters (weights pre-transposed to (in, out); matmul weights stored bf16)
# ----------------------------------------------------------------------------
def init_params(key, *, img_size, patch_size, in_channels, embed_dim, depth,
                mlp_ratio, out_dim=256):
    P = (img_size // patch_size) ** 2
    K = in_channels * patch_size * patch_size
    E = embed_dim
    hid = int(E * mlp_ratio)
    keys = jax.random.split(key, 20)
    bf = jnp.bfloat16

    def rnd(k, shape, dtype=jnp.float32, scale=0.02):
        return (scale * jax.random.normal(k, shape, jnp.float32)).astype(dtype)

    return {
        # torch Conv2d weight (E, C, p, p) -> reshape(E, K).T -> (K, E)
        "conv_w": rnd(keys[0], (K, E), bf),
        "conv_b": rnd(keys[1], (1, E)),
        "cls":    rnd(keys[2], (1, E)),
        "pos":    rnd(keys[3], (P + 1, E)),
        "norm_w": 1.0 + rnd(keys[4], (1, E)),
        "norm_b": rnd(keys[5], (1, E)),
        # torch Linear weight (out, in) -> .T -> (in, out)
        "proj_w": rnd(keys[6], (E, out_dim), bf),
        "proj_b": rnd(keys[7], (1, out_dim)),
        "layers": {   # per-layer weights stacked along a leading depth axis
            "ln1_w": 1.0 + rnd(keys[8], (depth, 1, E)),
            "ln1_b": rnd(keys[9], (depth, 1, E)),
            "wqkv":  rnd(keys[10], (depth, E, 3 * E), bf),   # in_proj_weight.T
            "bqkv":  rnd(keys[11], (depth, 1, 3 * E)),
            "wo":    rnd(keys[12], (depth, E, E), bf),       # out_proj.weight.T
            "bo":    rnd(keys[13], (depth, 1, E)),
            "ln2_w": 1.0 + rnd(keys[14], (depth, 1, E)),
            "ln2_b": rnd(keys[15], (depth, 1, E)),
            "w1":    rnd(keys[16], (depth, E, hid), bf),
            "b1":    rnd(keys[17], (depth, 1, hid)),
            "w2":    rnd(keys[18], (depth, hid, E), bf),
            "b2":    rnd(keys[19], (depth, 1, E)),
        },
    }


def prepare_params(params, *, num_heads):
    """Fold the 1/sqrt(head_dim) attention scale into the Q columns of wqkv/bqkv
    (one-time parameter prep; removes a per-layer (R, E) VPU multiply)."""
    E = params["pos"].shape[-1]
    scale = 1.0 / math.sqrt(E // num_heads)
    L = dict(params["layers"])
    wqkv = L["wqkv"].astype(jnp.float32)
    L["wqkv"] = wqkv.at[:, :, :E].multiply(scale).astype(params["layers"]["wqkv"].dtype)
    L["bqkv"] = L["bqkv"].at[:, :, :E].multiply(scale)
    out = dict(params)
    out["layers"] = L
    return out


# ----------------------------------------------------------------------------
# pure-JAX reference (same math, f32, no padding) for a sanity check
# ----------------------------------------------------------------------------
def reference_forward(x, params, *, patch_size, num_heads):
    hp = jax.lax.Precision.HIGHEST
    f32 = lambda a: a.astype(jnp.float32)
    B, C, H, W = x.shape
    p = patch_size
    gh, gw = H // p, W // p
    P = gh * gw
    E = params["pos"].shape[-1]
    L = params["layers"]
    depth = L["wqkv"].shape[0]

    patches = (x.reshape(B, C, gh, p, gw, p)
                 .transpose(0, 2, 4, 1, 3, 5)
                 .reshape(B, P, C * p * p))
    proj = jnp.einsum("bpk,ke->bpe", patches, f32(params["conv_w"]),
                      precision=hp) + params["conv_b"]
    cls = jnp.broadcast_to(params["cls"][None], (B, 1, E))
    seq = jnp.concatenate([cls, proj], axis=1) + params["pos"][None]

    hd = E // num_heads
    scale = 1.0 / math.sqrt(hd)
    for d in range(depth):
        n1 = _layernorm(seq, L["ln1_w"][d], L["ln1_b"][d])
        qkv = jnp.einsum("bse,ef->bsf", n1, f32(L["wqkv"][d]), precision=hp) + L["bqkv"][d]
        q = (qkv[..., :E] * scale).reshape(B, -1, num_heads, hd)
        k = qkv[..., E:2 * E].reshape(B, -1, num_heads, hd)
        v = qkv[..., 2 * E:].reshape(B, -1, num_heads, hd)
        s = jnp.einsum("bqhd,bkhd->bhqk", q, k, precision=hp)
        pa = jax.nn.softmax(s, axis=-1)
        a = jnp.einsum("bhqk,bkhd->bqhd", pa, v, precision=hp).reshape(B, -1, E)
        a = jnp.einsum("bse,ef->bsf", a, f32(L["wo"][d]), precision=hp) + L["bo"][d]
        seq = seq + a
        n2 = _layernorm(seq, L["ln2_w"][d], L["ln2_b"][d])
        hmid = _gelu_tanh(jnp.einsum("bse,ef->bsf", n2, f32(L["w1"][d]),
                                     precision=hp) + L["b1"][d])
        mlp = jnp.einsum("bsf,fe->bse", hmid, f32(L["w2"][d]), precision=hp) + L["b2"][d]
        seq = seq + mlp
    cls_out = seq[:, 0, :]
    n = _layernorm(cls_out, params["norm_w"], params["norm_b"])
    return jnp.einsum("be,ef->bf", n, f32(params["proj_w"]), precision=hp) + params["proj_b"]


# ----------------------------------------------------------------------------
if __name__ == "__main__":
    # Small shapes consistent with the module's forward:
    img_size, patch_size, in_channels = 16, 4, 3
    embed_dim, depth, num_heads, mlp_ratio = 32, 2, 4, 4.0
    B = 2

    key = jax.random.PRNGKey(0)
    kx, kp = jax.random.split(key)
    x = jax.random.normal(kx, (B, in_channels, img_size, img_size), jnp.float32)
    params = init_params(kp, img_size=img_size, patch_size=patch_size,
                         in_channels=in_channels, embed_dim=embed_dim,
                         depth=depth, mlp_ratio=mlp_ratio)
    kparams = prepare_params(params, num_heads=num_heads)   # Q-scale folded

    fwd = jax.jit(functools.partial(vision_transformer_forward,
                                    patch_size=patch_size, num_heads=num_heads))
    out = jax.block_until_ready(fwd(x, kparams))
    assert out.shape == (B, 256), out.shape

    ref = reference_forward(x, params, patch_size=patch_size, num_heads=num_heads)
    np.testing.assert_allclose(np.asarray(out), np.asarray(ref),
                               rtol=2e-2, atol=1e-2)

    print("KERNEL_OK")
</pallas_src>

<mosaic_0001>
module attributes {stable_mosaic.version = 11 : i64} {
  func.func @vit_kernel(%arg0: i32, %arg1: i32, %arg2: memref<2x16x48xbf16, #tpu.memory_space<vmem>>, %arg3: memref<48x32xbf16, #tpu.memory_space<vmem>>, %arg4: memref<24x32xf32, #tpu.memory_space<vmem>>, %arg5: memref<1x1x32xf32, #tpu.memory_space<vmem>>, %arg6: memref<1x1x32xf32, #tpu.memory_space<vmem>>, %arg7: memref<1x32x96xbf16, #tpu.memory_space<vmem>>, %arg8: memref<1x1x96xf32, #tpu.memory_space<vmem>>, %arg9: memref<1x32x32xbf16, #tpu.memory_space<vmem>>, %arg10: memref<1x1x32xf32, #tpu.memory_space<vmem>>, %arg11: memref<1x1x32xf32, #tpu.memory_space<vmem>>, %arg12: memref<1x1x32xf32, #tpu.memory_space<vmem>>, %arg13: memref<1x32x128xbf16, #tpu.memory_space<vmem>>, %arg14: memref<1x1x128xf32, #tpu.memory_space<vmem>>, %arg15: memref<1x128x32xbf16, #tpu.memory_space<vmem>>, %arg16: memref<1x1x32xf32, #tpu.memory_space<vmem>>, %arg17: memref<1x32xf32, #tpu.memory_space<vmem>>, %arg18: memref<1x32xf32, #tpu.memory_space<vmem>>, %arg19: memref<32x256xbf16, #tpu.memory_space<vmem>>, %arg20: memref<1x256xf32, #tpu.memory_space<vmem>>, %arg21: memref<2x1x256xf32, #tpu.memory_space<vmem>>, %arg22: memref<48x32xf32, #tpu.memory_space<vmem>>, %arg23: memref<48x32xf32, #tpu.memory_space<vmem>>) attributes {dimension_semantics = [#tpu.dimension_semantics<arbitrary>, #tpu.dimension_semantics<arbitrary>], iteration_bounds = array<i64: 1, 2>, scalar_prefetch = 0 : i64, scratch_operands = 2 : i64, tpu.core_type = #tpu.core_type<tc>, window_params = [{transform_indices = @transform_0, window_bounds = array<i64: 2, 16, 48>}, {pipeline_mode = #tpu.pipeline_mode<synchronous>, transform_indices = @transform_1, window_bounds = array<i64: 48, 32>}, {pipeline_mode = #tpu.pipeline_mode<synchronous>, transform_indices = @transform_2, window_bounds = array<i64: 24, 32>}, {transform_indices = @transform_3, window_bounds = array<i64: 1, 1, 32>}, {transform_indices = @transform_4, window_bounds = array<i64: 1, 1, 32>}, {transform_indices = @transform_5, window_bounds = array<i64: 1, 32, 96>}, {transform_indices = @transform_6, window_bounds = array<i64: 1, 1, 96>}, {transform_indices = @transform_7, window_bounds = array<i64: 1, 32, 32>}, {transform_indices = @transform_8, window_bounds = array<i64: 1, 1, 32>}, {transform_indices = @transform_9, window_bounds = array<i64: 1, 1, 32>}, {transform_indices = @transform_10, window_bounds = array<i64: 1, 1, 32>}, {transform_indices = @transform_11, window_bounds = array<i64: 1, 32, 128>}, {transform_indices = @transform_12, window_bounds = array<i64: 1, 1, 128>}, {transform_indices = @transform_13, window_bounds = array<i64: 1, 128, 32>}, {transform_indices = @transform_14, window_bounds = array<i64: 1, 1, 32>}, {pipeline_mode = #tpu.pipeline_mode<synchronous>, transform_indices = @transform_15, window_bounds = array<i64: 1, 32>}, {pipeline_mode = #tpu.pipeline_mode<synchronous>, transform_indices = @transform_16, window_bounds = array<i64: 1, 32>}, {pipeline_mode = #tpu.pipeline_mode<synchronous>, transform_indices = @transform_17, window_bounds = array<i64: 32, 256>}, {pipeline_mode = #tpu.pipeline_mode<synchronous>, transform_indices = @transform_18, window_bounds = array<i64: 1, 256>}, {transform_indices = @transform_19, window_bounds = array<i64: 2, 1, 256>}]} {
    %c0_i32 = arith.constant 0 : i32
    %0 = arith.cmpi eq, %arg1, %c0_i32 : i32
    %1 = arith.extui %0 : i1 to i32
    %c0_i32_0 = arith.constant 0 : i32
    %2 = arith.cmpi ne, %1, %c0_i32_0 : i32
    scf.if %2 {
      %c0_113 = arith.constant 0 : index
      %c0_114 = arith.constant 0 : index
      %c0_115 = arith.constant 0 : index
      %306 = vector.load %arg2[%c0_113, %c0_114, %c0_115] : memref<2x16x48xbf16, #tpu.memory_space<vmem>>, vector<1x16x48xbf16>
      %307 = vector.shape_cast %306 : vector<1x16x48xbf16> to vector<16x48xbf16>
      %c0_116 = arith.constant 0 : index
      %c0_117 = arith.constant 0 : index
      %308 = vector.load %arg3[%c0_116, %c0_117] : memref<48x32xbf16, #tpu.memory_space<vmem>>, vector<48x32xbf16>
      %cst_118 = arith.constant dense<0.000000e+00> : vector<16x32xf32>
      %309 = tpu.matmul %307, %308, %cst_118 {dimension_numbers = #tpu.dot_dimension_numbers<[1], [0], [0], [1], [0, 0, 1, 1], [], []>} : vector<16x48xbf16>, vector<48x32xbf16>, vector<16x32xf32> -> vector<16x32xf32>
      %cst_119 = arith.constant 0.000000e+00 : f32
      %310 = vector.broadcast %cst_119 : f32 to vector<1x32xf32>
      %cst_120 = arith.constant 0.000000e+00 : f32
      %311 = vector.broadcast %cst_120 : f32 to vector<7x32xf32>
      %312 = tpu.concatenate %310, %309, %311 in 0 : vector<1x32xf32>, vector<16x32xf32>, vector<7x32xf32> -> vector<24x32xf32>
      %c0_121 = arith.constant 0 : index
      %c0_122 = arith.constant 0 : index
      %313 = vector.load %arg4[%c0_121, %c0_122] : memref<24x32xf32, #tpu.memory_space<vmem>>, vector<24x32xf32>
      %314 = arith.addf %312, %313 : vector<24x32xf32>
      %c0_123 = arith.constant 0 : index
      %c0_124 = arith.constant 0 : index
      %315 = vector.load %arg22[%c0_123, %c0_124] : memref<48x32xf32, #tpu.memory_space<vmem>>, vector<24x32xf32>
      tpu.vector_store %arg22[%c0_123, %c0_124], %314 {strides = array<i32>} : memref<48x32xf32, #tpu.memory_space<vmem>>, vector<24x32xf32>,
      %c1 = arith.constant 1 : index
      %c0_125 = arith.constant 0 : index
      %c0_126 = arith.constant 0 : index
      %316 = vector.load %arg2[%c1, %c0_125, %c0_126] : memref<2x16x48xbf16, #tpu.memory_space<vmem>>, vector<1x16x48xbf16>
      %317 = vector.shape_cast %316 : vector<1x16x48xbf16> to vector<16x48xbf16>
      %c0_127 = arith.constant 0 : index
      %c0_128 = arith.constant 0 : index
      %318 = vector.load %arg3[%c0_127, %c0_128] : memref<48x32xbf16, #tpu.memory_space<vmem>>, vector<48x32xbf16>
      %cst_129 = arith.constant dense<0.000000e+00> : vector<16x32xf32>
      %319 = tpu.matmul %317, %318, %cst_129 {dimension_numbers = #tpu.dot_dimension_numbers<[1], [0], [0], [1], [0, 0, 1, 1], [], []>} : vector<16x48xbf16>, vector<48x32xbf16>, vector<16x32xf32> -> vector<16x32xf32>
      %cst_130 = arith.constant 0.000000e+00 : f32
      %320 = vector.broadcast %cst_130 : f32 to vector<1x32xf32>
      %cst_131 = arith.constant 0.000000e+00 : f32
      %321 = vector.broadcast %cst_131 : f32 to vector<7x32xf32>
      %322 = tpu.concatenate %320, %319, %321 in 0 : vector<1x32xf32>, vector<16x32xf32>, vector<7x32xf32> -> vector<24x32xf32>
      %c0_132 = arith.constant 0 : index
      %c0_133 = arith.constant 0 : index
      %323 = vector.load %arg4[%c0_132, %c0_133] : memref<24x32xf32, #tpu.memory_space<vmem>>, vector<24x32xf32>
      %324 = arith.addf %322, %323 : vector<24x32xf32>
      %c24_134 = arith.constant 24 : index
      %c0_135 = arith.constant 0 : index
      %325 = vector.load %arg22[%c24_134, %c0_135] : memref<48x32xf32, #tpu.memory_space<vmem>>, vector<24x32xf32>
      tpu.vector_store %arg22[%c24_134, %c0_135], %324 {strides = array<i32>} : memref<48x32xf32, #tpu.memory_space<vmem>>, vector<24x32xf32>,
    } else {
    }
    %c0 = arith.constant 0 : index
    %c0_1 = arith.constant 0 : index
    %3 = vector.load %arg22[%c0, %c0_1] : memref<48x32xf32, #tpu.memory_space<vmem>>, vector<48x32xf32>
    %c0_2 = arith.constant 0 : index
    %c0_3 = arith.constant 0 : index
    %c0_4 = arith.constant 0 : index
    %4 = vector.load %arg5[%c0_2, %c0_3, %c0_4] : memref<1x1x32xf32, #tpu.memory_space<vmem>>, vector<1x1x32xf32>
    %5 = vector.shape_cast %4 : vector<1x1x32xf32> to vector<1x32xf32>
    %c0_5 = arith.constant 0 : index
    %c0_6 = arith.constant 0 : index
    %c0_7 = arith.constant 0 : index
    %6 = vector.load %arg6[%c0_5, %c0_6, %c0_7] : memref<1x1x32xf32, #tpu.memory_space<vmem>>, vector<1x1x32xf32>
    %7 = vector.shape_cast %6 : vector<1x1x32xf32> to vector<1x32xf32>
    %cst = arith.constant dense<0.000000e+00> : vector<48xf32>
    %8 = vector.multi_reduction <add>, %3, %cst [1] : vector<48x32xf32> to vector<48xf32>
    %9 = vector.shape_cast %8 : vector<48xf32> to vector<48x1xf32>
    %cst_8 = arith.constant 3.200000e+01 : f32
    %10 = vector.broadcast %cst_8 : f32 to vector<48x1xf32>
    %11 = arith.divf %9, %10 : vector<48x1xf32>
    %12 = vector.broadcast %11 : vector<48x1xf32> to vector<48x32xf32>
    %13 = arith.subf %3, %12 : vector<48x32xf32>
    %14 = arith.mulf %13, %13 : vector<48x32xf32>
    %cst_9 = arith.constant dense<0.000000e+00> : vector<48xf32>
    %15 = vector.multi_reduction <add>, %14, %cst_9 [1] : vector<48x32xf32> to vector<48xf32>
    %16 = vector.shape_cast %15 : vector<48xf32> to vector<48x1xf32>
    %cst_10 = arith.constant 3.200000e+01 : f32
    %17 = vector.broadcast %cst_10 : f32 to vector<48x1xf32>
    %18 = arith.divf %16, %17 : vector<48x1xf32>
    %19 = vector.broadcast %11 : vector<48x1xf32> to vector<48x32xf32>
    %20 = arith.subf %3, %19 : vector<48x32xf32>
    %cst_11 = arith.constant 9.99999974E-6 : f32
    %21 = vector.broadcast %cst_11 : f32 to vector<48x1xf32>
    %22 = arith.addf %18, %21 : vector<48x1xf32>
    %23 = math.rsqrt %22 : vector<48x1xf32>
    %24 = vector.broadcast %23 : vector<48x1xf32> to vector<48x32xf32>
    %25 = arith.mulf %20, %24 : vector<48x32xf32>
    %26 = vector.broadcast %5 : vector<1x32xf32> to vector<48x32xf32>
    %27 = arith.mulf %25, %26 : vector<48x32xf32>
    %28 = vector.broadcast %7 : vector<1x32xf32> to vector<48x32xf32>
    %29 = arith.addf %27, %28 : vector<48x32xf32>
    %30 = arith.truncf %29 : vector<48x32xf32> to vector<48x32xbf16>
    %c0_12 = arith.constant 0 : index
    %c0_13 = arith.constant 0 : index
    %c0_14 = arith.constant 0 : index
    %31 = vector.load %arg7[%c0_12, %c0_13, %c0_14] : memref<1x32x96xbf16, #tpu.memory_space<vmem>>, vector<1x32x96xbf16>
    %32 = vector.shape_cast %31 : vector<1x32x96xbf16> to vector<32x96xbf16>
    %cst_15 = arith.constant dense<0.000000e+00> : vector<48x96xf32>
    %33 = tpu.matmul %30, %32, %cst_15 {dimension_numbers = #tpu.dot_dimension_numbers<[1], [0], [0], [1], [0, 0, 1, 1], [], []>} : vector<48x32xbf16>, vector<32x96xbf16>, vector<48x96xf32> -> vector<48x96xf32>
    %c0_16 = arith.constant 0 : index
    %c0_17 = arith.constant 0 : index
    %c0_18 = arith.constant 0 : index
    %34 = vector.load %arg8[%c0_16, %c0_17, %c0_18] : memref<1x1x96xf32, #tpu.memory_space<vmem>>, vector<1x1x96xf32>
    %35 = vector.shape_cast %34 : vector<1x1x96xf32> to vector<1x96xf32>
    %36 = vector.broadcast %35 : vector<1x96xf32> to vector<48x96xf32>
    %37 = arith.addf %33, %36 : vector<48x96xf32>
    %38 = vector.extract_strided_slice %37 {offsets = [0, 0], sizes = [48, 32], strides = [1, 1]} : vector<48x96xf32> to vector<48x32xf32>
    %39 = vector.extract_strided_slice %37 {offsets = [0, 32], sizes = [48, 32], strides = [1, 1]} : vector<48x96xf32> to vector<48x32xf32>
    %40 = vector.extract_strided_slice %37 {offsets = [0, 64], sizes = [48, 32], strides = [1, 1]} : vector<48x96xf32> to vector<48x32xf32>
    %41 = tpu.iota {dimensions = array<i32: 1>} : vector<1x24xi32>
    %c17_i32 = arith.constant 17 : i32
    %42 = vector.broadcast %c17_i32 : i32 to vector<1x24xi32>
    %43 = arith.cmpi slt, %41, %42 : vector<1x24xi32>
    %44 = vector.extract_strided_slice %38 {offsets = [0, 0], sizes = [24, 8], strides = [1, 1]} : vector<48x32xf32> to vector<24x8xf32>
    %45 = arith.truncf %44 : vector<24x8xf32> to vector<24x8xbf16>
    %46 = vector.extract_strided_slice %39 {offsets = [0, 0], sizes = [24, 8], strides = [1, 1]} : vector<48x32xf32> to vector<24x8xf32>
    %47 = arith.truncf %46 : vector<24x8xf32> to vector<24x8xbf16>
    %48 = vector.extract_strided_slice %40 {offsets = [0, 0], sizes = [24, 8], strides = [1, 1]} : vector<48x32xf32> to vector<24x8xf32>
    %49 = arith.truncf %48 : vector<24x8xf32> to vector<24x8xbf16>
    "tpu.trace_start"() <{level = 10 : i32, message = "qd,kd->qk"}> : () -> ()
    %cst_19 = arith.constant dense<0.000000e+00> : vector<24x24xf32>
    %50 = tpu.matmul %45, %47, %cst_19 {dimension_numbers = #tpu.dot_dimension_numbers<[1], [1], [0], [0], [0, 0, 1, 0], [], []>} : vector<24x8xbf16>, vector<24x8xbf16>, vector<24x24xf32> -> vector<24x24xf32>
    %cst_20 = arith.constant -1.70141173E+38 : f32
    "tpu.trace_stop"() : () -> ()
    %51 = vector.shape_cast %43 : vector<1x24xi1> to vector<1x24xi1>
    %52 = vector.broadcast %51 : vector<1x24xi1> to vector<24x24xi1>
    %53 = vector.broadcast %cst_20 : f32 to vector<24x24xf32>
    %54 = arith.select %52, %50, %53 : vector<24x24xi1>, vector<24x24xf32>
    %cst_21 = arith.constant dense<0xFF800000> : vector<24xf32>
    %55 = vector.multi_reduction <maximumf>, %54, %cst_21 [1] : vector<24x24xf32> to vector<24xf32>
    %56 = vector.shape_cast %55 : vector<24xf32> to vector<24x1xf32>
    %57 = vector.broadcast %56 : vector<24x1xf32> to vector<24x24xf32>
    %58 = arith.subf %54, %57 : vector<24x24xf32>
    %59 = math.exp %58 : vector<24x24xf32>
    %cst_22 = arith.constant dense<0.000000e+00> : vector<24xf32>
    %60 = vector.multi_reduction <add>, %59, %cst_22 [1] : vector<24x24xf32> to vector<24xf32>
    %61 = vector.shape_cast %60 : vector<24xf32> to vector<24x1xf32>
    %62 = tpu.reciprocal %61 {approx = true} : vector<24x1xf32> -> vector<24x1xf32>
    %63 = vector.broadcast %62 : vector<24x1xf32> to vector<24x24xf32>
    %64 = arith.mulf %59, %63 : vector<24x24xf32>
    %65 = arith.truncf %64 : vector<24x24xf32> to vector<24x24xbf16>
    %cst_23 = arith.constant dense<0.000000e+00> : vector<24x8xf32>
    %66 = tpu.matmul %65, %49, %cst_23 {dimension_numbers = #tpu.dot_dimension_numbers<[1], [0], [0], [1], [0, 0, 1, 1], [], []>} : vector<24x24xbf16>, vector<24x8xbf16>, vector<24x8xf32> -> vector<24x8xf32>
    %c0_24 = arith.constant 0 : index
    %c0_25 = arith.constant 0 : index
    %67 = vector.load %arg23[%c0_24, %c0_25] : memref<48x32xf32, #tpu.memory_space<vmem>>, vector<24x8xf32>
    tpu.vector_store %arg23[%c0_24, %c0_25], %66 {strides = array<i32>} : memref<48x32xf32, #tpu.memory_space<vmem>>, vector<24x8xf32>,
    %68 = vector.extract_strided_slice %38 {offsets = [0, 8], sizes = [24, 8], strides = [1, 1]} : vector<48x32xf32> to vector<24x8xf32>
    %69 = arith.truncf %68 : vector<24x8xf32> to vector<24x8xbf16>
    %70 = vector.extract_strided_slice %39 {offsets = [0, 8], sizes = [24, 8], strides = [1, 1]} : vector<48x32xf32> to vector<24x8xf32>
    %71 = arith.truncf %70 : vector<24x8xf32> to vector<24x8xbf16>
    %72 = vector.extract_strided_slice %40 {offsets = [0, 8], sizes = [24, 8], strides = [1, 1]} : vector<48x32xf32> to vector<24x8xf32>
    %73 = arith.truncf %72 : vector<24x8xf32> to vector<24x8xbf16>
    "tpu.trace_start"() <{level = 10 : i32, message = "qd,kd->qk"}> : () -> ()
    %cst_26 = arith.constant dense<0.000000e+00> : vector<24x24xf32>
    %74 = tpu.matmul %69, %71, %cst_26 {dimension_numbers = #tpu.dot_dimension_numbers<[1], [1], [0], [0], [0, 0, 1, 0], [], []>} : vector<24x8xbf16>, vector<24x8xbf16>, vector<24x24xf32> -> vector<24x24xf32>
    %cst_27 = arith.constant -1.70141173E+38 : f32
    "tpu.trace_stop"() : () -> ()
    %75 = vector.shape_cast %43 : vector<1x24xi1> to vector<1x24xi1>
    %76 = vector.broadcast %75 : vector<1x24xi1> to vector<24x24xi1>
    %77 = vector.broadcast %cst_27 : f32 to vector<24x24xf32>
    %78 = arith.select %76, %74, %77 : vector<24x24xi1>, vector<24x24xf32>
    %cst_28 = arith.constant dense<0xFF800000> : vector<24xf32>
    %79 = vector.multi_reduction <maximumf>, %78, %cst_28 [1] : vector<24x24xf32> to vector<24xf32>
    %80 = vector.shape_cast %79 : vector<24xf32> to vector<24x1xf32>
    %81 = vector.broadcast %80 : vector<24x1xf32> to vector<24x24xf32>
    %82 = arith.subf %78, %81 : vector<24x24xf32>
    %83 = math.exp %82 : vector<24x24xf32>
    %cst_29 = arith.constant dense<0.000000e+00> : vector<24xf32>
    %84 = vector.multi_reduction <add>, %83, %cst_29 [1] : vector<24x24xf32> to vector<24xf32>
    %85 = vector.shape_cast %84 : vector<24xf32> to vector<24x1xf32>
    %86 = tpu.reciprocal %85 {approx = true} : vector<24x1xf32> -> vector<24x1xf32>
    %87 = vector.broadcast %86 : vector<24x1xf32> to vector<24x24xf32>
    %88 = arith.mulf %83, %87 : vector<24x24xf32>
    %89 = arith.truncf %88 : vector<24x24xf32> to vector<24x24xbf16>
    %cst_30 = arith.constant dense<0.000000e+00> : vector<24x8xf32>
    %90 = tpu.matmul %89, %73, %cst_30 {dimension_numbers = #tpu.dot_dimension_numbers<[1], [0], [0], [1], [0, 0, 1, 1], [], []>} : vector<24x24xbf16>, vector<24x8xbf16>, vector<24x8xf32> -> vector<24x8xf32>
    %c0_31 = arith.constant 0 : index
    %c8 = arith.constant 8 : index
    %91 = vector.load %arg23[%c0_31, %c8] : memref<48x32xf32, #tpu.memory_space<vmem>>, vector<24x8xf32>
    tpu.vector_store %arg23[%c0_31, %c8], %90 {strides = array<i32>} : memref<48x32xf32, #tpu.memory_space<vmem>>, vector<24x8xf32>,
    %92 = vector.extract_strided_slice %38 {offsets = [0, 16], sizes = [24, 8], strides = [1, 1]} : vector<48x32xf32> to vector<24x8xf32>
    %93 = arith.truncf %92 : vector<24x8xf32> to vector<24x8xbf16>
    %94 = vector.extract_strided_slice %39 {offsets = [0, 16], sizes = [24, 8], strides = [1, 1]} : vector<48x32xf32> to vector<24x8xf32>
    %95 = arith.truncf %94 : vector<24x8xf32> to vector<24x8xbf16>
    %96 = vector.extract_strided_slice %40 {offsets = [0, 16], sizes = [24, 8], strides = [1, 1]} : vector<48x32xf32> to vector<24x8xf32>
    %97 = arith.truncf %96 : vector<24x8xf32> to vector<24x8xbf16>
    "tpu.trace_start"() <{level = 10 : i32, message = "qd,kd->qk"}> : () -> ()
    %cst_32 = arith.constant dense<0.000000e+00> : vector<24x24xf32>
    %98 = tpu.matmul %93, %95, %cst_32 {dimension_numbers = #tpu.dot_dimension_numbers<[1], [1], [0], [0], [0, 0, 1, 0], [], []>} : vector<24x8xbf16>, vector<24x8xbf16>, vector<24x24xf32> -> vector<24x24xf32>
    %cst_33 = arith.constant -1.70141173E+38 : f32
    "tpu.trace_stop"() : () -> ()
    %99 = vector.shape_cast %43 : vector<1x24xi1> to vector<1x24xi1>
    %100 = vector.broadcast %99 : vector<1x24xi1> to vector<24x24xi1>
    %101 = vector.broadcast %cst_33 : f32 to vector<24x24xf32>
    %102 = arith.select %100, %98, %101 : vector<24x24xi1>, vector<24x24xf32>
    %cst_34 = arith.constant dense<0xFF800000> : vector<24xf32>
    %103 = vector.multi_reduction <maximumf>, %102, %cst_34 [1] : vector<24x24xf32> to vector<24xf32>
    %104 = vector.shape_cast %103 : vector<24xf32> to vector<24x1xf32>
    %105 = vector.broadcast %104 : vector<24x1xf32> to vector<24x24xf32>
    %106 = arith.subf %102, %105 : vector<24x24xf32>
    %107 = math.exp %106 : vector<24x24xf32>
    %cst_35 = arith.constant dense<0.000000e+00> : vector<24xf32>
    %108 = vector.multi_reduction <add>, %107, %cst_35 [1] : vector<24x24xf32> to vector<24xf32>
    %109 = vector.shape_cast %108 : vector<24xf32> to vector<24x1xf32>
    %110 = tpu.reciprocal %109 {approx = true} : vector<24x1xf32> -> vector<24x1xf32>
    %111 = vector.broadcast %110 : vector<24x1xf32> to vector<24x24xf32>
    %112 = arith.mulf %107, %111 : vector<24x24xf32>
    %113 = arith.truncf %112 : vector<24x24xf32> to vector<24x24xbf16>
    %cst_36 = arith.constant dense<0.000000e+00> : vector<24x8xf32>
    %114 = tpu.matmul %113, %97, %cst_36 {dimension_numbers = #tpu.dot_dimension_numbers<[1], [0], [0], [1], [0, 0, 1, 1], [], []>} : vector<24x24xbf16>, vector<24x8xbf16>, vector<24x8xf32> -> vector<24x8xf32>
    %c0_37 = arith.constant 0 : index
    %c16 = arith.constant 16 : index
    %115 = vector.load %arg23[%c0_37, %c16] : memref<48x32xf32, #tpu.memory_space<vmem>>, vector<24x8xf32>
    tpu.vector_store %arg23[%c0_37, %c16], %114 {strides = array<i32>} : memref<48x32xf32, #tpu.memory_space<vmem>>, vector<24x8xf32>,
    %116 = vector.extract_strided_slice %38 {offsets = [0, 24], sizes = [24, 8], strides = [1, 1]} : vector<48x32xf32> to vector<24x8xf32>
    %117 = arith.truncf %116 : vector<24x8xf32> to vector<24x8xbf16>
    %118 = vector.extract_strided_slice %39 {offsets = [0, 24], sizes = [24, 8], strides = [1, 1]} : vector<48x32xf32> to vector<24x8xf32>
    %119 = arith.truncf %118 : vector<24x8xf32> to vector<24x8xbf16>
    %120 = vector.extract_strided_slice %40 {offsets = [0, 24], sizes = [24, 8], strides = [1, 1]} : vector<48x32xf32> to vector<24x8xf32>
    %121 = arith.truncf %120 : vector<24x8xf32> to vector<24x8xbf16>
    "tpu.trace_start"() <{level = 10 : i32, message = "qd,kd->qk"}> : () -> ()
    %cst_38 = arith.constant dense<0.000000e+00> : vector<24x24xf32>
    %122 = tpu.matmul %117, %119, %cst_38 {dimension_numbers = #tpu.dot_dimension_numbers<[1], [1], [0], [0], [0, 0, 1, 0], [], []>} : vector<24x8xbf16>, vector<24x8xbf16>, vector<24x24xf32> -> vector<24x24xf32>
    %cst_39 = arith.constant -1.70141173E+38 : f32
    "tpu.trace_stop"() : () -> ()
    %123 = vector.shape_cast %43 : vector<1x24xi1> to vector<1x24xi1>
    %124 = vector.broadcast %123 : vector<1x24xi1> to vector<24x24xi1>
    %125 = vector.broadcast %cst_39 : f32 to vector<24x24xf32>
    %126 = arith.select %124, %122, %125 : vector<24x24xi1>, vector<24x24xf32>
    %cst_40 = arith.constant dense<0xFF800000> : vector<24xf32>
    %127 = vector.multi_reduction <maximumf>, %126, %cst_40 [1] : vector<24x24xf32> to vector<24xf32>
    %128 = vector.shape_cast %127 : vector<24xf32> to vector<24x1xf32>
    %129 = vector.broadcast %128 : vector<24x1xf32> to vector<24x24xf32>
    %130 = arith.subf %126, %129 : vector<24x24xf32>
    %131 = math.exp %130 : vector<24x24xf32>
    %cst_41 = arith.constant dense<0.000000e+00> : vector<24xf32>
    %132 = vector.multi_reduction <add>, %131, %cst_41 [1] : vector<24x24xf32> to vector<24xf32>
    %133 = vector.shape_cast %132 : vector<24xf32> to vector<24x1xf32>
    %134 = tpu.reciprocal %133 {approx = true} : vector<24x1xf32> -> vector<24x1xf32>
    %135 = vector.broadcast %134 : vector<24x1xf32> to vector<24x24xf32>
    %136 = arith.mulf %131, %135 : vector<24x24xf32>
    %137 = arith.truncf %136 : vector<24x24xf32> to vector<24x24xbf16>
    %cst_42 = arith.constant dense<0.000000e+00> : vector<24x8xf32>
    %138 = tpu.matmul %137, %121, %cst_42 {dimension_numbers = #tpu.dot_dimension_numbers<[1], [0], [0], [1], [0, 0, 1, 1], [], []>} : vector<24x24xbf16>, vector<24x8xbf16>, vector<24x8xf32> -> vector<24x8xf32>
    %c0_43 = arith.constant 0 : index
    %c24 = arith.constant 24 : index
    %139 = vector.load %arg23[%c0_43, %c24] : memref<48x32xf32, #tpu.memory_space<vmem>>, vector<24x8xf32>
    tpu.vector_store %arg23[%c0_43, %c24], %138 {strides = array<i32>} : memref<48x32xf32, #tpu.memory_space<vmem>>, vector<24x8xf32>,
    %140 = vector.extract_strided_slice %38 {offsets = [24, 0], sizes = [24, 8], strides = [1, 1]} : vector<48x32xf32> to vector<24x8xf32>
    %141 = arith.truncf %140 : vector<24x8xf32> to vector<24x8xbf16>
    %142 = vector.extract_strided_slice %39 {offsets = [24, 0], sizes = [24, 8], strides = [1, 1]} : vector<48x32xf32> to vector<24x8xf32>
    %143 = arith.truncf %142 : vector<24x8xf32> to vector<24x8xbf16>
    %144 = vector.extract_strided_slice %40 {offsets = [24, 0], sizes = [24, 8], strides = [1, 1]} : vector<48x32xf32> to vector<24x8xf32>
    %145 = arith.truncf %144 : vector<24x8xf32> to vector<24x8xbf16>
    "tpu.trace_start"() <{level = 10 : i32, message = "qd,kd->qk"}> : () -> ()
    %cst_44 = arith.constant dense<0.000000e+00> : vector<24x24xf32>
    %146 = tpu.matmul %141, %143, %cst_44 {dimension_numbers = #tpu.dot_dimension_numbers<[1], [1], [0], [0], [0, 0, 1, 0], [], []>} : vector<24x8xbf16>, vector<24x8xbf16>, vector<24x24xf32> -> vector<24x24xf32>
    %cst_45 = arith.constant -1.70141173E+38 : f32
    "tpu.trace_stop"() : () -> ()
    %147 = vector.shape_cast %43 : vector<1x24xi1> to vector<1x24xi1>
    %148 = vector.broadcast %147 : vector<1x24xi1> to vector<24x24xi1>
    %149 = vector.broadcast %cst_45 : f32 to vector<24x24xf32>
    %150 = arith.select %148, %146, %149 : vector<24x24xi1>, vector<24x24xf32>
    %cst_46 = arith.constant dense<0xFF800000> : vector<24xf32>
    %151 = vector.multi_reduction <maximumf>, %150, %cst_46 [1] : vector<24x24xf32> to vector<24xf32>
    %152 = vector.shape_cast %151 : vector<24xf32> to vector<24x1xf32>
    %153 = vector.broadcast %152 : vector<24x1xf32> to vector<24x24xf32>
    %154 = arith.subf %150, %153 : vector<24x24xf32>
    %155 = math.exp %154 : vector<24x24xf32>
    %cst_47 = arith.constant dense<0.000000e+00> : vector<24xf32>
    %156 = vector.multi_reduction <add>, %155, %cst_47 [1] : vector<24x24xf32> to vector<24xf32>
    %157 = vector.shape_cast %156 : vector<24xf32> to vector<24x1xf32>
    %158 = tpu.reciprocal %157 {approx = true} : vector<24x1xf32> -> vector<24x1xf32>
    %159 = vector.broadcast %158 : vector<24x1xf32> to vector<24x24xf32>
    %160 = arith.mulf %155, %159 : vector<24x24xf32>
    %161 = arith.truncf %160 : vector<24x24xf32> to vector<24x24xbf16>
    %cst_48 = arith.constant dense<0.000000e+00> : vector<24x8xf32>
    %162 = tpu.matmul %161, %145, %cst_48 {dimension_numbers = #tpu.dot_dimension_numbers<[1], [0], [0], [1], [0, 0, 1, 1], [], []>} : vector<24x24xbf16>, vector<24x8xbf16>, vector<24x8xf32> -> vector<24x8xf32>
    %c24_49 = arith.constant 24 : index
    %c0_50 = arith.constant 0 : index
    %163 = vector.load %arg23[%c24_49, %c0_50] : memref<48x32xf32, #tpu.memory_space<vmem>>, vector<24x8xf32>
    tpu.vector_store %arg23[%c24_49, %c0_50], %162 {strides = array<i32>} : memref<48x32xf32, #tpu.memory_space<vmem>>, vector<24x8xf32>,
    %164 = vector.extract_strided_slice %38 {offsets = [24, 8], sizes = [24, 8], strides = [1, 1]} : vector<48x32xf32> to vector<24x8xf32>
    %165 = arith.truncf %164 : vector<24x8xf32> to vector<24x8xbf16>
    %166 = vector.extract_strided_slice %39 {offsets = [24, 8], sizes = [24, 8], strides = [1, 1]} : vector<48x32xf32> to vector<24x8xf32>
    %167 = arith.truncf %166 : vector<24x8xf32> to vector<24x8xbf16>
    %168 = vector.extract_strided_slice %40 {offsets = [24, 8], sizes = [24, 8], strides = [1, 1]} : vector<48x32xf32> to vector<24x8xf32>
    %169 = arith.truncf %168 : vector<24x8xf32> to vector<24x8xbf16>
    "tpu.trace_start"() <{level = 10 : i32, message = "qd,kd->qk"}> : () -> ()
    %cst_51 = arith.constant dense<0.000000e+00> : vector<24x24xf32>
    %170 = tpu.matmul %165, %167, %cst_51 {dimension_numbers = #tpu.dot_dimension_numbers<[1], [1], [0], [0], [0, 0, 1, 0], [], []>} : vector<24x8xbf16>, vector<24x8xbf16>, vector<24x24xf32> -> vector<24x24xf32>
    %cst_52 = arith.constant -1.70141173E+38 : f32
    "tpu.trace_stop"() : () -> ()
    %171 = vector.shape_cast %43 : vector<1x24xi1> to vector<1x24xi1>
    %172 = vector.broadcast %171 : vector<1x24xi1> to vector<24x24xi1>
    %173 = vector.broadcast %cst_52 : f32 to vector<24x24xf32>
    %174 = arith.select %172, %170, %173 : vector<24x24xi1>, vector<24x24xf32>
    %cst_53 = arith.constant dense<0xFF800000> : vector<24xf32>
    %175 = vector.multi_reduction <maximumf>, %174, %cst_53 [1] : vector<24x24xf32> to vector<24xf32>
    %176 = vector.shape_cast %175 : vector<24xf32> to vector<24x1xf32>
    %177 = vector.broadcast %176 : vector<24x1xf32> to vector<24x24xf32>
    %178 = arith.subf %174, %177 : vector<24x24xf32>
    %179 = math.exp %178 : vector<24x24xf32>
    %cst_54 = arith.constant dense<0.000000e+00> : vector<24xf32>
    %180 = vector.multi_reduction <add>, %179, %cst_54 [1] : vector<24x24xf32> to vector<24xf32>
    %181 = vector.shape_cast %180 : vector<24xf32> to vector<24x1xf32>
    %182 = tpu.reciprocal %181 {approx = true} : vector<24x1xf32> -> vector<24x1xf32>
    %183 = vector.broadcast %182 : vector<24x1xf32> to vector<24x24xf32>
    %184 = arith.mulf %179, %183 : vector<24x24xf32>
    %185 = arith.truncf %184 : vector<24x24xf32> to vector<24x24xbf16>
    %cst_55 = arith.constant dense<0.000000e+00> : vector<24x8xf32>
    %186 = tpu.matmul %185, %169, %cst_55 {dimension_numbers = #tpu.dot_dimension_numbers<[1], [0], [0], [1], [0, 0, 1, 1], [], []>} : vector<24x24xbf16>, vector<24x8xbf16>, vector<24x8xf32> -> vector<24x8xf32>
    %c24_56 = arith.constant 24 : index
    %c8_57 = arith.constant 8 : index
    %187 = vector.load %arg23[%c24_56, %c8_57] : memref<48x32xf32, #tpu.memory_space<vmem>>, vector<24x8xf32>
    tpu.vector_store %arg23[%c24_56, %c8_57], %186 {strides = array<i32>} : memref<48x32xf32, #tpu.memory_space<vmem>>, vector<24x8xf32>,
    %188 = vector.extract_strided_slice %38 {offsets = [24, 16], sizes = [24, 8], strides = [1, 1]} : vector<48x32xf32> to vector<24x8xf32>
    %189 = arith.truncf %188 : vector<24x8xf32> to vector<24x8xbf16>
    %190 = vector.extract_strided_slice %39 {offsets = [24, 16], sizes = [24, 8], strides = [1, 1]} : vector<48x32xf32> to vector<24x8xf32>
    %191 = arith.truncf %190 : vector<24x8xf32> to vector<24x8xbf16>
    %192 = vector.extract_strided_slice %40 {offsets = [24, 16], sizes = [24, 8], strides = [1, 1]} : vector<48x32xf32> to vector<24x8xf32>
    %193 = arith.truncf %192 : vector<24x8xf32> to vector<24x8xbf16>
    "tpu.trace_start"() <{level = 10 : i32, message = "qd,kd->qk"}> : () -> ()
    %cst_58 = arith.constant dense<0.000000e+00> : vector<24x24xf32>
    %194 = tpu.matmul %189, %191, %cst_58 {dimension_numbers = #tpu.dot_dimension_numbers<[1], [1], [0], [0], [0, 0, 1, 0], [], []>} : vector<24x8xbf16>, vector<24x8xbf16>, vector<24x24xf32> -> vector<24x24xf32>
    %cst_59 = arith.constant -1.70141173E+38 : f32
    "tpu.trace_stop"() : () -> ()
    %195 = vector.shape_cast %43 : vector<1x24xi1> to vector<1x24xi1>
    %196 = vector.broadcast %195 : vector<1x24xi1> to vector<24x24xi1>
    %197 = vector.broadcast %cst_59 : f32 to vector<24x24xf32>
    %198 = arith.select %196, %194, %197 : vector<24x24xi1>, vector<24x24xf32>
    %cst_60 = arith.constant dense<0xFF800000> : vector<24xf32>
    %199 = vector.multi_reduction <maximumf>, %198, %cst_60 [1] : vector<24x24xf32> to vector<24xf32>
    %200 = vector.shape_cast %199 : vector<24xf32> to vector<24x1xf32>
    %201 = vector.broadcast %200 : vector<24x1xf32> to vector<24x24xf32>
    %202 = arith.subf %198, %201 : vector<24x24xf32>
    %203 = math.exp %202 : vector<24x24xf32>
    %cst_61 = arith.constant dense<0.000000e+00> : vector<24xf32>
    %204 = vector.multi_reduction <add>, %203, %cst_61 [1] : vector<24x24xf32> to vector<24xf32>
    %205 = vector.shape_cast %204 : vector<24xf32> to vector<24x1xf32>
    %206 = tpu.reciprocal %205 {approx = true} : vector<24x1xf32> -> vector<24x1xf32>
    %207 = vector.broadcast %206 : vector<24x1xf32> to vector<24x24xf32>
    %208 = arith.mulf %203, %207 : vector<24x24xf32>
    %209 = arith.truncf %208 : vector<24x24xf32> to vector<24x24xbf16>
    %cst_62 = arith.constant dense<0.000000e+00> : vector<24x8xf32>
    %210 = tpu.matmul %209, %193, %cst_62 {dimension_numbers = #tpu.dot_dimension_numbers<[1], [0], [0], [1], [0, 0, 1, 1], [], []>} : vector<24x24xbf16>, vector<24x8xbf16>, vector<24x8xf32> -> vector<24x8xf32>
    %c24_63 = arith.constant 24 : index
    %c16_64 = arith.constant 16 : index
    %211 = vector.load %arg23[%c24_63, %c16_64] : memref<48x32xf32, #tpu.memory_space<vmem>>, vector<24x8xf32>
    tpu.vector_store %arg23[%c24_63, %c16_64], %210 {strides = array<i32>} : memref<48x32xf32, #tpu.memory_space<vmem>>, vector<24x8xf32>,
    %212 = vector.extract_strided_slice %38 {offsets = [24, 24], sizes = [24, 8], strides = [1, 1]} : vector<48x32xf32> to vector<24x8xf32>
    %213 = arith.truncf %212 : vector<24x8xf32> to vector<24x8xbf16>
    %214 = vector.extract_strided_slice %39 {offsets = [24, 24], sizes = [24, 8], strides = [1, 1]} : vector<48x32xf32> to vector<24x8xf32>
    %215 = arith.truncf %214 : vector<24x8xf32> to vector<24x8xbf16>
    %216 = vector.extract_strided_slice %40 {offsets = [24, 24], sizes = [24, 8], strides = [1, 1]} : vector<48x32xf32> to vector<24x8xf32>
    %217 = arith.truncf %216 : vector<24x8xf32> to vector<24x8xbf16>
    "tpu.trace_start"() <{level = 10 : i32, message = "qd,kd->qk"}> : () -> ()
    %cst_65 = arith.constant dense<0.000000e+00> : vector<24x24xf32>
    %218 = tpu.matmul %213, %215, %cst_65 {dimension_numbers = #tpu.dot_dimension_numbers<[1], [1], [0], [0], [0, 0, 1, 0], [], []>} : vector<24x8xbf16>, vector<24x8xbf16>, vector<24x24xf32> -> vector<24x24xf32>
    %cst_66 = arith.constant -1.70141173E+38 : f32
    "tpu.trace_stop"() : () -> ()
    %219 = vector.shape_cast %43 : vector<1x24xi1> to vector<1x24xi1>
    %220 = vector.broadcast %219 : vector<1x24xi1> to vector<24x24xi1>
    %221 = vector.broadcast %cst_66 : f32 to vector<24x24xf32>
    %222 = arith.select %220, %218, %221 : vector<24x24xi1>, vector<24x24xf32>
    %cst_67 = arith.constant dense<0xFF800000> : vector<24xf32>
    %223 = vector.multi_reduction <maximumf>, %222, %cst_67 [1] : vector<24x24xf32> to vector<24xf32>
    %224 = vector.shape_cast %223 : vector<24xf32> to vector<24x1xf32>
    %225 = vector.broadcast %224 : vector<24x1xf32> to vector<24x24xf32>
    %226 = arith.subf %222, %225 : vector<24x24xf32>
    %227 = math.exp %226 : vector<24x24xf32>
    %cst_68 = arith.constant dense<0.000000e+00> : vector<24xf32>
    %228 = vector.multi_reduction <add>, %227, %cst_68 [1] : vector<24x24xf32> to vector<24xf32>
    %229 = vector.shape_cast %228 : vector<24xf32> to vector<24x1xf32>
    %230 = tpu.reciprocal %229 {approx = true} : vector<24x1xf32> -> vector<24x1xf32>
    %231 = vector.broadcast %230 : vector<24x1xf32> to vector<24x24xf32>
    %232 = arith.mulf %227, %231 : vector<24x24xf32>
    %233 = arith.truncf %232 : vector<24x24xf32> to vector<24x24xbf16>
    %cst_69 = arith.constant dense<0.000000e+00> : vector<24x8xf32>
    %234 = tpu.matmul %233, %217, %cst_69 {dimension_numbers = #tpu.dot_dimension_numbers<[1], [0], [0], [1], [0, 0, 1, 1], [], []>} : vector<24x24xbf16>, vector<24x8xbf16>, vector<24x8xf32> -> vector<24x8xf32>
    %c24_70 = arith.constant 24 : index
    %c24_71 = arith.constant 24 : index
    %235 = vector.load %arg23[%c24_70, %c24_71] : memref<48x32xf32, #tpu.memory_space<vmem>>, vector<24x8xf32>
    tpu.vector_store %arg23[%c24_70, %c24_71], %234 {strides = array<i32>} : memref<48x32xf32, #tpu.memory_space<vmem>>, vector<24x8xf32>,
    %c0_72 = arith.constant 0 : index
    %c0_73 = arith.constant 0 : index
    %236 = vector.load %arg23[%c0_72, %c0_73] : memref<48x32xf32, #tpu.memory_space<vmem>>, vector<48x32xf32>
    %237 = arith.truncf %236 : vector<48x32xf32> to vector<48x32xbf16>
    %c0_74 = arith.constant 0 : index
    %c0_75 = arith.constant 0 : index
    %c0_76 = arith.constant 0 : index
    %238 = vector.load %arg9[%c0_74, %c0_75, %c0_76] : memref<1x32x32xbf16, #tpu.memory_space<vmem>>, vector<1x32x32xbf16>
    %239 = vector.shape_cast %238 : vector<1x32x32xbf16> to vector<32x32xbf16>
    %cst_77 = arith.constant dense<0.000000e+00> : vector<48x32xf32>
    %240 = tpu.matmul %237, %239, %cst_77 {dimension_numbers = #tpu.dot_dimension_numbers<[1], [0], [0], [1], [0, 0, 1, 1], [], []>} : vector<48x32xbf16>, vector<32x32xbf16>, vector<48x32xf32> -> vector<48x32xf32>
    %c0_78 = arith.constant 0 : index
    %c0_79 = arith.constant 0 : index
    %c0_80 = arith.constant 0 : index
    %241 = vector.load %arg10[%c0_78, %c0_79, %c0_80] : memref<1x1x32xf32, #tpu.memory_space<vmem>>, vector<1x1x32xf32>
    %242 = vector.shape_cast %241 : vector<1x1x32xf32> to vector<1x32xf32>
    %243 = vector.broadcast %242 : vector<1x32xf32> to vector<48x32xf32>
    %244 = arith.addf %240, %243 : vector<48x32xf32>
    %245 = arith.addf %3, %244 : vector<48x32xf32>
    %c0_81 = arith.constant 0 : index
    %c0_82 = arith.constant 0 : index
    %c0_83 = arith.constant 0 : index
    %246 = vector.load %arg11[%c0_81, %c0_82, %c0_83] : memref<1x1x32xf32, #tpu.memory_space<vmem>>, vector<1x1x32xf32>
    %247 = vector.shape_cast %246 : vector<1x1x32xf32> to vector<1x32xf32>
    %c0_84 = arith.constant 0 : index
    %c0_85 = arith.constant 0 : index
    %c0_86 = arith.constant 0 : index
    %248 = vector.load %arg12[%c0_84, %c0_85, %c0_86] : memref<1x1x32xf32, #tpu.memory_space<vmem>>, vector<1x1x32xf32>
    %249 = vector.shape_cast %248 : vector<1x1x32xf32> to vector<1x32xf32>
    %cst_87 = arith.constant dense<0.000000e+00> : vector<48xf32>
    %250 = vector.multi_reduction <add>, %245, %cst_87 [1] : vector<48x32xf32> to vector<48xf32>
    %251 = vector.shape_cast %250 : vector<48xf32> to vector<48x1xf32>
    %cst_88 = arith.constant 3.200000e+01 : f32
    %252 = vector.broadcast %cst_88 : f32 to vector<48x1xf32>
    %253 = arith.divf %251, %252 : vector<48x1xf32>
    %254 = vector.broadcast %253 : vector<48x1xf32> to vector<48x32xf32>
    %255 = arith.subf %245, %254 : vector<48x32xf32>
    %256 = arith.mulf %255, %255 : vector<48x32xf32>
    %cst_89 = arith.constant dense<0.000000e+00> : vector<48xf32>
    %257 = vector.multi_reduction <add>, %256, %cst_89 [1] : vector<48x32xf32> to vector<48xf32>
    %258 = vector.shape_cast %257 : vector<48xf32> to vector<48x1xf32>
    %cst_90 = arith.constant 3.200000e+01 : f32
    %259 = vector.broadcast %cst_90 : f32 to vector<48x1xf32>
    %260 = arith.divf %258, %259 : vector<48x1xf32>
    %261 = vector.broadcast %253 : vector<48x1xf32> to vector<48x32xf32>
    %262 = arith.subf %245, %261 : vector<48x32xf32>
    %cst_91 = arith.constant 9.99999974E-6 : f32
    %263 = vector.broadcast %cst_91 : f32 to vector<48x1xf32>
    %264 = arith.addf %260, %263 : vector<48x1xf32>
    %265 = math.rsqrt %264 : vector<48x1xf32>
    %266 = vector.broadcast %265 : vector<48x1xf32> to vector<48x32xf32>
    %267 = arith.mulf %262, %266 : vector<48x32xf32>
    %268 = vector.broadcast %247 : vector<1x32xf32> to vector<48x32xf32>
    %269 = arith.mulf %267, %268 : vector<48x32xf32>
    %270 = vector.broadcast %249 : vector<1x32xf32> to vector<48x32xf32>
    %271 = arith.addf %269, %270 : vector<48x32xf32>
    %272 = arith.truncf %271 : vector<48x32xf32> to vector<48x32xbf16>
    %c0_92 = arith.constant 0 : index
    %c0_93 = arith.constant 0 : index
    %c0_94 = arith.constant 0 : index
    %273 = vector.load %arg13[%c0_92, %c0_93, %c0_94] : memref<1x32x128xbf16, #tpu.memory_space<vmem>>, vector<1x32x128xbf16>
    %274 = vector.shape_cast %273 : vector<1x32x128xbf16> to vector<32x128xbf16>
    %cst_95 = arith.constant dense<0.000000e+00> : vector<48x128xf32>
    %275 = tpu.matmul %272, %274, %cst_95 {dimension_numbers = #tpu.dot_dimension_numbers<[1], [0], [0], [1], [0, 0, 1, 1], [], []>} : vector<48x32xbf16>, vector<32x128xbf16>, vector<48x128xf32> -> vector<48x128xf32>
    %c0_96 = arith.constant 0 : index
    %c0_97 = arith.constant 0 : index
    %c0_98 = arith.constant 0 : index
    %276 = vector.load %arg14[%c0_96, %c0_97, %c0_98] : memref<1x1x128xf32, #tpu.memory_space<vmem>>, vector<1x1x128xf32>
    %277 = vector.shape_cast %276 : vector<1x1x128xf32> to vector<1x128xf32>
    %278 = vector.broadcast %277 : vector<1x128xf32> to vector<48x128xf32>
    %279 = arith.addf %275, %278 : vector<48x128xf32>
    %cst_99 = arith.constant 5.000000e-01 : f32
    %280 = vector.broadcast %cst_99 : f32 to vector<48x128xf32>
    %281 = arith.mulf %280, %279 : vector<48x128xf32>
    %cst_100 = arith.constant 4.471500e-02 : f32
    %282 = vector.broadcast %cst_100 : f32 to vector<48x128xf32>
    %283 = arith.mulf %282, %279 : vector<48x128xf32>
    %284 = arith.mulf %283, %279 : vector<48x128xf32>
    %285 = arith.mulf %284, %279 : vector<48x128xf32>
    %286 = arith.addf %279, %285 : vector<48x128xf32>
    %cst_101 = arith.constant 0.797884583 : f32
    %287 = vector.broadcast %cst_101 : f32 to vector<48x128xf32>
    %288 = arith.mulf %287, %286 : vector<48x128xf32>
    %289 = math.tanh %288 : vector<48x128xf32>
    %cst_102 = arith.constant 1.000000e+00 : f32
    %290 = vector.broadcast %cst_102 : f32 to vector<48x128xf32>
    %291 = arith.addf %290, %289 : vector<48x128xf32>
    %292 = arith.mulf %281, %291 : vector<48x128xf32>
    %293 = arith.truncf %292 : vector<48x128xf32> to vector<48x128xbf16>
    %c0_103 = arith.constant 0 : index
    %c0_104 = arith.constant 0 : index
    %c0_105 = arith.constant 0 : index
    %294 = vector.load %arg15[%c0_103, %c0_104, %c0_105] : memref<1x128x32xbf16, #tpu.memory_space<vmem>>, vector<1x128x32xbf16>
    %295 = vector.shape_cast %294 : vector<1x128x32xbf16> to vector<128x32xbf16>
    %cst_106 = arith.constant dense<0.000000e+00> : vector<48x32xf32>
    %296 = tpu.matmul %293, %295, %cst_106 {dimension_numbers = #tpu.dot_dimension_numbers<[1], [0], [0], [1], [0, 0, 1, 1], [], []>} : vector<48x128xbf16>, vector<128x32xbf16>, vector<48x32xf32> -> vector<48x32xf32>
    %c0_107 = arith.constant 0 : index
    %c0_108 = arith.constant 0 : index
    %c0_109 = arith.constant 0 : index
    %297 = vector.load %arg16[%c0_107, %c0_108, %c0_109] : memref<1x1x32xf32, #tpu.memory_space<vmem>>, vector<1x1x32xf32>
    %298 = vector.shape_cast %297 : vector<1x1x32xf32> to vector<1x32xf32>
    %299 = vector.broadcast %298 : vector<1x32xf32> to vector<48x32xf32>
    %300 = arith.addf %296, %299 : vector<48x32xf32>
    %301 = arith.addf %245, %300 : vector<48x32xf32>
    %c0_110 = arith.constant 0 : index
    %c0_111 = arith.constant 0 : index
    %302 = vector.load %arg22[%c0_110, %c0_111] : memref<48x32xf32, #tpu.memory_space<vmem>>, vector<48x32xf32>
    tpu.vector_store %arg22[%c0_110, %c0_111], %301 {strides = array<i32>} : memref<48x32xf32, #tpu.memory_space<vmem>>, vector<48x32xf32>,
    %c1_i32 = arith.constant 1 : i32
    %303 = arith.cmpi eq, %arg1, %c1_i32 : i32
    %304 = arith.extui %303 : i1 to i32
    %c0_i32_112 = arith.constant 0 : i32
    %305 = arith.cmpi ne, %304, %c0_i32_112 : i32
    scf.if %305 {
      %306 = vector.extract_strided_slice %301 {offsets = [0, 0], sizes = [1, 32], strides = [1, 1]} : vector<48x32xf32> to vector<1x32xf32>
      %c0_113 = arith.constant 0 : index
      %c0_114 = arith.constant 0 : index
      %307 = vector.load %arg17[%c0_113, %c0_114] : memref<1x32xf32, #tpu.memory_space<vmem>>, vector<1x32xf32>
      %c0_115 = arith.constant 0 : index
      %c0_116 = arith.constant 0 : index
      %308 = vector.load %arg18[%c0_115, %c0_116] : memref<1x32xf32, #tpu.memory_space<vmem>>, vector<1x32xf32>
      %cst_117 = arith.constant dense<0.000000e+00> : vector<1xf32>
      %309 = vector.multi_reduction <add>, %306, %cst_117 [1] : vector<1x32xf32> to vector<1xf32>
      %310 = vector.shape_cast %309 : vector<1xf32> to vector<1x1xf32>
      %cst_118 = arith.constant 3.200000e+01 : f32
      %311 = vector.broadcast %cst_118 : f32 to vector<1x1xf32>
      %312 = arith.divf %310, %311 : vector<1x1xf32>
      %313 = vector.broadcast %312 : vector<1x1xf32> to vector<1x32xf32>
      %314 = arith.subf %306, %313 : vector<1x32xf32>
      %315 = arith.mulf %314, %314 : vector<1x32xf32>
      %cst_119 = arith.constant dense<0.000000e+00> : vector<1xf32>
      %316 = vector.multi_reduction <add>, %315, %cst_119 [1] : vector<1x32xf32> to vector<1xf32>
      %317 = vector.shape_cast %316 : vector<1xf32> to vector<1x1xf32>
      %cst_120 = arith.constant 3.200000e+01 : f32
      %318 = vector.broadcast %cst_120 : f32 to vector<1x1xf32>
      %319 = arith.divf %317, %318 : vector<1x1xf32>
      %320 = vector.broadcast %312 : vector<1x1xf32> to vector<1x32xf32>
      %321 = arith.subf %306, %320 : vector<1x32xf32>
      %cst_121 = arith.constant 9.99999974E-6 : f32
      %322 = vector.broadcast %cst_121 : f32 to vector<1x1xf32>
      %323 = arith.addf %319, %322 : vector<1x1xf32>
      %324 = math.rsqrt %323 : vector<1x1xf32>
      %325 = vector.broadcast %324 : vector<1x1xf32> to vector<1x32xf32>
      %326 = arith.mulf %321, %325 : vector<1x32xf32>
      %327 = arith.mulf %326, %307 : vector<1x32xf32>
      %328 = arith.addf %327, %308 : vector<1x32xf32>
      %329 = arith.truncf %328 : vector<1x32xf32> to vector<1x32xbf16>
      %c0_122 = arith.constant 0 : index
      %c0_123 = arith.constant 0 : index
      %330 = vector.load %arg19[%c0_122, %c0_123] : memref<32x256xbf16, #tpu.memory_space<vmem>>, vector<32x256xbf16>
      %cst_124 = arith.constant dense<0.000000e+00> : vector<1x256xf32>
      %331 = tpu.matmul %329, %330, %cst_124 {dimension_numbers = #tpu.dot_dimension_numbers<[1], [0], [0], [1], [0, 0, 1, 1], [], []>} : vector<1x32xbf16>, vector<32x256xbf16>, vector<1x256xf32> -> vector<1x256xf32>
      %c0_125 = arith.constant 0 : index
      %c0_126 = arith.constant 0 : index
      %332 = vector.load %arg20[%c0_125, %c0_126] : memref<1x256xf32, #tpu.memory_space<vmem>>, vector<1x256xf32>
      %333 = arith.addf %331, %332 : vector<1x256xf32>
      %c0_127 = arith.constant 0 : index
      %c0_128 = arith.constant 0 : index
      %c0_129 = arith.constant 0 : index
      %334 = vector.load %arg21[%c0_127, %c0_128, %c0_129] : memref<2x1x256xf32, #tpu.memory_space<vmem>>, vector<1x1x256xf32>
      %335 = vector.shape_cast %334 : vector<1x1x256xf32> to vector<1x256xf32>
      %336 = vector.shape_cast %333 : vector<1x256xf32> to vector<1x1x256xf32>
      tpu.vector_store %arg21[%c0_127, %c0_128, %c0_129], %336 {strides = array<i32>} : memref<2x1x256xf32, #tpu.memory_space<vmem>>, vector<1x1x256xf32>,
      %337 = vector.extract_strided_slice %301 {offsets = [24, 0], sizes = [1, 32], strides = [1, 1]} : vector<48x32xf32> to vector<1x32xf32>
      %c0_130 = arith.constant 0 : index
      %c0_131 = arith.constant 0 : index
      %338 = vector.load %arg17[%c0_130, %c0_131] : memref<1x32xf32, #tpu.memory_space<vmem>>, vector<1x32xf32>
      %c0_132 = arith.constant 0 : index
      %c0_133 = arith.constant 0 : index
      %339 = vector.load %arg18[%c0_132, %c0_133] : memref<1x32xf32, #tpu.memory_space<vmem>>, vector<1x32xf32>
      %cst_134 = arith.constant dense<0.000000e+00> : vector<1xf32>
      %340 = vector.multi_reduction <add>, %337, %cst_134 [1] : vector<1x32xf32> to vector<1xf32>
      %341 = vector.shape_cast %340 : vector<1xf32> to vector<1x1xf32>
      %cst_135 = arith.constant 3.200000e+01 : f32
      %342 = vector.broadcast %cst_135 : f32 to vector<1x1xf32>
      %343 = arith.divf %341, %342 : vector<1x1xf32>
      %344 = vector.broadcast %343 : vector<1x1xf32> to vector<1x32xf32>
      %345 = arith.subf %337, %344 : vector<1x32xf32>
      %346 = arith.mulf %345, %345 : vector<1x32xf32>
      %cst_136 = arith.constant dense<0.000000e+00> : vector<1xf32>
      %347 = vector.multi_reduction <add>, %346, %cst_136 [1] : vector<1x32xf32> to vector<1xf32>
      %348 = vector.shape_cast %347 : vector<1xf32> to vector<1x1xf32>
      %cst_137 = arith.constant 3.200000e+01 : f32
      %349 = vector.broadcast %cst_137 : f32 to vector<1x1xf32>
      %350 = arith.divf %348, %349 : vector<1x1xf32>
      %351 = vector.broadcast %343 : vector<1x1xf32> to vector<1x32xf32>
      %352 = arith.subf %337, %351 : vector<1x32xf32>
      %cst_138 = arith.constant 9.99999974E-6 : f32
      %353 = vector.broadcast %cst_138 : f32 to vector<1x1xf32>
      %354 = arith.addf %350, %353 : vector<1x1xf32>
      %355 = math.rsqrt %354 : vector<1x1xf32>
      %356 = vector.broadcast %355 : vector<1x1xf32> to vector<1x32xf32>
      %357 = arith.mulf %352, %356 : vector<1x32xf32>
      %358 = arith.mulf %357, %338 : vector<1x32xf32>
      %359 = arith.addf %358, %339 : vector<1x32xf32>
      %360 = arith.truncf %359 : vector<1x32xf32> to vector<1x32xbf16>
      %c0_139 = arith.constant 0 : index
      %c0_140 = arith.constant 0 : index
      %361 = vector.load %arg19[%c0_139, %c0_140] : memref<32x256xbf16, #tpu.memory_space<vmem>>, vector<32x256xbf16>
      %cst_141 = arith.constant dense<0.000000e+00> : vector<1x256xf32>
      %362 = tpu.matmul %360, %361, %cst_141 {dimension_numbers = #tpu.dot_dimension_numbers<[1], [0], [0], [1], [0, 0, 1, 1], [], []>} : vector<1x32xbf16>, vector<32x256xbf16>, vector<1x256xf32> -> vector<1x256xf32>
      %c0_142 = arith.constant 0 : index
      %c0_143 = arith.constant 0 : index
      %363 = vector.load %arg20[%c0_142, %c0_143] : memref<1x256xf32, #tpu.memory_space<vmem>>, vector<1x256xf32>
      %364 = arith.addf %362, %363 : vector<1x256xf32>
      %c1 = arith.constant 1 : index
      %c0_144 = arith.constant 0 : index
      %c0_145 = arith.constant 0 : index
      %365 = vector.load %arg21[%c1, %c0_144, %c0_145] : memref<2x1x256xf32, #tpu.memory_space<vmem>>, vector<1x1x256xf32>
      %366 = vector.shape_cast %365 : vector<1x1x256xf32> to vector<1x256xf32>
      %367 = vector.shape_cast %364 : vector<1x256xf32> to vector<1x1x256xf32>
      tpu.vector_store %arg21[%c1, %c0_144, %c0_145], %367 {strides = array<i32>} : memref<2x1x256xf32, #tpu.memory_space<vmem>>, vector<1x1x256xf32>,
    } else {
    }
    return
  }
  func.func @transform_0(%arg0: i32, %arg1: i32) -> (i32, i32, i32) {
    %c0_i32 = arith.constant 0 : i32
    %c0_i32_0 = arith.constant 0 : i32
    %c0_i32_1 = arith.constant 0 : i32
    return %arg0, %c0_i32, %c0_i32_0 : i32, i32, i32
  }
  func.func @transform_1(%arg0: i32, %arg1: i32) -> (i32, i32) {
    %c0_i32 = arith.constant 0 : i32
    %c0_i32_0 = arith.constant 0 : i32
    %c0_i32_1 = arith.constant 0 : i32
    return %c0_i32, %c0_i32_0 : i32, i32
  }
  func.func @transform_2(%arg0: i32, %arg1: i32) -> (i32, i32) {
    %c0_i32 = arith.constant 0 : i32
    %c0_i32_0 = arith.constant 0 : i32
    %c0_i32_1 = arith.constant 0 : i32
    return %c0_i32, %c0_i32_0 : i32, i32
  }
  func.func @transform_3(%arg0: i32, %arg1: i32) -> (i32, i32, i32) {
    %c0_i32 = arith.constant 0 : i32
    %c0_i32_0 = arith.constant 0 : i32
    %c0_i32_1 = arith.constant 0 : i32
    return %arg1, %c0_i32, %c0_i32_0 : i32, i32, i32
  }
  func.func @transform_4(%arg0: i32, %arg1: i32) -> (i32, i32, i32) {
    %c0_i32 = arith.constant 0 : i32
    %c0_i32_0 = arith.constant 0 : i32
    %c0_i32_1 = arith.constant 0 : i32
    return %arg1, %c0_i32, %c0_i32_0 : i32, i32, i32
  }
  func.func @transform_5(%arg0: i32, %arg1: i32) -> (i32, i32, i32) {
    %c0_i32 = arith.constant 0 : i32
    %c0_i32_0 = arith.constant 0 : i32
    %c0_i32_1 = arith.constant 0 : i32
    return %arg1, %c0_i32, %c0_i32_0 : i32, i32, i32
  }
  func.func @transform_6(%arg0: i32, %arg1: i32) -> (i32, i32, i32) {
    %c0_i32 = arith.constant 0 : i32
    %c0_i32_0 = arith.constant 0 : i32
    %c0_i32_1 = arith.constant 0 : i32
    return %arg1, %c0_i32, %c0_i32_0 : i32, i32, i32
  }
  func.func @transform_7(%arg0: i32, %arg1: i32) -> (i32, i32, i32) {
    %c0_i32 = arith.constant 0 : i32
    %c0_i32_0 = arith.constant 0 : i32
    %c0_i32_1 = arith.constant 0 : i32
    return %arg1, %c0_i32, %c0_i32_0 : i32, i32, i32
  }
  func.func @transform_8(%arg0: i32, %arg1: i32) -> (i32, i32, i32) {
    %c0_i32 = arith.constant 0 : i32
    %c0_i32_0 = arith.constant 0 : i32
    %c0_i32_1 = arith.constant 0 : i32
    return %arg1, %c0_i32, %c0_i32_0 : i32, i32, i32
  }
  func.func @transform_9(%arg0: i32, %arg1: i32) -> (i32, i32, i32) {
    %c0_i32 = arith.constant 0 : i32
    %c0_i32_0 = arith.constant 0 : i32
    %c0_i32_1 = arith.constant 0 : i32
    return %arg1, %c0_i32, %c0_i32_0 : i32, i32, i32
  }
  func.func @transform_10(%arg0: i32, %arg1: i32) -> (i32, i32, i32) {
    %c0_i32 = arith.constant 0 : i32
    %c0_i32_0 = arith.constant 0 : i32
    %c0_i32_1 = arith.constant 0 : i32
    return %arg1, %c0_i32, %c0_i32_0 : i32, i32, i32
  }
  func.func @transform_11(%arg0: i32, %arg1: i32) -> (i32, i32, i32) {
    %c0_i32 = arith.constant 0 : i32
    %c0_i32_0 = arith.constant 0 : i32
    %c0_i32_1 = arith.constant 0 : i32
    return %arg1, %c0_i32, %c0_i32_0 : i32, i32, i32
  }
  func.func @transform_12(%arg0: i32, %arg1: i32) -> (i32, i32, i32) {
    %c0_i32 = arith.constant 0 : i32
    %c0_i32_0 = arith.constant 0 : i32
    %c0_i32_1 = arith.constant 0 : i32
    return %arg1, %c0_i32, %c0_i32_0 : i32, i32, i32
  }
  func.func @transform_13(%arg0: i32, %arg1: i32) -> (i32, i32, i32) {
    %c0_i32 = arith.constant 0 : i32
    %c0_i32_0 = arith.constant 0 : i32
    %c0_i32_1 = arith.constant 0 : i32
    return %arg1, %c0_i32, %c0_i32_0 : i32, i32, i32
  }
  func.func @transform_14(%arg0: i32, %arg1: i32) -> (i32, i32, i32) {
    %c0_i32 = arith.constant 0 : i32
    %c0_i32_0 = arith.constant 0 : i32
    %c0_i32_1 = arith.constant 0 : i32
    return %arg1, %c0_i32, %c0_i32_0 : i32, i32, i32
  }
  func.func @transform_15(%arg0: i32, %arg1: i32) -> (i32, i32) {
    %c0_i32 = arith.constant 0 : i32
    %c0_i32_0 = arith.constant 0 : i32
    %c0_i32_1 = arith.constant 0 : i32
    return %c0_i32, %c0_i32_0 : i32, i32
  }
  func.func @transform_16(%arg0: i32, %arg1: i32) -> (i32, i32) {
    %c0_i32 = arith.constant 0 : i32
    %c0_i32_0 = arith.constant 0 : i32
    %c0_i32_1 = arith.constant 0 : i32
    return %c0_i32, %c0_i32_0 : i32, i32
  }
  func.func @transform_17(%arg0: i32, %arg1: i32) -> (i32, i32) {
    %c0_i32 = arith.constant 0 : i32
    %c0_i32_0 = arith.constant 0 : i32
    %c0_i32_1 = arith.constant 0 : i32
    return %c0_i32, %c0_i32_0 : i32, i32
  }
  func.func @transform_18(%arg0: i32, %arg1: i32) -> (i32, i32) {
    %c0_i32 = arith.constant 0 : i32
    %c0_i32_0 = arith.constant 0 : i32
    %c0_i32_1 = arith.constant 0 : i32
    return %c0_i32, %c0_i32_0 : i32, i32
  }
  func.func @transform_19(%arg0: i32, %arg1: i32) -> (i32, i32, i32) {
    %c0_i32 = arith.constant 0 : i32
    %c0_i32_0 = arith.constant 0 : i32
    %c0_i32_1 = arith.constant 0 : i32
    return %arg0, %c0_i32, %c0_i32_0 : i32, i32, i32
  }
}

</mosaic_0001>

<bundles_post_ra>
// kernel: vision_transformer_forward.1
= control target key start
LH: loop header
LB: loop body
LE: loop exit
PB: predicated region body
PF: predicated region fallthrough
CT: control target
= control target key end

     0   :  { %s4406_s30 = smov 0   ;;  %s4408_s20 = smov 0   ;;  %s5180_s0 = inlined_call_operand.vmem [shape: bf16[2,16,48], index: 0, kind: input, shape index: {}]   ;;  %s5181_s1 = inlined_call_operand.vmem [shape: bf16[48,32], index: 1, kind: input, shape index: {}]   ;;  %s5182_s2 = inlined_call_operand.vmem [shape: f32[24,32], index: 2, kind: input, shape index: {}]   ;;  %s5183_s3 = inlined_call_operand.vmem [shape: f32[2,1,32], index: 3, kind: input, shape index: {}]   ;;  %s5184_s4 = inlined_call_operand.vmem [shape: f32[2,1,32], index: 4, kind: input, shape index: {}]   ;;  %s5185_s5 = inlined_call_operand.vmem [shape: bf16[2,32,96], index: 5, kind: input, shape index: {}]   ;;  %s5186_s6 = inlined_call_operand.vmem [shape: f32[2,1,96], index: 6, kind: input, shape index: {}]   ;;  %s5187_s7 = inlined_call_operand.vmem [shape: bf16[2,32,32], index: 7, kind: input, shape index: {}]   ;;  %s5188_s8 = inlined_call_operand.vmem [shape: f32[2,1,32], index: 8, kind: input, shape index: {}]   ;;  %s5189_s9 = inlined_call_operand.vmem [shape: f32[2,1,32], index: 9, kind: input, shape index: {}]   ;;  %s5190_s10 = inlined_call_operand.vmem [shape: f32[2,1,32], index: 10, kind: input, shape index: {}]   ;;  %s5191_s11 = inlined_call_operand.vmem [shape: bf16[2,32,128], index: 11, kind: input, shape index: {}]   ;;  %s5192_s12 = inlined_call_operand.vmem [shape: f32[2,1,128], index: 12, kind: input, shape index: {}]   ;;  %s5193_s13 = inlined_call_operand.vmem [shape: bf16[2,128,32], index: 13, kind: input, shape index: {}]   ;;  %s5194_s14 = inlined_call_operand.vmem [shape: f32[2,1,32], index: 14, kind: input, shape index: {}]   ;;  %s5195_s15 = inlined_call_operand.vmem [shape: f32[1,32], index: 15, kind: input, shape index: {}]   ;;  %s5196_s16 = inlined_call_operand.vmem [shape: f32[1,32], index: 16, kind: input, shape index: {}]   ;;  %s5197_s17 = inlined_call_operand.vmem [shape: bf16[32,256], index: 17, kind: input, shape index: {}]   ;;  %s5198_s18 = inlined_call_operand.vmem [shape: f32[1,256], index: 18, kind: input, shape index: {}]   ;;  %s5199_s19 = inlined_call_operand.vmem [shape: f32[2,1,256], index: 19, kind: output, shape index: {}]  }
   0x1   :  { %5209 = sst [smem:[#allocation7_spill]] %s5180_s0  ;;  %s4404_s0 = smov 0  }
   0x2   :  { %5210 = sst [smem:[#allocation8_spill]] %s5181_s1 }
   0x3   :  { %5211 = sst [smem:[#allocation9_spill]] %s5182_s2 }
   0x4   :  { %5212 = sst [smem:[#allocation10_spill]] %s5183_s3 }
   0x5   :  { %5213 = sst [smem:[#allocation11_spill]] %s5185_s5 }
   0x6   :  { %5214 = sst [smem:[#allocation12_spill]] %s5187_s7 }
   0x7   :  { %5215 = sst [smem:[#allocation13_spill]] %s5195_s15 }
   0x8   :  { %5216 = sst [smem:[#allocation14_spill]] %s5196_s16 }
   0x9   :  { %5217 = sst [smem:[#allocation15_spill]] %s5198_s18 }
   0xa   :  { %5218 = sst [smem:[#allocation16_spill]] %s5199_s19 }
   0xb LB: > { %5219 = sst [smem:[#allocation4_spill]] %s4278_s30  ;;  %s38_s21 = sadd.s32 1, %s4278_s30  ;;  %s4282_s20 = sphi %s4408_s20, %s29_s20   ;;  %s4278_s30 = sphi %s4406_s30, %s5241_s30   ;;  %s4274_s0 = sphi %s4404_s0, %s5240_s0  }
   0xc   : > { %5220 = sst [smem:[#allocation5_spill]] %s4282_s20  ;;  %p3595_p0 = scmp.ge.s32.totalorder %s4282_s20, 1 }
   0xd   : > { %p39_p1 = scmp.ge.s32.totalorder %s38_s21, 2  ;;  %p655_p2 = scmp.lt.s32.totalorder %s4282_s20, 3 }
   0xf   : > { %s5243_s21 = smov (%p39_p1, %s38_s21), 0  ;;  %p656_p3 = pnand %p3595_p0, %p655_p2 }
  0x10   : > { %5221 = sst [smem:[#allocation6_spill]] %s5243_s21  ;;  %p763_p4 = scmp.lt.s32.totalorder (!%p656_p3), %s4274_s0, 1 }
  0x11   : > { %659 = sbr.rel (%p656_p3) target bundleno = 5930 (0x172a), region = 96  ;;  %s5223_s5 = sld [smem:[#allocation11_spill]] (!%p656_p3) }
  0x12   : > { %s5224_s7 = sld [smem:[#allocation12_spill]] (!%p656_p3)  ;;  %p3604_p5 = scmp.ne.s32.totalorder (!%p656_p3), %s4274_s0, 0 }
  0x16   : > { %s4426_s1 = scalar_select %p763_p4, %s4274_s0, 1 }
  0x17   : > { %s5225_s22 = sld [smem:[#allocation8_spill]] (!%p3604_p5) }
  0x18   : > { %s3696_s27 = sshll.u32 %s4426_s1, 4  ;;  %s787_s16 = scalar_lea.vmem %s5189_s9, %s4426_s1 }
  0x19   : > { %s4444_s30 = scalar_lea.vmem %s5223_s5, %s3696_s27  ;;  %s4449_s18 = scalar_lea.vmem %s5224_s7, %s3696_s27 }
  0x1a   : > { %s790_s21 = scalar_lea.vmem %s5190_s10, %s4426_s1  ;;  %s4466_s5 = scalar_lea.vmem %s5191_s11, %s3696_s27 }
  0x1b   : > { %s3699_s15 = sshll.u32 %s4426_s1, 6  ;;  %817 = sbr.rel (%p3604_p5) target bundleno = 249 (0xf9), region = 100 }
  0x1c   : > { %s4476_s25 = scalar_lea.vmem %s5193_s13, %s3699_s15  ;;  %s5226_s15 = sld [smem:[#allocation7_spill]] (!%p3604_p5) }
  0x1d   : > { %s5227_s3 = sld [smem:[#allocation9_spill]] (!%p3604_p5) }
  0x20   : > { %v4090_v0 = vld [vmem:[%s5225_s22 + $0x10] sm:$0xff]   ;;  %v4284_v1 = vmov 0.0   ;;  %v4092_v3 = vld [vmem:[%s5225_s22 + $0x8] sm:$0xff]   ;;  %vm4285_vm0 = vmmov 0   ;;  %v4094_v5 = vld [vmem:[%s5225_s22] sm:$0xff]   ;;  %vm849_vm1 = vcmask 392192  }
  0x21   : > { %3798 = vmatprep.subr.bf16.mxu0 %v4284_v1  ;;  %3808 = vmatprep.subr.bf16.mxu1 %v4284_v1  ;;  %v4091_v2 = vld [vmem:[%s5225_s22 + $0x10] sm:$0xff]   ;;  %v4093_v4 = vld [vmem:[%s5225_s22 + $0x8] sm:$0xff]   ;;  %v4095_v6 = vld [vmem:[%s5225_s22] sm:$0xff]   ;;  %vm896_vm2 = vcmask 1040384   ;;  %vm911_vm3 = vcmask 261120  }
  0x22   : > { %3799 = vmatpush3.bf16.msra.mxu0 %v4090_v0  ;;  %3804 = vmatprep.mubr.msk.bf16.mxu0 %vm4285_vm0, %v4284_v1  ;;  %v4096_v7 = vld [vmem:[%s5226_s15] sm:$0xff]   ;;  %v4097_v8 = vld [vmem:[%s5226_s15 + $0x8] sm:$0xff]  }
  0x23   : > { %3809 = vmatpush3.bf16.msra.mxu1 %v4091_v2  ;;  %3800 = vmatprep.subr.bf16.mxu0 %v4284_v1  ;;  %v905_v11 = vld [vmem:[%s5227_s3] sm:$0xff]  ;;  %v906_v22 = vld [vmem:[%s5227_s3 + $0x8] sm:$0xff]  ;;  %v907_v23 = vld [vmem:[%s5227_s3 + $0x10] sm:$0xff] }
  0x24   : > { %3810 = vmatprep.subr.bf16.mxu1 %v4284_v1  ;;  %3814 = vmatprep.mubr.msk.bf16.mxu1 %vm4285_vm0, %v4284_v1 }
  0x26   : > { %3801 = vmatpush3.bf16.msra.mxu0 %v4092_v3 }
  0x27   : > { %3811 = vmatpush3.bf16.msra.mxu1 %v4093_v4  ;;  %3802 = vmatprep.subr.bf16.mxu0 %v4284_v1 }
  0x28   : > { %3812 = vmatprep.subr.bf16.mxu1 %v4284_v1 }
  0x2a   : > { %3803 = vmatpush3.bf16.msra.mxu0 %v4094_v5 }
  0x2b   : > { %3813 = vmatpush3.bf16.msra.mxu1 %v4095_v6 }
  0x2d   : > { %3805 = vmatmul.mubr.msk.bf16.vlgmr.msra.gmra.mxu0 %vm849_vm1, %v4096_v7 }
  0x2e   : > { %3815 = vmatmul.mubr.msk.bf16.vlgmr.msra.gmra.mxu1 %vm849_vm1, %v4097_v8 }
  0xed   : > { %v887_v9 = vpop.f32.mrf.mxu0 }
  0xee   : > { %v897_v10 = vrot.slane %v887_v9, 7  ;;  %v984_v12 = vpop.f32.mrf.mxu1 }
  0xef   : > { %v993_v13 = vrot.slane %v984_v12, 7  ;;  %v3806_v14 = vpop.f32.mrf.mxu0 }
  0xf0   : > { %v903_v15 = vsel %vm896_vm2, 0.0, %v897_v10  ;;  %v3816_v16 = vpop.f32.mrf.mxu1 }
  0xf1   : > { %v908_v17 = vadd.f32 %v905_v11, %v903_v15  ;;  %v999_v18 = vsel %vm896_vm2, 0.0, %v993_v13  ;;  %v890_v19 = vpop.f32.mrf.mxu0 }
  0xf2   : > { %v1004_v20 = vadd.f32 %v999_v18, %v905_v11  ;;  %v898_v21 = vrot.slane %v890_v19, 7  ;;  %v987_v24 = vpop.f32.mrf.mxu1 }
  0xf3   : > { %912 = vst.msk [vmem:[#allocation2] sm:$0xff] %vm911_vm3, %v908_v17  ;;  %v994_v25 = vrot.slane %v987_v24, 7  ;;  %v3807_v26 = vpop.f32.mrf.mxu0 }
  0xf4   : > { %1007 = vst.msk [vmem:[#allocation2 + $0x18] sm:$0xff] %vm911_vm3, %v1004_v20  ;;  %v899_v27 = vsel %vm896_vm2, %v897_v10, %v898_v21  ;;  %v904_v28 = vsel %vm896_vm2, %v898_v21, 0.0  ;;  %v3817_v29 = vpop.f32.mrf.mxu1 }
  0xf5   : > { %v909_v30 = vadd.f32 %v906_v22, %v899_v27  ;;  %v910_v31 = vadd.f32 %v907_v23, %v904_v28  ;;  %v995_v32 = vsel %vm896_vm2, %v993_v13, %v994_v25  ;;  %v1000_v33 = vsel %vm896_vm2, %v994_v25, 0.0 }
  0xf6   : > { %v1005_v34 = vadd.f32 %v995_v32, %v906_v22  ;;  %v1006_v35 = vadd.f32 %v1000_v33, %v907_v23 }
  0xf7   : > { %913 = vst.msk [vmem:[#allocation2 + $0x8] sm:$0xff] %vm911_vm3, %v909_v30  ;;  %914 = vst.msk [vmem:[#allocation2 + $0x10] sm:$0xff] %vm911_vm3, %v910_v31 }
  0xf8   : > { %1008 = vst.msk [vmem:[#allocation2 + $0x20] sm:$0xff] %vm911_vm3, %v1005_v34  ;;  %1009 = vst.msk [vmem:[#allocation2 + $0x28] sm:$0xff] %vm911_vm3, %v1006_v35 }
  0xf9 PF: > { %vm1018_vm4 = vcmask 261120   ;;  %v4098_v4 = vld [vmem:[%s4444_s30 + $0x8] sm:$0xff]   ;;  %v4286_v5 = vmov 0.0   ;;  %vm4287_vm5 = vmmov 0   ;;  %v4099_v6 = vld [vmem:[%s4444_s30] sm:$0xff]   ;;  %s5228_s24 = sld [smem:[#allocation10_spill]]  ;;  %s5230_s27 = scalar_lea.vmem %s5184_s4, %s4426_s1 }
  0xfa   : > { %v1010_v36 = vld [vmem:[#allocation2] sm:$0xff]  ;;  %3818 = vmatprep.subr.bf16.mxu1 %v4286_v5  ;;  %3822 = vmatprep.mubr.msk.bf16.mxu1 %vm4287_vm5, %v4286_v5  ;;  %s5231_s30 = scalar_lea.vmem %s5186_s6, %s4426_s1  ;;  %vm1225_vm6 = vcmask 64512   ;;  %s4288_s20 = smov 88   ;;  %vm1291_vm8 = vcmask 195584   ;;  %vm1338_vm9 = vcmask 1043456   ;;  %vm1573_vm10 = vcmask 130112  }
  0xfb   : > { %v1019_v39 = vsel %vm1018_vm4, %v1010_v36, 0.0  ;;  %v1013_v41 = vld [vmem:[#allocation2 + $0x18] sm:$0xff]  ;;  %3819 = vmatpush3.bf16.msra.mxu1 %v4098_v4  ;;  %s4291_s26 = smov 80   ;;  %s4292_s29 = smov 112   ;;  %vm1757_vm11 = vcmask 195712   ;;  %vm1941_vm12 = vcmask 261312  }
  0xfc   : > { %1020 = vadd.xlane.f32.xlu0 %v1019_v39  ;;  %v1028_v43 = vsel %vm1018_vm4, %v1013_v41, 0.0  ;;  %3820 = vmatprep.subr.bf16.mxu1 %v4286_v5  ;;  %s4294_s2 = smov 56   ;;  %s4295_s19 = smov 48  }
  0xfd   : > { %s4297_s28 = smov 104   ;;  %s4298_s7 = smov 40  }
  0xfe   : > { %v1012_v37 = vld [vmem:[#allocation2 + $0x10] sm:$0xff]  ;;  %v1011_v38 = vld [vmem:[#allocation2 + $0x8] sm:$0xff]  ;;  %p3680_p6 = scmp.ne.s32.totalorder %s4274_s0, 1 }
  0xff   : > { %v1025_v40 = vsel %vm1018_vm4, %v1012_v37, 0.0  ;;  %v1022_v42 = vsel %vm1018_vm4, %v1011_v38, 0.0  ;;  %v1014_v62 = vld [vmem:[#allocation2 + $0x20] sm:$0xff]  ;;  %v1015_v2 = vld [vmem:[#allocation2 + $0x28] sm:$0xff]  ;;  %3821 = vmatpush3.bf16.msra.mxu1 %v4099_v6  ;;  %s5229_s23 = scalar_lea.vmem %s5228_s24, %s4426_s1  ;;  %s4289_s24 = smov 96  }
 0x100   : > { %1026 = vadd.xlane.f32.xlu1 %v1025_v40  ;;  %1023 = vadd.xlane.f32.xlu0 %v1022_v42  ;;  %v1031_v1 = vsel %vm1018_vm4, %v1014_v62, 0.0  ;;  %v1034_v3 = vsel %vm1018_vm4, %v1015_v2, 0.0  ;;  %v3617_v31 = vld [vmem:[%s5229_s23] ss:$0 sm:$0xff]  ;;  %s4290_s23 = smov 120  }
 0x104   : > { %1029 = vadd.xlane.f32.xlu1 %v1028_v43 }
 0x185   : > { %v1021_v44 = vpop.xlane.xlu0 %1020 }
 0x186   : > { %v1038_v46 = vmul.f32 0.03125, %v1021_v44 }
 0x188   : > { %v4532_v48 = vsub.f32 %v1010_v36, %v1038_v46  ;;  %v3618_v36 = vld [vmem:[%s5230_s27] ss:$0 sm:$0xff]  ;;  %s4293_s27 = smov 64  }
 0x189   : > { %v1027_v45 = vpop.xlane.xlu1 %1026  ;;  %v1024_v50 = vpop.xlane.xlu0 %1023 }
 0x18a   : > { %v1040_v47 = vmul.f32 0.03125, %v1027_v45  ;;  %v1039_v52 = vmul.f32 0.03125, %v1024_v50  ;;  %v1050_v54 = vmul.f32 %v4532_v48, %v4532_v48 }
 0x18c   : > { %v4534_v49 = vsub.f32 %v1012_v37, %v1040_v47  ;;  %v1045_v56 = vsub.f32 %v1011_v38, %v1039_v52  ;;  %v1056_v58 = vsel %vm1018_vm4, %v1050_v54, 0.0 }
 0x18d   : > { %v1030_v51 = vpop.xlane.xlu1 %1029  ;;  %1057 = vadd.xlane.f32.xlu0 %v1056_v58 }
 0x18e   : > { %v1041_v53 = vmul.f32 0.03125, %v1030_v51  ;;  %v1052_v55 = vmul.f32 %v4534_v49, %v4534_v49  ;;  %v1051_v60 = vmul.f32 %v1045_v56, %v1045_v56 }
 0x190   : > { %v4540_v57 = vsub.f32 %v1013_v41, %v1041_v53  ;;  %v1062_v59 = vsel %vm1018_vm4, %v1052_v55, 0.0  ;;  %v1059_v63 = vsel %vm1018_vm4, %v1051_v60, 0.0 }
 0x191   : > { %1063 = vadd.xlane.f32.xlu0 %v1062_v59  ;;  %1060 = vadd.xlane.f32.xlu1 %v1059_v63 }
 0x192   : > { %v1053_v61 = vmul.f32 %v4540_v57, %v4540_v57 }
 0x194   : > { %v1065_v0 = vsel %vm1018_vm4, %v1053_v61, 0.0 }
 0x195   : > { %1066 = vadd.xlane.f32.xlu1 %v1065_v0  ;;  %1032 = vadd.xlane.f32.xlu0 %v1031_v1  ;;  %v4583_v1 = vld [vmem:[%s5231_s30] ss:$0 sm:$0xff]  ;;  %s4296_s30 = smov 72  }
 0x199   : > { %1035 = vadd.xlane.f32.xlu1 %v1034_v3 }
 0x216   : > { %v1058_v7 = vpop.xlane.xlu0 %1057 }
 0x217   : > { %v1074_v8 = vmul.f32 0.03125, %v1058_v7 }
 0x219   : > { %v1080_v9 = vadd.f32 1e-05, %v1074_v8 }
 0x21a   : > { %v1061_v10 = vpop.xlane.xlu1 %1060  ;;  %v1064_v11 = vpop.xlane.xlu0 %1063 }
 0x21b   : > { %4112 = vrsqrt.f32 %v1080_v9  ;;  %v1075_v12 = vmul.f32 0.03125, %v1061_v10  ;;  %v1076_v13 = vmul.f32 0.03125, %v1064_v11 }
 0x21d   : > { %v1081_v14 = vadd.f32 1e-05, %v1075_v12  ;;  %v1082_v15 = vadd.f32 1e-05, %v1076_v13 }
 0x21e   : > { %v1067_v16 = vpop.xlane.xlu1 %1066  ;;  %v1033_v17 = vpop.xlane.xlu0 %1032 }
 0x21f   : > { %4114 = vrsqrt.f32 %v1081_v14  ;;  %v1077_v18 = vmul.f32 0.03125, %v1067_v16  ;;  %v1042_v19 = vmul.f32 0.03125, %v1033_v17 }
 0x220   : > { %4116 = vrsqrt.f32 %v1082_v15 }
 0x221   : > { %v1083_v20 = vadd.f32 1e-05, %v1077_v18  ;;  %v1048_v21 = vsub.f32 %v1014_v62, %v1042_v19 }
 0x222   : > { %v1036_v22 = vpop.xlane.xlu1 %1035 }
 0x223   : > { %4118 = vrsqrt.f32 %v1083_v20  ;;  %v1043_v23 = vmul.f32 0.03125, %v1036_v22  ;;  %v1054_v24 = vmul.f32 %v1048_v21, %v1048_v21 }
 0x225   : > { %v1049_v25 = vsub.f32 %v1015_v2, %v1043_v23  ;;  %v1068_v26 = vsel %vm1018_vm4, %v1054_v24, 0.0 }
 0x226   : > { %1069 = vadd.xlane.f32.xlu0 %v1068_v26 }
 0x227   : > { %v1055_v27 = vmul.f32 %v1049_v25, %v1049_v25 }
 0x228   : > { %v4113_v28 = vpop.eup %4112 }
 0x229   : > { %v1071_v29 = vsel %vm1018_vm4, %v1055_v27, 0.0  ;;  %v1092_v30 = vmul.f32 %v4113_v28, %v4532_v48 }
 0x22a   : > { %1072 = vadd.xlane.f32.xlu1 %v1071_v29 }
 0x22b   : > { %v1104_v34 = vmul.f32 %v3617_v31, %v1092_v30 }
 0x22c   : > { %v4115_v32 = vpop.eup %4114 }
 0x22d   : > { %v1093_v33 = vmul.f32 %v4115_v32, %v1045_v56  ;;  %v4117_v35 = vpop.eup %4116  ;;  %v1116_v39 = vadd.f32 %v3618_v36, %v1104_v34 }
 0x22e   : > { %v1094_v41 = vmul.f32 %v4117_v35, %v4534_v49 }
 0x22f   : > { %v1105_v37 = vmul.f32 %v3617_v31, %v1093_v33 }
 0x230   : > { %v4119_v38 = vpop.eup %4118  ;;  %v1106_v45 = vmul.f32 %v3617_v31, %v1094_v41 }
 0x231   : > { %v1117_v40 = vadd.f32 %v3618_v36, %v1105_v37  ;;  %v1095_v42 = vmul.f32 %v4119_v38, %v4540_v57  ;;  %v1214_v38 = vlaneseq }
 0x232   : > { %v1118_v47 = vadd.f32 %v3618_v36, %v1106_v45 }
 0x233   : > { %v1122_v43 = vpack.c.bf16 %v1117_v40, %v1116_v39  ;;  %v1107_v44 = vmul.f32 %v3617_v31, %v1095_v42  ;;  %v4639_v39 = vand.u32 127, %v1214_v38 }
 0x235   : > { %3823 = vmatmul.mubr.msk.bf16.vlgmr.msra.gmra.mxu1 %vm1018_vm4, %v1122_v43  ;;  %v1119_v46 = vadd.f32 %v3618_v36, %v1107_v44  ;;  %vm1216_vm7 = vcmp.lt.s32.totalorder %v4639_v39, 17 }
 0x236   : > { %3826 = vmatprep.mubr.msk.bf16.mxu1 %vm4287_vm5, %v4286_v5 }
 0x237   : > { %v1123_v48 = vpack.c.bf16 %v1119_v46, %v1118_v47 }
 0x23d   : > { %3827 = vmatmul.mubr.msk.bf16.gmra.mxu1 %vm1018_vm4, %v1123_v48 }
 0x23e   : > { %3830 = vmatprep.mubr.msk.bf16.mxu1 %vm4287_vm5, %v4286_v5 }
 0x2af   : > { %v1070_v50 = vpop.xlane.xlu0 %1069 }
 0x2b0   : > { %v1078_v49 = vmul.f32 0.03125, %v1070_v50 }
 0x2b2   : > { %v1084_v51 = vadd.f32 1e-05, %v1078_v49 }
 0x2b3   : > { %v1073_v52 = vpop.xlane.xlu1 %1072 }
 0x2b4   : > { %v1079_v53 = vmul.f32 0.03125, %v1073_v52  ;;  %4120 = vrsqrt.f32 %v1084_v51 }
 0x2b6   : > { %v1085_v54 = vadd.f32 1e-05, %v1079_v53 }
 0x2b8   : > { %4122 = vrsqrt.f32 %v1085_v54 }
 0x2c1   : > { %v4121_v55 = vpop.eup %4120 }
 0x2c2   : > { %v1096_v56 = vmul.f32 %v4121_v55, %v1048_v21 }
 0x2c4   : > { %v1108_v57 = vmul.f32 %v3617_v31, %v1096_v56 }
 0x2c5   : > { %v4123_v58 = vpop.eup %4122 }
 0x2c6   : > { %v1097_v59 = vmul.f32 %v4123_v58, %v1049_v25  ;;  %v1120_v61 = vadd.f32 %v3618_v36, %v1108_v57 }
 0x2c8   : > { %v1109_v60 = vmul.f32 %v3617_v31, %v1097_v59 }
 0x2ca   : > { %v1121_v62 = vadd.f32 %v3618_v36, %v1109_v60 }
 0x2cc   : > { %v1124_v63 = vpack.c.bf16 %v1121_v62, %v1120_v61 }
 0x2ce   : > { %3831 = vmatmul.mubr.msk.bf16.gmra.mxu1 %vm1018_vm4, %v1124_v63 }
 0x2f5   : > { %v1191_v0 = vpop.f32.mrf.mxu1 }
 0x2f6   : > { %v1192_v4 = vadd.f32 %v4583_v1, %v1191_v0 }
 0x2f7   : > { %v3824_v2 = vpop.f32.mrf.mxu1 }
 0x2f9   : > { %v1194_v3 = vpop.f32.mrf.mxu1 }
 0x2fa   : > { %v1195_v6 = vadd.f32 %v4583_v1, %v1194_v3 }
 0x2fb   : > { %v3825_v7 = vpop.f32.mrf.mxu1 }
 0x2fc   : > { %v4587_v8 = vpack.c.bf16 %v1195_v6, %v1192_v4 }
 0x2fd   : > { %v1199_v9 = vpop.f32.mrf.mxu1 }
 0x2fe   : > { %v1200_v10 = vadd.f32 %v4583_v1, %v1199_v9  ;;  %3838 = vmatprep.mubr.msk.bf16.mxu1 %vm1225_vm6, %v4587_v8 }
 0x2ff   : > { %v3828_v11 = vpop.f32.mrf.mxu1 }
 0x300   : > { %v4592_v12 = vpack.c.bf16 %v1200_v10, %v1200_v10 }
 0x301   : > { %v1202_v13 = vpop.f32.mrf.mxu1 }
 0x302   : > { %1399 = vrot.lane.b32.xlu1 %v4592_v12, %s4288_s20  ;;  %1223 = vrot.lane.b32.xlu0 %v4592_v12, %s4289_s24  ;;  %v1203_v31 = vadd.f32 %v4583_v1, %v1202_v13 }
 0x303   : > { %v3829_v14 = vpop.f32.mrf.mxu1 }
 0x306   : > { %1221 = vrot.lane.b32.xlu1 %v4587_v8, %s4289_s24  ;;  %1393 = vrot.lane.b32.xlu0 %v4587_v8, %s4290_s23 }
 0x30a   : > { %1397 = vrot.lane.b32.xlu1 %v4587_v8, %s4288_s20  ;;  %1395 = vrot.lane.b32.xlu0 %v4592_v12, %s4290_s23 }
 0x30e   : > { %1583 = vrot.lane.b32.xlu1 %v4592_v12, %s4291_s26  ;;  %1577 = vrot.lane.b32.xlu0 %v4587_v8, %s4292_s29 }
 0x312   : > { %1581 = vrot.lane.b32.xlu1 %v4587_v8, %s4291_s26 }
 0x316   : > { %1579 = vrot.lane.b32.xlu1 %v4592_v12, %s4292_s29 }
 0x374   : > { %v1400_v15 = vpop.permute.xlu1 %1399  ;;  %v1224_v16 = vpop.permute.xlu0 %1223 }
 0x375   : > { %4022 = vmatprep.subr.msk.bf16.mxu1 %vm1225_vm6, %v1224_v16  ;;  %4025 = vmatprep.subr.msk.bf16.mxu0 %vm1225_vm6, %v1400_v15  ;;  %v1236_v17 = vsel %vm1225_vm6, %v1224_v16, 0  ;;  %v1411_v18 = vsel %vm1225_vm6, %v1400_v15, 0 }
 0x376   : > { %3835 = vmatpush3.bf16.xpose.msra.mxu1 %v1236_v17  ;;  %3851 = vmatpush3.bf16.xpose.msra.mxu0 %v1411_v18 }
 0x378   : > { %v1222_v19 = vpop.permute.xlu1 %1221  ;;  %v1394_v20 = vpop.permute.xlu0 %1393 }
 0x379   : > { %4023 = vmatprep.subr.msk.bf16.mxu1 %vm1225_vm6, %v1222_v19  ;;  %3854 = vmatprep.mubr.msk.bf16.mxu0 %vm1225_vm6, %v1394_v20  ;;  %v1233_v22 = vsel %vm1225_vm6, %v1222_v19, 0 }
 0x37c   : > { %v1398_v21 = vpop.permute.xlu1 %1397  ;;  %v1396_v24 = vpop.permute.xlu0 %1395 }
 0x37d   : > { %4026 = vmatprep.subr.msk.bf16.mxu0 %vm1225_vm6, %v1398_v21  ;;  %v1408_v23 = vsel %vm1225_vm6, %v1398_v21, 0 }
 0x37e   : > { %3837 = vmatpush3.bf16.xpose.msra.mxu1 %v1233_v22  ;;  %3853 = vmatpush3.bf16.xpose.msra.mxu0 %v1408_v23 }
 0x380   : > { %v1584_v25 = vpop.permute.xlu1 %1583  ;;  %v1578_v26 = vpop.permute.xlu0 %1577 }
 0x381   : > { %4028 = vmatprep.subr.msk.bf16.mxu0 %vm1225_vm6, %v1584_v25  ;;  %v1595_v27 = vsel %vm1225_vm6, %v1584_v25, 0 }
 0x384   : > { %v1582_v28 = vpop.permute.xlu1 %1581 }
 0x385   : > { %3839 = vmatmul.mubr.msk.bf16.vlgmr.msra.gmra.mxu1 %vm1225_vm6, %v4592_v12  ;;  %3855 = vmatmul.mubr.msk.bf16.vlgmr.msra.gmra.mxu0 %vm1225_vm6, %v1396_v24  ;;  %v1592_v29 = vsel %vm1225_vm6, %v1582_v28, 0 }
 0x386   : > { %3867 = vmatpush3.bf16.xpose.msra.mxu0 %v1595_v27  ;;  %3870 = vmatprep.mubr.msk.bf16.mxu0 %vm1225_vm6, %v1578_v26 }
 0x387   : > { %4029 = vmatprep.subr.msk.bf16.mxu0 %vm1225_vm6, %v1582_v28 }
 0x388   : > { %v1580_v36 = vpop.permute.xlu1 %1579 }
 0x38e   : > { %v1207_v30 = vpop.f32.mrf.mxu1  ;;  %3869 = vmatpush3.bf16.xpose.msra.mxu0 %v1592_v29 }
 0x38f   : > { %v1208_v32 = vadd.f32 %v4583_v1, %v1207_v30 }
 0x390   : > { %v3832_v33 = vpop.f32.mrf.mxu1 }
 0x391   : > { %v4633_v34 = vpack.c.bf16 %v1208_v32, %v1203_v31 }
 0x392   : > { %v4635_v35 = vpop.f32.mrf.mxu1 }
 0x394   : > { %v3833_v37 = vpop.f32.mrf.mxu1 }
 0x395   : > { %3871 = vmatmul.mubr.msk.bf16.vlgmr.msra.gmra.mxu0 %vm1225_vm6, %v1580_v36 }
 0x445   : > { %v3840_v40 = vpop.f32.mrf.mxu1  ;;  %v3856_v41 = vpop.f32.mrf.mxu0 }
 0x446   : > { %v1290_v48 = vsel %vm1216_vm7, %v3840_v40, -1.7014117e+38  ;;  %v1463_v53 = vsel %vm1216_vm7, %v3856_v41, -1.7014117e+38 }
 0x447   : > { %v1272_v42 = vpop.f32.mrf.mxu1  ;;  %v1447_v43 = vpop.f32.mrf.mxu0  ;;  %v1298_v51 = vsel %vm1291_vm8, %v1290_v48, -inf  ;;  %v1470_v56 = vsel %vm1291_vm8, %v1463_v53, -inf }
 0x448   : > { %v1288_v44 = vsel %vm1216_vm7, %v1272_v42, -1.7014117e+38  ;;  %v1461_v54 = vsel %vm1216_vm7, %v1447_v43, -1.7014117e+38 }
 0x449   : > { %v3841_v45 = vpop.f32.mrf.mxu1  ;;  %v3857_v46 = vpop.f32.mrf.mxu0  ;;  %v1292_v47 = vsel %vm1291_vm8, %v1288_v44, -inf  ;;  %v1464_v57 = vsel %vm1291_vm8, %v1461_v54, -inf }
 0x44a   : > { %1293 = vmax.xlane.f32.xlu0 %v1292_v47 }
 0x44b   : > { %v1275_v50 = vpop.f32.mrf.mxu1  ;;  %v1450_v55 = vpop.f32.mrf.mxu0 }
 0x44c   : > { %v1289_v49 = vsel %vm1216_vm7, %v1275_v50, -1.7014117e+38  ;;  %v1462_v58 = vsel %vm1216_vm7, %v1450_v55, -1.7014117e+38 }
 0x44d   : > { %v1295_v52 = vsel %vm1291_vm8, %v1289_v49, -inf  ;;  %v1467_v60 = vsel %vm1291_vm8, %v1462_v58, -inf }
 0x44e   : > { %1299 = vmax.xlane.f32.xlu0 %v1298_v51  ;;  %1296 = vmax.xlane.f32.xlu1 %v1295_v52 }
 0x452   : > { %1471 = vmax.xlane.f32.xlu1 %v1470_v56  ;;  %1465 = vmax.xlane.f32.xlu0 %v1464_v57 }
 0x455   : > { %v3872_v59 = vpop.f32.mrf.mxu0 }
 0x456   : > { %1468 = vmax.xlane.f32.xlu0 %v1467_v60  ;;  %v1647_v2 = vsel %vm1216_vm7, %v3872_v59, -1.7014117e+38 }
 0x457   : > { %v1631_v61 = vpop.f32.mrf.mxu0  ;;  %v1654_v6 = vsel %vm1291_vm8, %v1647_v2, -inf }
 0x458   : > { %v1645_v62 = vsel %vm1216_vm7, %v1631_v61, -1.7014117e+38 }
 0x459   : > { %v3873_v63 = vpop.f32.mrf.mxu0  ;;  %v1648_v0 = vsel %vm1291_vm8, %v1645_v62, -inf }
 0x45a   : > { %1649 = vmax.xlane.f32.xlu0 %v1648_v0 }
 0x45b   : > { %v1634_v3 = vpop.f32.mrf.mxu0 }
 0x45c   : > { %v4667_v4 = vsel %vm1216_vm7, %v1634_v3, -1.7014117e+38 }
 0x45d   : > { %v1651_v7 = vsel %vm1291_vm8, %v4667_v4, -inf }
 0x45e   : > { %1655 = vmax.xlane.f32.xlu0 %v1654_v6  ;;  %1652 = vmax.xlane.f32.xlu1 %v1651_v7 }
 0x46f   : > { %1327 = vrot.lane.b32.xlu1 %v4587_v8, %s4293_s27 }
 0x473   : > { %1501 = vrot.lane.b32.xlu1 %v4592_v12, %s4294_s2 }
 0x474   : > { %1329 = vrot.lane.b32.xlu0 %v4592_v12, %s4293_s27 }
 0x477   : > { %1499 = vrot.lane.b32.xlu1 %v4587_v8, %s4294_s2 }
 0x4d3   : > { %v1294_v9 = vpop.xlane.xlu0 %1293 }
 0x4d4   : > { %v1301_v10 = vsub.f32 %v1288_v44, %v1294_v9 }
 0x4d6   : > { %v1304_v16 = vmul.f32 1.442695, %v1301_v10 }
 0x4d7   : > { %v1297_v11 = vpop.xlane.xlu1 %1296  ;;  %v1300_v13 = vpop.xlane.xlu0 %1299 }
 0x4d8   : > { %v1303_v14 = vsub.f32 %v1290_v48, %v1300_v13  ;;  %v1302_v21 = vsub.f32 %v1289_v49, %v1297_v11 }
 0x4da   : > { %v1308_v15 = vmul.f32 1.442695, %v1303_v14  ;;  %v1306_v26 = vmul.f32 1.442695, %v1302_v21 }
 0x4db   : > { %v1472_v17 = vpop.xlane.xlu1 %1471  ;;  %v1466_v18 = vpop.xlane.xlu0 %1465 }
 0x4dc   : > { %v1475_v19 = vsub.f32 %v1463_v53, %v1472_v17  ;;  %v1473_v20 = vsub.f32 %v1461_v54, %v1466_v18  ;;  %4124 = vpow2.f32 %v1308_v15 }
 0x4dd   : > { %4126 = vpow2.f32 %v1304_v16 }
 0x4de   : > { %v1480_v22 = vmul.f32 1.442695, %v1475_v19  ;;  %v1476_v23 = vmul.f32 1.442695, %v1473_v20 }
 0x4df   : > { %v1469_v24 = vpop.xlane.xlu0 %1468 }
 0x4e0   : > { %4128 = vpow2.f32 %v1480_v22  ;;  %v1474_v25 = vsub.f32 %v1462_v58, %v1469_v24 }
 0x4e1   : > { %4130 = vpow2.f32 %v1476_v23 }
 0x4e2   : > { %v1478_v27 = vmul.f32 1.442695, %v1474_v25 }
 0x4e3   : > { %v1650_v28 = vpop.xlane.xlu0 %1649 }
 0x4e4   : > { %4132 = vpow2.f32 %v1478_v27  ;;  %v1657_v29 = vsub.f32 %v1645_v62, %v1650_v28 }
 0x4e5   : > { %4134 = vpow2.f32 %v1306_v26 }
 0x4e6   : > { %v1660_v37 = vmul.f32 1.442695, %v1657_v29 }
 0x4e7   : > { %v1653_v30 = vpop.xlane.xlu1 %1652  ;;  %v1656_v31 = vpop.xlane.xlu0 %1655 }
 0x4e8   : > { %v1659_v32 = vsub.f32 %v1647_v2, %v1656_v31  ;;  %v1658_v59 = vsub.f32 %v4667_v4, %v1653_v30 }
 0x4e9   : > { %v4680_v33 = vpop.eup %4124 }
 0x4ea   : > { %v1664_v36 = vmul.f32 1.442695, %v1659_v32  ;;  %v1316_v41 = vsel %vm1291_vm8, %v4680_v33, 0.0  ;;  %v4684_v43 = vpop.eup %4126  ;;  %v1662_v60 = vmul.f32 1.442695, %v1658_v59 }
 0x4eb   : > { %v1328_v40 = vpop.permute.xlu1 %1327  ;;  %v1330_v42 = vpop.permute.xlu0 %1329  ;;  %1317 = vadd.xlane.f32.xlu1 %v1316_v41  ;;  %v1310_v48 = vsel %vm1291_vm8, %v4684_v43, 0.0 }
 0x4ec   : > { %4024 = vmatprep.subr.msk.bf16.mxu1 %vm1338_vm9, %v1330_v42  ;;  %v1340_v44 = vsel %vm1338_vm9, %v1330_v42, 0  ;;  %4136 = vpow2.f32 %v1664_v36 }
 0x4ed   : > { %v4688_v45 = vpop.eup %4128  ;;  %3843 = vmatpush3.bf16.msra.mxu1 %v1340_v44  ;;  %4138 = vpow2.f32 %v1660_v37 }
 0x4ee   : > { %3844 = vmatprep.subr.bf16.mxu1 %v1328_v40  ;;  %v1488_v46 = vsel %vm1291_vm8, %v4688_v45, 0.0  ;;  %v4131_v47 = vpop.eup %4130  ;;  %4140 = vpow2.f32 %v1662_v60 }
 0x4ef   : > { %1489 = vadd.xlane.f32.xlu0 %v1488_v46  ;;  %1311 = vadd.xlane.f32.xlu1 %v1310_v48  ;;  %v1502_v49 = vpop.permute.xlu1 %1501  ;;  %v1482_v51 = vsel %vm1291_vm8, %v4131_v47, 0.0 }
 0x4f0   : > { %v1511_v25 = vsel %vm1338_vm9, %v1502_v49, 0 }
 0x4f1   : > { %v4133_v50 = vpop.eup %4132  ;;  %3845 = vmatpush3.bf16.msra.mxu1 %v1328_v40 }
 0x4f2   : > { %4027 = vmatprep.subr.msk.bf16.mxu1 %vm1338_vm9, %v1502_v49  ;;  %v1485_v52 = vsel %vm1291_vm8, %v4133_v50, 0.0  ;;  %v4135_v53 = vpop.eup %4134 }
 0x4f3   : > { %1483 = vadd.xlane.f32.xlu0 %v1482_v51  ;;  %1486 = vadd.xlane.f32.xlu1 %v1485_v52  ;;  %v1313_v54 = vsel %vm1291_vm8, %v4135_v53, 0.0  ;;  %v1500_v63 = vpop.permute.xlu1 %1499 }
 0x4f7   : > { %1314 = vadd.xlane.f32.xlu0 %v1313_v54 }
 0x4f9   : > { %v4698_v55 = vpop.eup %4136 }
 0x4fa   : > { %v1672_v56 = vsel %vm1291_vm8, %v4698_v55, 0.0  ;;  %v4702_v57 = vpop.eup %4138 }
 0x4fb   : > { %1673 = vadd.xlane.f32.xlu1 %v1672_v56  ;;  %v1666_v58 = vsel %vm1291_vm8, %v4702_v57, 0.0  ;;  %v4141_v61 = vpop.eup %4140 }
 0x4fc   : > { %v1669_v62 = vsel %vm1291_vm8, %v4141_v61, 0.0 }
 0x4ff   : > { %1667 = vadd.xlane.f32.xlu1 %v1666_v58 }
 0x50d   : > { %1685 = vrot.lane.b32.xlu0 %v4592_v12, %s4295_s19 }
 0x510   : > { %1683 = vrot.lane.b32.xlu1 %v4587_v8, %s4295_s19 }
 0x514   : > { %1765 = vrot.lane.b32.xlu1 %v4587_v8, %s4296_s30 }
 0x518   : > { %1763 = vrot.lane.b32.xlu1 %v4592_v12, %s4297_s28 }
 0x52c   : > { %1670 = vadd.xlane.f32.xlu0 %v1669_v62 }
 0x542   : > { %1767 = vrot.lane.b32.xlu0 %v4592_v12, %s4296_s30 }
 0x546   : > { %1761 = vrot.lane.b32.xlu0 %v4587_v8, %s4297_s28 }
 0x574   : > { %v1318_v0 = vpop.xlane.xlu1 %1317 }
 0x575   : > { %4142 = vrcp.f32 %v1318_v0 }
 0x578   : > { %v1490_v2 = vpop.xlane.xlu0 %1489  ;;  %v1312_v3 = vpop.xlane.xlu1 %1311 }
 0x579   : > { %4144 = vrcp.f32 %v1312_v3 }
 0x57c   : > { %v1484_v4 = vpop.xlane.xlu0 %1483  ;;  %v1487_v6 = vpop.xlane.xlu1 %1486 }
 0x57d   : > { %4146 = vrcp.f32 %v1484_v4 }
 0x57e   : > { %4148 = vrcp.f32 %v1487_v6 }
 0x580   : > { %v1315_v7 = vpop.xlane.xlu0 %1314 }
 0x581   : > { %4150 = vrcp.f32 %v1315_v7 }
 0x582   : > { %4152 = vrcp.f32 %v1490_v2  ;;  %v4143_v9 = vpop.eup %4142 }
 0x583   : > { %v1324_v15 = vmul.f32 %v4143_v9, %v4680_v33 }
 0x584   : > { %v1674_v20 = vpop.xlane.xlu1 %1673  ;;  %v1686_v28 = vpop.permute.xlu0 %1685 }
 0x585   : > { %v1326_v22 = vpack.c.bf16 %v1324_v15, %v1324_v15  ;;  %v1695_v30 = vsel %vm1338_vm9, %v1686_v28, 0  ;;  %4154 = vrcp.f32 %v1674_v20 }
 0x586   : > { %v4145_v10 = vpop.eup %4144 }
 0x587   : > { %v1322_v16 = vmul.f32 %v4145_v10, %v4684_v43 }
 0x588   : > { %v1668_v27 = vpop.xlane.xlu1 %1667 }
 0x589   : > { %4156 = vrcp.f32 %v1668_v27 }
 0x58a   : > { %v4147_v11 = vpop.eup %4146 }
 0x58b   : > { %v4149_v13 = vpop.eup %4148  ;;  %v1494_v18 = vmul.f32 %v4147_v11, %v4131_v47 }
 0x58c   : > { %v1495_v19 = vmul.f32 %v4149_v13, %v4133_v50  ;;  %v1684_v31 = vpop.permute.xlu1 %1683 }
 0x58e   : > { %v4151_v14 = vpop.eup %4150  ;;  %v1497_v24 = vpack.c.bf16 %v1495_v19, %v1494_v18 }
 0x58f   : > { %v1323_v17 = vmul.f32 %v4151_v14, %v4135_v53  ;;  %v4153_v23 = vpop.eup %4152 }
 0x590   : > { %v1496_v26 = vmul.f32 %v4153_v23, %v4688_v45  ;;  %v1766_v48 = vpop.permute.xlu1 %1765 }
 0x591   : > { %v1325_v21 = vpack.c.bf16 %v1323_v17, %v1322_v16  ;;  %v1776_v50 = vsel %vm1225_vm6, %v1766_v48, 0 }
 0x592   : > { %v1498_v29 = vpack.c.bf16 %v1496_v26, %v1496_v26  ;;  %v4155_v36 = vpop.eup %4154 }
 0x593   : > { %3846 = vmatprep.mubr.msk.bf16.mxu1 %vm1291_vm8, %v1325_v21  ;;  %v1680_v41 = vmul.f32 %v4155_v36, %v4698_v55 }
 0x594   : > { %3847 = vmatmul.mubr.msk.bf16.vlgmr.msra.gmra.mxu1 %vm1291_vm8, %v1326_v22  ;;  %v1764_v49 = vpop.permute.xlu1 %1763 }
 0x595   : > { %3859 = vmatpush3.bf16.msra.mxu1 %v1511_v25  ;;  %3862 = vmatprep.mubr.msk.bf16.mxu1 %vm1291_vm8, %v1497_v24  ;;  %v1682_v45 = vpack.c.bf16 %v1680_v41, %v1680_v41 }
 0x596   : > { %3860 = vmatprep.subr.bf16.mxu1 %v1500_v63  ;;  %v4157_v37 = vpop.eup %4156 }
 0x597   : > { %v1678_v42 = vmul.f32 %v4157_v37, %v4702_v57 }
 0x599   : > { %3861 = vmatpush3.bf16.msra.mxu1 %v1500_v63 }
 0x59a   : > { %4030 = vmatprep.subr.msk.bf16.mxu1 %vm1338_vm9, %v1686_v28  ;;  %v1211_v28 = vadd.f32 %v4583_v1, %v4635_v35 }
 0x59c   : > { %3863 = vmatmul.mubr.msk.bf16.vlgmr.msra.gmra.mxu1 %vm1291_vm8, %v1498_v29  ;;  %v4771_v29 = vpack.c.bf16 %v1211_v28, %v1211_v28 }
 0x59d   : > { %3875 = vmatpush3.bf16.msra.mxu1 %v1695_v30 }
 0x59e   : > { %3876 = vmatprep.subr.bf16.mxu1 %v1684_v31 }
 0x5a1   : > { %3877 = vmatpush3.bf16.msra.mxu1 %v1684_v31 }
 0x5b5   : > { %v1671_v32 = vpop.xlane.xlu0 %1670 }
 0x5b6   : > { %4158 = vrcp.f32 %v1671_v32 }
 0x5b9   : > { %v1768_v33 = vpop.permute.xlu0 %1767 }
 0x5ba   : > { %4031 = vmatprep.subr.msk.bf16.mxu1 %vm1225_vm6, %v1768_v33  ;;  %v1779_v46 = vsel %vm1225_vm6, %v1768_v33, 0 }
 0x5bd   : > { %v1762_v47 = vpop.permute.xlu0 %1761 }
 0x5c3   : > { %v4159_v40 = vpop.eup %4158 }
 0x5c4   : > { %v1679_v43 = vmul.f32 %v4159_v40, %v4141_v61 }
 0x5c6   : > { %v1681_v44 = vpack.c.bf16 %v1679_v43, %v1678_v42 }
 0x5c8   : > { %3878 = vmatprep.mubr.msk.bf16.mxu1 %vm1291_vm8, %v1681_v44 }
 0x5c9   : > { %3879 = vmatmul.mubr.msk.bf16.vlgmr.msra.gmra.mxu1 %vm1291_vm8, %v1682_v45 }
 0x5ca   : > { %3883 = vmatpush3.bf16.xpose.msra.mxu1 %v1779_v46  ;;  %3886 = vmatprep.mubr.msk.bf16.mxu1 %vm1225_vm6, %v1762_v47 }
 0x5cb   : > { %4032 = vmatprep.subr.msk.bf16.mxu1 %vm1225_vm6, %v1766_v48 }
 0x5d2   : > { %3885 = vmatpush3.bf16.xpose.msra.mxu1 %v1776_v50 }
 0x5d9   : > { %3887 = vmatmul.mubr.msk.bf16.vlgmr.msra.gmra.mxu1 %vm1225_vm6, %v1764_v49 }
 0x654   : > { %v3848_v51 = vpop.f32.mrf.mxu1 }
 0x655   : > { %1392 = vst.msk [vmem:[#allocation3 + $0x10] sm:$0xff] %vm1225_vm6, %v3848_v51 }
 0x656   : > { %v1376_v52 = vpop.f32.mrf.mxu1 }
 0x657   : > { %1390 = vst.msk [vmem:[#allocation3] sm:$0xff] %vm1225_vm6, %v1376_v52 }
 0x658   : > { %v3849_v53 = vpop.f32.mrf.mxu1 }
 0x65a   : > { %v1379_v54 = vpop.f32.mrf.mxu1 }
 0x65b   : > { %1391 = vst.msk [vmem:[#allocation3 + $0x8] sm:$0xff] %vm1225_vm6, %v1379_v54 }
 0x65c   : > { %v4743_v55 = vpop.f32.mrf.mxu1 }
 0x65e   : > { %v4745_v56 = vpop.f32.mrf.mxu1 }
 0x660   : > { %v3865_v57 = vpop.f32.mrf.mxu1 }
 0x662   : > { %v4747_v58 = vpop.f32.mrf.mxu1 }
 0x689   : > { %v4749_v59 = vpop.f32.mrf.mxu1 }
 0x68b   : > { %v4751_v60 = vpop.f32.mrf.mxu1 }
 0x68d   : > { %v3881_v61 = vpop.f32.mrf.mxu1 }
 0x68f   : > { %v4753_v62 = vpop.f32.mrf.mxu1 }
 0x699   : > { %v3888_v63 = vpop.f32.mrf.mxu1 }
 0x69a   : > { %v1831_v6 = vsel %vm1216_vm7, %v3888_v63, -1.7014117e+38 }
 0x69b   : > { %v1815_v0 = vpop.f32.mrf.mxu1  ;;  %v1838_v10 = vsel %vm1291_vm8, %v1831_v6, -inf }
 0x69c   : > { %v1829_v2 = vsel %vm1216_vm7, %v1815_v0, -1.7014117e+38 }
 0x69d   : > { %v3889_v3 = vpop.f32.mrf.mxu1  ;;  %v1832_v4 = vsel %vm1291_vm8, %v1829_v2, -inf }
 0x69e   : > { %1833 = vmax.xlane.f32.xlu0 %v1832_v4 }
 0x69f   : > { %v1818_v7 = vpop.f32.mrf.mxu1 }
 0x6a0   : > { %v1830_v9 = vsel %vm1216_vm7, %v1818_v7, -1.7014117e+38 }
 0x6a1   : > { %v1835_v11 = vsel %vm1291_vm8, %v1830_v9, -inf }
 0x6a2   : > { %1839 = vmax.xlane.f32.xlu0 %v1838_v10  ;;  %1836 = vmax.xlane.f32.xlu1 %v1835_v11 }
 0x727   : > { %v1834_v13 = vpop.xlane.xlu0 %1833 }
 0x728   : > { %v1841_v14 = vsub.f32 %v1829_v2, %v1834_v13 }
 0x72a   : > { %v1844_v15 = vmul.f32 1.442695, %v1841_v14 }
 0x72b   : > { %v1840_v16 = vpop.xlane.xlu0 %1839  ;;  %v1837_v17 = vpop.xlane.xlu1 %1836 }
 0x72c   : > { %4160 = vpow2.f32 %v1844_v15  ;;  %v1843_v18 = vsub.f32 %v1831_v6, %v1840_v16  ;;  %v1842_v19 = vsub.f32 %v1830_v9, %v1837_v17 }
 0x72e   : > { %v1848_v20 = vmul.f32 1.442695, %v1843_v18  ;;  %v1846_v21 = vmul.f32 1.442695, %v1842_v19 }
 0x730   : > { %4162 = vpow2.f32 %v1848_v20 }
 0x731   : > { %4164 = vpow2.f32 %v1846_v21 }
 0x739   : > { %v4161_v22 = vpop.eup %4160 }
 0x73a   : > { %v1850_v23 = vsel %vm1291_vm8, %v4161_v22, 0.0 }
 0x73b   : > { %1851 = vadd.xlane.f32.xlu0 %v1850_v23 }
 0x73d   : > { %v4163_v24 = vpop.eup %4162 }
 0x73e   : > { %v4165_v25 = vpop.eup %4164  ;;  %v1856_v26 = vsel %vm1291_vm8, %v4163_v24, 0.0 }
 0x73f   : > { %1857 = vadd.xlane.f32.xlu1 %v1856_v26  ;;  %v1853_v27 = vsel %vm1291_vm8, %v4165_v25, 0.0 }
 0x740   : > { %1854 = vadd.xlane.f32.xlu0 %v1853_v27 }
 0x750   : > { %1867 = vrot.lane.b32.xlu1 %v4587_v8, %s4298_s7 }
 0x754   : > { %1951 = vrot.lane.b32.xlu1 %v4771_v29, %s4289_s24 }
 0x756   : > { %1869 = vrot.lane.b32.xlu0 %v4592_v12, %s4298_s7 }
 0x758   : > { %1949 = vrot.lane.b32.xlu1 %v4633_v34, %s4289_s24  ;;  %s4301_s24 = smov 24  }
 0x7c4   : > { %v1852_v30 = vpop.xlane.xlu0 %1851 }
 0x7c5   : > { %4166 = vrcp.f32 %v1852_v30 }
 0x7c8   : > { %v1858_v31 = vpop.xlane.xlu1 %1857 }
 0x7c9   : > { %v1855_v32 = vpop.xlane.xlu0 %1854  ;;  %4168 = vrcp.f32 %v1858_v31 }
 0x7ca   : > { %4170 = vrcp.f32 %v1855_v32 }
 0x7cc   : > { %v1868_v35 = vpop.permute.xlu1 %1867 }
 0x7cd   : > { %v1870_v1 = vpop.permute.xlu0 %1869 }
 0x7ce   : > { %v1879_v8 = vsel %vm1338_vm9, %v1870_v1, 0  ;;  %4033 = vmatprep.subr.msk.bf16.mxu0 %vm1338_vm9, %v1870_v1 }
 0x7cf   : > { %3891 = vmatpush3.bf16.msra.mxu0 %v1879_v8 }
 0x7d0   : > { %3892 = vmatprep.subr.bf16.mxu0 %v1868_v35  ;;  %v1952_v33 = vpop.permute.xlu1 %1951 }
 0x7d1   : > { %v1963_v45 = vsel %vm1225_vm6, %v1952_v33, 0 }
 0x7d2   : > { %v4167_v12 = vpop.eup %4166 }
 0x7d3   : > { %3893 = vmatpush3.bf16.msra.mxu0 %v1868_v35  ;;  %v1862_v41 = vmul.f32 %v4167_v12, %v4161_v22 }
 0x7d4   : > { %4034 = vmatprep.subr.msk.bf16.mxu0 %vm1225_vm6, %v1952_v33  ;;  %v1950_v46 = vpop.permute.xlu1 %1949 }
 0x7d5   : > { %v1960_v47 = vsel %vm1225_vm6, %v1950_v46, 0 }
 0x7d6   : > { %v4169_v36 = vpop.eup %4168 }
 0x7d7   : > { %v4171_v37 = vpop.eup %4170  ;;  %v1864_v40 = vmul.f32 %v4169_v36, %v4163_v24 }
 0x7d8   : > { %v1863_v42 = vmul.f32 %v4171_v37, %v4165_v25 }
 0x7d9   : > { %v1866_v43 = vpack.c.bf16 %v1864_v40, %v1864_v40 }
 0x7da   : > { %v1865_v44 = vpack.c.bf16 %v1863_v42, %v1862_v41 }
 0x7dc   : > { %3894 = vmatprep.mubr.msk.bf16.mxu0 %vm1291_vm8, %v1865_v44 }
 0x7dd   : > { %3895 = vmatmul.mubr.msk.bf16.vlgmr.msra.gmra.mxu0 %vm1291_vm8, %v1866_v43 }
 0x7de   : > { %3899 = vmatpush3.bf16.xpose.msra.mxu0 %v1963_v45  ;;  %3902 = vmatprep.mubr.msk.bf16.mxu0 %vm1225_vm6, %v4633_v34 }
 0x7df   : > { %4035 = vmatprep.subr.msk.bf16.mxu0 %vm1225_vm6, %v1950_v46 }
 0x7e6   : > { %3901 = vmatpush3.bf16.xpose.msra.mxu0 %v1960_v47 }
 0x7ed   : > { %3903 = vmatmul.mubr.msk.bf16.vlgmr.msra.gmra.mxu0 %vm1225_vm6, %v4771_v29 }
 0x89d   : > { %v4791_v48 = vpop.f32.mrf.mxu0 }
 0x89f   : > { %v4793_v50 = vpop.f32.mrf.mxu0 }
 0x8a1   : > { %v3897_v49 = vpop.f32.mrf.mxu0 }
 0x8a3   : > { %v4795_v51 = vpop.f32.mrf.mxu0 }
 0x8ad   : > { %v3904_v52 = vpop.f32.mrf.mxu0 }
 0x8ae   : > { %v2015_v63 = vsel %vm1216_vm7, %v3904_v52, -1.7014117e+38 }
 0x8af   : > { %v1999_v53 = vpop.f32.mrf.mxu0  ;;  %v2022_v3 = vsel %vm1291_vm8, %v2015_v63, -inf }
 0x8b0   : > { %v2013_v54 = vsel %vm1216_vm7, %v1999_v53, -1.7014117e+38 }
 0x8b1   : > { %v3905_v57 = vpop.f32.mrf.mxu0  ;;  %v2016_v61 = vsel %vm1291_vm8, %v2013_v54, -inf }
 0x8b2   : > { %2017 = vmax.xlane.f32.xlu0 %v2016_v61 }
 0x8b3   : > { %v2002_v0 = vpop.f32.mrf.mxu0 }
 0x8b4   : > { %v2014_v2 = vsel %vm1216_vm7, %v2002_v0, -1.7014117e+38 }
 0x8b5   : > { %v2019_v4 = vsel %vm1291_vm8, %v2014_v2, -inf }
 0x8b6   : > { %2023 = vmax.xlane.f32.xlu0 %v2022_v3  ;;  %2020 = vmax.xlane.f32.xlu1 %v2019_v4 }
 0x93b   : > { %v2018_v6 = vpop.xlane.xlu0 %2017 }
 0x93c   : > { %v2025_v7 = vsub.f32 %v2013_v54, %v2018_v6 }
 0x93e   : > { %v2028_v9 = vmul.f32 1.442695, %v2025_v7 }
 0x93f   : > { %v2024_v10 = vpop.xlane.xlu0 %2023  ;;  %v2021_v11 = vpop.xlane.xlu1 %2020 }
 0x940   : > { %4172 = vpow2.f32 %v2028_v9  ;;  %v2027_v13 = vsub.f32 %v2015_v63, %v2024_v10  ;;  %v2026_v14 = vsub.f32 %v2014_v2, %v2021_v11 }
 0x942   : > { %v2032_v15 = vmul.f32 1.442695, %v2027_v13  ;;  %v2030_v16 = vmul.f32 1.442695, %v2026_v14 }
 0x944   : > { %4174 = vpow2.f32 %v2032_v15 }
 0x945   : > { %4176 = vpow2.f32 %v2030_v16 }
 0x94d   : > { %v4173_v17 = vpop.eup %4172 }
 0x94e   : > { %v2034_v18 = vsel %vm1291_vm8, %v4173_v17, 0.0 }
 0x94f   : > { %2035 = vadd.xlane.f32.xlu0 %v2034_v18 }
 0x951   : > { %v4175_v19 = vpop.eup %4174 }
 0x952   : > { %v4177_v20 = vpop.eup %4176  ;;  %v2040_v21 = vsel %vm1291_vm8, %v4175_v19, 0.0 }
 0x953   : > { %2041 = vadd.xlane.f32.xlu1 %v2040_v21  ;;  %v2037_v22 = vsel %vm1291_vm8, %v4177_v20, 0.0 }
 0x954   : > { %2038 = vadd.xlane.f32.xlu0 %v2037_v22 }
 0x964   : > { %2051 = vrot.lane.b32.xlu1 %v4633_v34, %s4293_s27 }
 0x968   : > { %2122 = vrot.lane.b32.xlu1 %v4771_v29, %s4288_s20 }
 0x96a   : > { %2053 = vrot.lane.b32.xlu0 %v4771_v29, %s4293_s27 }
 0x96c   : > { %2120 = vrot.lane.b32.xlu1 %v4633_v34, %s4288_s20  ;;  %s4300_s20 = smov 16  }
 0x96e   : > { %2116 = vrot.lane.b32.xlu0 %v4633_v34, %s4290_s23 }
 0x970   : > { %2118 = vrot.lane.b32.xlu1 %v4771_v29, %s4290_s23  ;;  %s5232_s23 = scalar_lea.vmem %s5188_s8, %s4426_s1 }
 0x9d8   : > { %v2036_v23 = vpop.xlane.xlu0 %2035 }
 0x9d9   : > { %4178 = vrcp.f32 %v2036_v23 }
 0x9dc   : > { %v2042_v24 = vpop.xlane.xlu1 %2041 }
 0x9dd   : > { %v2039_v25 = vpop.xlane.xlu0 %2038  ;;  %4180 = vrcp.f32 %v2042_v24 }
 0x9de   : > { %4182 = vrcp.f32 %v2039_v25 }
 0x9e0   : > { %v2052_v27 = vpop.permute.xlu1 %2051 }
 0x9e1   : > { %v2054_v26 = vpop.permute.xlu0 %2053 }
 0x9e2   : > { %v2063_v28 = vsel %vm1338_vm9, %v2054_v26, 0  ;;  %4036 = vmatprep.subr.msk.bf16.mxu1 %vm1338_vm9, %v2054_v26 }
 0x9e3   : > { %3907 = vmatpush3.bf16.msra.mxu1 %v2063_v28 }
 0x9e4   : > { %3908 = vmatprep.subr.bf16.mxu1 %v2052_v27  ;;  %v2123_v30 = vpop.permute.xlu1 %2122 }
 0x9e5   : > { %v2117_v37 = vpop.permute.xlu0 %2116  ;;  %v2134_v40 = vsel %vm1225_vm6, %v2123_v30, 0 }
 0x9e6   : > { %v4179_v31 = vpop.eup %4178 }
 0x9e7   : > { %3909 = vmatpush3.bf16.msra.mxu1 %v2052_v27  ;;  %v2046_v8 = vmul.f32 %v4179_v31, %v4173_v17 }
 0x9e8   : > { %4037 = vmatprep.subr.msk.bf16.mxu1 %vm1225_vm6, %v2123_v30  ;;  %v2121_v41 = vpop.permute.xlu1 %2120 }
 0x9e9   : > { %v2131_v42 = vsel %vm1225_vm6, %v2121_v41, 0 }
 0x9ea   : > { %v4181_v32 = vpop.eup %4180 }
 0x9eb   : > { %v4183_v1 = vpop.eup %4182  ;;  %v2048_v35 = vmul.f32 %v4181_v32, %v4175_v19 }
 0x9ec   : > { %v2047_v33 = vmul.f32 %v4183_v1, %v4177_v20  ;;  %v2119_v43 = vpop.permute.xlu1 %2118 }
 0x9ed   : > { %v2050_v12 = vpack.c.bf16 %v2048_v35, %v2048_v35 }
 0x9ee   : > { %v2049_v36 = vpack.c.bf16 %v2047_v33, %v2046_v8 }
 0x9f0   : > { %3910 = vmatprep.mubr.msk.bf16.mxu1 %vm1291_vm8, %v2049_v36 }
 0x9f1   : > { %3911 = vmatmul.mubr.msk.bf16.vlgmr.msra.gmra.mxu1 %vm1291_vm8, %v2050_v12 }
 0x9f2   : > { %3915 = vmatpush3.bf16.xpose.msra.mxu1 %v2134_v40  ;;  %3918 = vmatprep.mubr.msk.bf16.mxu1 %vm1225_vm6, %v2117_v37 }
 0x9f3   : > { %4038 = vmatprep.subr.msk.bf16.mxu1 %vm1225_vm6, %v2121_v41 }
 0x9fa   : > { %3917 = vmatpush3.bf16.xpose.msra.mxu1 %v2131_v42 }
 0xa01   : > { %3919 = vmatmul.mubr.msk.bf16.vlgmr.msra.gmra.mxu1 %vm1225_vm6, %v2119_v43 }
 0xab1   : > { %v3912_v44 = vpop.f32.mrf.mxu1 }
 0xab2   : > { %2115 = vst.msk [vmem:[#allocation3 + $0x28] sm:$0xff] %vm1225_vm6, %v3912_v44 }
 0xab3   : > { %v2099_v45 = vpop.f32.mrf.mxu1 }
 0xab4   : > { %2113 = vst.msk [vmem:[#allocation3 + $0x18] sm:$0xff] %vm1225_vm6, %v2099_v45 }
 0xab5   : > { %v3913_v46 = vpop.f32.mrf.mxu1 }
 0xab7   : > { %v2102_v47 = vpop.f32.mrf.mxu1 }
 0xab8   : > { %2114 = vst.msk [vmem:[#allocation3 + $0x20] sm:$0xff] %vm1225_vm6, %v2102_v47 }
 0xac1   : > { %v3920_v49 = vpop.f32.mrf.mxu1 }
 0xac2   : > { %v2186_v61 = vsel %vm1216_vm7, %v3920_v49, -1.7014117e+38 }
 0xac3   : > { %v2170_v52 = vpop.f32.mrf.mxu1  ;;  %v2193_v2 = vsel %vm1291_vm8, %v2186_v61, -inf }
 0xac4   : > { %v2184_v53 = vsel %vm1216_vm7, %v2170_v52, -1.7014117e+38 }
 0xac5   : > { %v3921_v54 = vpop.f32.mrf.mxu1  ;;  %v2187_v57 = vsel %vm1291_vm8, %v2184_v53, -inf }
 0xac6   : > { %2188 = vmax.xlane.f32.xlu0 %v2187_v57 }
 0xac7   : > { %v2173_v63 = vpop.f32.mrf.mxu1 }
 0xac8   : > { %v2185_v0 = vsel %vm1216_vm7, %v2173_v63, -1.7014117e+38 }
 0xac9   : > { %v2190_v3 = vsel %vm1291_vm8, %v2185_v0, -inf }
 0xaca   : > { %2194 = vmax.xlane.f32.xlu0 %v2193_v2  ;;  %2191 = vmax.xlane.f32.xlu1 %v2190_v3 }
 0xb4f   : > { %v2189_v4 = vpop.xlane.xlu0 %2188 }
 0xb50   : > { %v2196_v6 = vsub.f32 %v2184_v53, %v2189_v4 }
 0xb52   : > { %v2199_v7 = vmul.f32 1.442695, %v2196_v6 }
 0xb53   : > { %v2195_v9 = vpop.xlane.xlu0 %2194  ;;  %v2192_v10 = vpop.xlane.xlu1 %2191 }
 0xb54   : > { %4184 = vpow2.f32 %v2199_v7  ;;  %v2198_v11 = vsub.f32 %v2186_v61, %v2195_v9  ;;  %v2197_v13 = vsub.f32 %v2185_v0, %v2192_v10 }
 0xb56   : > { %v2203_v14 = vmul.f32 1.442695, %v2198_v11  ;;  %v2201_v15 = vmul.f32 1.442695, %v2197_v13 }
 0xb58   : > { %4186 = vpow2.f32 %v2203_v14 }
 0xb59   : > { %4188 = vpow2.f32 %v2201_v15 }
 0xb61   : > { %v4185_v16 = vpop.eup %4184 }
 0xb62   : > { %v2205_v17 = vsel %vm1291_vm8, %v4185_v16, 0.0 }
 0xb63   : > { %2206 = vadd.xlane.f32.xlu0 %v2205_v17 }
 0xb65   : > { %v4187_v18 = vpop.eup %4186 }
 0xb66   : > { %v4189_v19 = vpop.eup %4188  ;;  %v2211_v20 = vsel %vm1291_vm8, %v4187_v18, 0.0 }
 0xb67   : > { %2212 = vadd.xlane.f32.xlu1 %v2211_v20  ;;  %v2208_v21 = vsel %vm1291_vm8, %v4189_v19, 0.0 }
 0xb68   : > { %2209 = vadd.xlane.f32.xlu0 %v2208_v21 }
 0xb78   : > { %2222 = vrot.lane.b32.xlu1 %v4633_v34, %s4294_s2 }
 0xb7c   : > { %2305 = vrot.lane.b32.xlu1 %v4771_v29, %s4291_s26 }
 0xb7e   : > { %2224 = vrot.lane.b32.xlu0 %v4771_v29, %s4294_s2 }
 0xb80   : > { %2303 = vrot.lane.b32.xlu1 %v4633_v34, %s4291_s26 }
 0xb82   : > { %2299 = vrot.lane.b32.xlu0 %v4633_v34, %s4292_s29 }
 0xb84   : > { %2301 = vrot.lane.b32.xlu1 %v4771_v29, %s4292_s29  ;;  %s5235_s29 = sld [smem:[#allocation13_spill]] (!%p3680_p6) }
 0xbec   : > { %v2207_v22 = vpop.xlane.xlu0 %2206 }
 0xbed   : > { %4190 = vrcp.f32 %v2207_v22 }
 0xbf0   : > { %v2213_v23 = vpop.xlane.xlu1 %2212 }
 0xbf1   : > { %v2210_v24 = vpop.xlane.xlu0 %2209  ;;  %4192 = vrcp.f32 %v2213_v23 }
 0xbf2   : > { %4194 = vrcp.f32 %v2210_v24 }
 0xbf4   : > { %v2223_v26 = vpop.permute.xlu1 %2222 }
 0xbf5   : > { %v2225_v25 = vpop.permute.xlu0 %2224 }
 0xbf6   : > { %v2234_v27 = vsel %vm1338_vm9, %v2225_v25, 0  ;;  %4039 = vmatprep.subr.msk.bf16.mxu0 %vm1338_vm9, %v2225_v25 }
 0xbf7   : > { %3923 = vmatpush3.bf16.msra.mxu0 %v2234_v27 }
 0xbf8   : > { %3924 = vmatprep.subr.bf16.mxu0 %v2223_v26  ;;  %v2306_v28 = vpop.permute.xlu1 %2305 }
 0xbf9   : > { %v2300_v36 = vpop.permute.xlu0 %2299  ;;  %v2317_v37 = vsel %vm1225_vm6, %v2306_v28, 0 }
 0xbfa   : > { %v4191_v30 = vpop.eup %4190 }
 0xbfb   : > { %3925 = vmatpush3.bf16.msra.mxu0 %v2223_v26  ;;  %v2217_v35 = vmul.f32 %v4191_v30, %v4185_v16 }
 0xbfc   : > { %4040 = vmatprep.subr.msk.bf16.mxu0 %vm1225_vm6, %v2306_v28  ;;  %v2304_v40 = vpop.permute.xlu1 %2303 }
 0xbfd   : > { %v2314_v41 = vsel %vm1225_vm6, %v2304_v40, 0 }
 0xbfe   : > { %v4193_v31 = vpop.eup %4192 }
 0xbff   : > { %v4195_v32 = vpop.eup %4194  ;;  %v2219_v1 = vmul.f32 %v4193_v31, %v4187_v18 }
 0xc00   : > { %v2218_v8 = vmul.f32 %v4195_v32, %v4189_v19  ;;  %v2302_v42 = vpop.permute.xlu1 %2301 }
 0xc01   : > { %v2221_v33 = vpack.c.bf16 %v2219_v1, %v2219_v1 }
 0xc02   : > { %v2220_v12 = vpack.c.bf16 %v2218_v8, %v2217_v35 }
 0xc04   : > { %3926 = vmatprep.mubr.msk.bf16.mxu0 %vm1291_vm8, %v2220_v12 }
 0xc05   : > { %3927 = vmatmul.mubr.msk.bf16.vlgmr.msra.gmra.mxu0 %vm1291_vm8, %v2221_v33 }
 0xc06   : > { %3931 = vmatpush3.bf16.xpose.msra.mxu0 %v2317_v37  ;;  %3934 = vmatprep.mubr.msk.bf16.mxu0 %vm1225_vm6, %v2300_v36 }
 0xc07   : > { %4041 = vmatprep.subr.msk.bf16.mxu0 %vm1225_vm6, %v2304_v40 }
 0xc0e   : > { %3933 = vmatpush3.bf16.xpose.msra.mxu0 %v2314_v41 }
 0xc15   : > { %3935 = vmatmul.mubr.msk.bf16.vlgmr.msra.gmra.mxu0 %vm1225_vm6, %v2302_v42 }
 0xcc5   : > { %v4868_v43 = vpop.f32.mrf.mxu0 }
 0xcc7   : > { %v4870_v44 = vpop.f32.mrf.mxu0 }
 0xcc9   : > { %v3929_v45 = vpop.f32.mrf.mxu0 }
 0xccb   : > { %v4872_v46 = vpop.f32.mrf.mxu0 }
 0xcd5   : > { %v3936_v47 = vpop.f32.mrf.mxu0 }
 0xcd6   : > { %v2369_v57 = vsel %vm1216_vm7, %v3936_v47, -1.7014117e+38 }
 0xcd7   : > { %v2353_v49 = vpop.f32.mrf.mxu0  ;;  %v2376_v0 = vsel %vm1291_vm8, %v2369_v57, -inf }
 0xcd8   : > { %v2367_v52 = vsel %vm1216_vm7, %v2353_v49, -1.7014117e+38 }
 0xcd9   : > { %v3937_v53 = vpop.f32.mrf.mxu0  ;;  %v2370_v54 = vsel %vm1291_vm8, %v2367_v52, -inf }
 0xcda   : > { %2371 = vmax.xlane.f32.xlu0 %v2370_v54 }
 0xcdb   : > { %v2356_v61 = vpop.f32.mrf.mxu0 }
 0xcdc   : > { %v2368_v63 = vsel %vm1216_vm7, %v2356_v61, -1.7014117e+38 }
 0xcdd   : > { %v2373_v2 = vsel %vm1291_vm8, %v2368_v63, -inf }
 0xcde   : > { %2377 = vmax.xlane.f32.xlu0 %v2376_v0  ;;  %2374 = vmax.xlane.f32.xlu1 %v2373_v2 }
 0xd63   : > { %v2372_v3 = vpop.xlane.xlu0 %2371 }
 0xd64   : > { %v2379_v4 = vsub.f32 %v2367_v52, %v2372_v3 }
 0xd66   : > { %v2382_v6 = vmul.f32 1.442695, %v2379_v4 }
 0xd67   : > { %v2378_v7 = vpop.xlane.xlu0 %2377  ;;  %v2375_v9 = vpop.xlane.xlu1 %2374 }
 0xd68   : > { %4196 = vpow2.f32 %v2382_v6  ;;  %v2381_v10 = vsub.f32 %v2369_v57, %v2378_v7  ;;  %v2380_v11 = vsub.f32 %v2368_v63, %v2375_v9 }
 0xd6a   : > { %v2386_v13 = vmul.f32 1.442695, %v2381_v10  ;;  %v2384_v14 = vmul.f32 1.442695, %v2380_v11 }
 0xd6c   : > { %4198 = vpow2.f32 %v2386_v13 }
 0xd6d   : > { %4200 = vpow2.f32 %v2384_v14 }
 0xd75   : > { %v4197_v15 = vpop.eup %4196 }
 0xd76   : > { %v2388_v16 = vsel %vm1291_vm8, %v4197_v15, 0.0 }
 0xd77   : > { %2389 = vadd.xlane.f32.xlu0 %v2388_v16 }
 0xd79   : > { %v4199_v17 = vpop.eup %4198 }
 0xd7a   : > { %v4201_v18 = vpop.eup %4200  ;;  %v2394_v19 = vsel %vm1291_vm8, %v4199_v17, 0.0 }
 0xd7b   : > { %2395 = vadd.xlane.f32.xlu1 %v2394_v19  ;;  %v2391_v20 = vsel %vm1291_vm8, %v4201_v18, 0.0 }
 0xd7c   : > { %2392 = vadd.xlane.f32.xlu0 %v2391_v20 }
 0xd8c   : > { %2405 = vrot.lane.b32.xlu1 %v4633_v34, %s4295_s19 }
 0xd90   : > { %2488 = vrot.lane.b32.xlu1 %v4771_v29, %s4296_s30 }
 0xd92   : > { %2407 = vrot.lane.b32.xlu0 %v4771_v29, %s4295_s19 }
 0xd94   : > { %2486 = vrot.lane.b32.xlu1 %v4633_v34, %s4296_s30  ;;  %s5234_s30 = scalar_lea.vmem %s5194_s14, %s4426_s1 }
 0xd96   : > { %2482 = vrot.lane.b32.xlu0 %v4633_v34, %s4297_s28 }
 0xd98   : > { %2484 = vrot.lane.b32.xlu1 %v4771_v29, %s4297_s28  ;;  %s4299_s28 = smov 8  }
 0xe00   : > { %v2390_v21 = vpop.xlane.xlu0 %2389 }
 0xe01   : > { %4202 = vrcp.f32 %v2390_v21 }
 0xe04   : > { %v2396_v22 = vpop.xlane.xlu1 %2395 }
 0xe05   : > { %v2393_v23 = vpop.xlane.xlu0 %2392  ;;  %4204 = vrcp.f32 %v2396_v22 }
 0xe06   : > { %4206 = vrcp.f32 %v2393_v23 }
 0xe08   : > { %v2406_v25 = vpop.permute.xlu1 %2405 }
 0xe09   : > { %v2408_v24 = vpop.permute.xlu0 %2407 }
 0xe0a   : > { %v2417_v26 = vsel %vm1338_vm9, %v2408_v24, 0  ;;  %4042 = vmatprep.subr.msk.bf16.mxu1 %vm1338_vm9, %v2408_v24 }
 0xe0b   : > { %3939 = vmatpush3.bf16.msra.mxu1 %v2417_v26 }
 0xe0c   : > { %3940 = vmatprep.subr.bf16.mxu1 %v2406_v25  ;;  %v2489_v27 = vpop.permute.xlu1 %2488 }
 0xe0d   : > { %v2483_v12 = vpop.permute.xlu0 %2482  ;;  %v2500_v36 = vsel %vm1225_vm6, %v2489_v27, 0 }
 0xe0e   : > { %v4203_v28 = vpop.eup %4202 }
 0xe0f   : > { %3941 = vmatpush3.bf16.msra.mxu1 %v2406_v25  ;;  %v2400_v1 = vmul.f32 %v4203_v28, %v4197_v15  ;;  %v4100_v28 = vld [vmem:[%s4449_s18 + $0x8] sm:$0xff]  }
 0xe10   : > { %4043 = vmatprep.subr.msk.bf16.mxu1 %vm1225_vm6, %v2489_v27  ;;  %v2487_v37 = vpop.permute.xlu1 %2486 }
 0xe11   : > { %v2497_v40 = vsel %vm1225_vm6, %v2487_v37, 0 }
 0xe12   : > { %v4205_v30 = vpop.eup %4204 }
 0xe13   : > { %v4207_v31 = vpop.eup %4206  ;;  %v2402_v32 = vmul.f32 %v4205_v30, %v4199_v17 }
 0xe14   : > { %v2401_v35 = vmul.f32 %v4207_v31, %v4201_v18  ;;  %v2485_v41 = vpop.permute.xlu1 %2484 }
 0xe15   : > { %v2404_v8 = vpack.c.bf16 %v2402_v32, %v2402_v32  ;;  %v4101_v32 = vld [vmem:[%s4449_s18] sm:$0xff]  }
 0xe16   : > { %v2403_v33 = vpack.c.bf16 %v2401_v35, %v2400_v1 }
 0xe18   : > { %3942 = vmatprep.mubr.msk.bf16.mxu1 %vm1291_vm8, %v2403_v33 }
 0xe19   : > { %3943 = vmatmul.mubr.msk.bf16.vlgmr.msra.gmra.mxu1 %vm1291_vm8, %v2404_v8 }
 0xe1a   : > { %3947 = vmatpush3.bf16.xpose.msra.mxu1 %v2500_v36  ;;  %3950 = vmatprep.mubr.msk.bf16.mxu1 %vm1225_vm6, %v2483_v12 }
 0xe1b   : > { %4044 = vmatprep.subr.msk.bf16.mxu1 %vm1225_vm6, %v2487_v37 }
 0xe22   : > { %3949 = vmatpush3.bf16.xpose.msra.mxu1 %v2497_v40 }
 0xe23   : > { %3978 = vmatprep.subr.bf16.mxu1 %v4286_v5 }
 0xe29   : > { %3951 = vmatmul.mubr.msk.bf16.vlgmr.msra.gmra.mxu1 %vm1225_vm6, %v2485_v41 }
 0xe2a   : > { %3982 = vmatprep.mubr.msk.bf16.mxu1 %vm4287_vm5, %v4286_v5 }
 0xed9   : > { %v4911_v42 = vpop.f32.mrf.mxu1 }
 0xedb   : > { %v2453_v45 = vpop.f32.mrf.mxu1 }
 0xedd   : > { %v3945_v47 = vpop.f32.mrf.mxu1 }
 0xedf   : > { %v2456_v49 = vpop.f32.mrf.mxu1 }
 0xee9   : > { %v3952_v52 = vpop.f32.mrf.mxu1 }
 0xeea   : > { %v2552_v63 = vsel %vm1216_vm7, %v3952_v52, -1.7014117e+38 }
 0xeeb   : > { %v2536_v53 = vpop.f32.mrf.mxu1  ;;  %v2559_v4 = vsel %vm1291_vm8, %v2552_v63, -inf }
 0xeec   : > { %v2550_v54 = vsel %vm1216_vm7, %v2536_v53, -1.7014117e+38 }
 0xeed   : > { %v3953_v57 = vpop.f32.mrf.mxu1  ;;  %v2553_v61 = vsel %vm1291_vm8, %v2550_v54, -inf }
 0xeee   : > { %2554 = vmax.xlane.f32.xlu0 %v2553_v61 }
 0xeef   : > { %v2539_v0 = vpop.f32.mrf.mxu1 }
 0xef0   : > { %v2551_v2 = vsel %vm1216_vm7, %v2539_v0, -1.7014117e+38 }
 0xef1   : > { %v2556_v3 = vsel %vm1291_vm8, %v2551_v2, -inf }
 0xef2   : > { %2560 = vmax.xlane.f32.xlu0 %v2559_v4  ;;  %2557 = vmax.xlane.f32.xlu1 %v2556_v3 }
 0xf77   : > { %v2555_v6 = vpop.xlane.xlu0 %2554 }
 0xf78   : > { %v2562_v7 = vsub.f32 %v2550_v54, %v2555_v6  ;;  %v4245_v6 = vld [vmem:[#allocation2 + $0x8] sm:$0xff] }
 0xf7a   : > { %v2565_v9 = vmul.f32 1.442695, %v2562_v7 }
 0xf7b   : > { %v2561_v10 = vpop.xlane.xlu0 %2560  ;;  %v2558_v11 = vpop.xlane.xlu1 %2557 }
 0xf7c   : > { %4208 = vpow2.f32 %v2565_v9  ;;  %v2564_v13 = vsub.f32 %v2552_v63, %v2561_v10  ;;  %v2563_v14 = vsub.f32 %v2551_v2, %v2558_v11  ;;  %v3657_v63 = vld [vmem:[%s5232_s23] ss:$0 sm:$0xff]  ;;  %s5238_s23 = sld [smem:[#allocation16_spill]] (!%p3680_p6) }
 0xf7d   : > { %v4244_v2 = vld [vmem:[#allocation2] sm:$0xff] }
 0xf7e   : > { %v2569_v15 = vmul.f32 1.442695, %v2564_v13  ;;  %v2567_v16 = vmul.f32 1.442695, %v2563_v14 }
 0xf80   : > { %4210 = vpow2.f32 %v2569_v15 }
 0xf81   : > { %4212 = vpow2.f32 %v2567_v16 }
 0xf89   : > { %v4209_v39 = vpop.eup %4208 }
 0xf8a   : > { %v2571_v17 = vsel %vm1291_vm8, %v4209_v39, 0.0 }
 0xf8b   : > { %2572 = vadd.xlane.f32.xlu0 %v2571_v17 }
 0xf8d   : > { %v4211_v18 = vpop.eup %4210 }
 0xf8e   : > { %v4213_v19 = vpop.eup %4212  ;;  %v2577_v20 = vsel %vm1291_vm8, %v4211_v18, 0.0 }
 0xf8f   : > { %2578 = vadd.xlane.f32.xlu1 %v2577_v20  ;;  %v2574_v21 = vsel %vm1291_vm8, %v4213_v19, 0.0 }
 0xf90   : > { %2575 = vadd.xlane.f32.xlu0 %v2574_v21 }
 0xfa0   : > { %2588 = vrot.lane.b32.xlu1 %v4633_v34, %s4298_s7 }
 0xfa4   : > { %1564 = vrot.lane.b32.xlu1 %v4745_v56, %s4299_s28 }
 0xfa6   : > { %2590 = vrot.lane.b32.xlu0 %v4771_v29, %s4298_s7 }
 0xfa8   : > { %1566 = vrot.lane.b32.xlu1 %v4747_v58, %s4299_s28 }
 0xfaa   : > { %1748 = vrot.lane.b32.xlu0 %v4751_v60, %s4300_s20 }
 0xfac   : > { %1750 = vrot.lane.b32.xlu1 %v4753_v62, %s4300_s20 }
 0xfae   : > { %1932 = vrot.lane.b32.xlu0 %v4793_v50, %s4301_s24 }
 0xfb0   : > { %1934 = vrot.lane.b32.xlu1 %v4795_v51, %s4301_s24 }
 0xfb2   : > { %1568 = vrot.lane.b32.xlu0 %v4743_v55, %s4299_s28 }
 0xfb4   : > { %2287 = vrot.lane.b32.xlu1 %v4870_v44, %s4299_s28 }
 0xfb6   : > { %1752 = vrot.lane.b32.xlu0 %v4749_v59, %s4300_s20 }
 0xfb8   : > { %2470 = vrot.lane.b32.xlu1 %v2453_v45, %s4300_s20 }
 0xfba   : > { %1936 = vrot.lane.b32.xlu0 %v4791_v48, %s4301_s24 }
 0xfbc   : > { %2291 = vrot.lane.b32.xlu1 %v4868_v43, %s4299_s28 }
 0xfbe   : > { %2289 = vrot.lane.b32.xlu0 %v4872_v46, %s4299_s28  ;;  %s5237_s28 = sld [smem:[#allocation15_spill]] (!%p3680_p6) }
 0xfc2   : > { %2472 = vrot.lane.b32.xlu0 %v2456_v49, %s4300_s20 }
0x1014   : > { %v2573_v34 = vpop.xlane.xlu0 %2572 }
0x1015   : > { %4214 = vrcp.f32 %v2573_v34 }
0x1018   : > { %v2579_v56 = vpop.xlane.xlu1 %2578 }
0x1019   : > { %v2576_v55 = vpop.xlane.xlu0 %2575  ;;  %4216 = vrcp.f32 %v2579_v56 }
0x101a   : > { %4218 = vrcp.f32 %v2576_v55  ;;  %v4246_v55 = vld [vmem:[#allocation2 + $0x10] sm:$0xff] }
0x101c   : > { %v2589_v58 = vpop.permute.xlu1 %2588 }
0x101d   : > { %v2591_v60 = vpop.permute.xlu0 %2590 }
0x101e   : > { %v2600_v59 = vsel %vm1338_vm9, %v2591_v60, 0  ;;  %4045 = vmatprep.subr.msk.bf16.mxu0 %vm1338_vm9, %v2591_v60 }
0x101f   : > { %3955 = vmatpush3.bf16.msra.mxu0 %v2600_v59 }
0x1020   : > { %3956 = vmatprep.subr.bf16.mxu0 %v2589_v58  ;;  %v1565_v62 = vpop.permute.xlu1 %1564 }
0x1021   : > { %v1749_v29 = vpop.permute.xlu0 %1748  ;;  %1574 = vst.msk [vmem:[#allocation3] sm:$0xff] %vm1573_vm10, %v1565_v62 }
0x1022   : > { %1758 = vst.msk [vmem:[#allocation3] sm:$0xff] %vm1757_vm11, %v1749_v29  ;;  %v4215_v50 = vpop.eup %4214 }
0x1023   : > { %3957 = vmatpush3.bf16.msra.mxu0 %v2589_v58  ;;  %v2583_v23 = vmul.f32 %v4215_v50, %v4209_v39 }
0x1024   : > { %v1567_v48 = vpop.permute.xlu1 %1566  ;;  %3962 = vmatprep.subr.bf16.mxu0 %v4286_v5 }
0x1025   : > { %v1933_v51 = vpop.permute.xlu0 %1932  ;;  %1575 = vst.msk [vmem:[#allocation3 + $0x8] sm:$0xff] %vm1573_vm10, %v1567_v48 }
0x1026   : > { %v4217_v43 = vpop.eup %4216  ;;  %1942 = vst.msk [vmem:[#allocation3] sm:$0xff] %vm1941_vm12, %v1933_v51  ;;  %v4247_v51 = vld [vmem:[#allocation2 + $0x18] sm:$0xff] }
0x1027   : > { %v4219_v44 = vpop.eup %4218  ;;  %v2585_v46 = vmul.f32 %v4217_v43, %v4211_v18 }
0x1028   : > { %v1751_v22 = vpop.permute.xlu1 %1750  ;;  %v2584_v24 = vmul.f32 %v4219_v44, %v4213_v19 }
0x1029   : > { %v1569_v25 = vpop.permute.xlu0 %1568  ;;  %1759 = vst.msk [vmem:[#allocation3 + $0x8] sm:$0xff] %vm1757_vm11, %v1751_v22  ;;  %v2587_v26 = vpack.c.bf16 %v2585_v46, %v2585_v46 }
0x102a   : > { %1576 = vst.msk [vmem:[#allocation3 + $0x10] sm:$0xff] %vm1573_vm10, %v1569_v25  ;;  %v2586_v27 = vpack.c.bf16 %v2584_v24, %v2583_v23 }
0x102c   : > { %3958 = vmatprep.mubr.msk.bf16.mxu0 %vm1291_vm8, %v2586_v27  ;;  %v1935_v30 = vpop.permute.xlu1 %1934 }
0x102d   : > { %v1753_v31 = vpop.permute.xlu0 %1752  ;;  %3959 = vmatmul.mubr.msk.bf16.vlgmr.msra.gmra.mxu0 %vm1291_vm8, %v2587_v26  ;;  %1943 = vst.msk [vmem:[#allocation3 + $0x8] sm:$0xff] %vm1941_vm12, %v1935_v30  ;;  %v2665_v33 = vld [vmem:[#allocation3] sm:$0xff]  ;;  %v4248_v26 = vld [vmem:[#allocation2 + $0x20] sm:$0xff] }
0x102e   : > { %1760 = vst.msk [vmem:[#allocation3 + $0x10] sm:$0xff] %vm1757_vm11, %v1753_v31  ;;  %3963 = vmatpush3.bf16.msra.mxu0 %v4100_v28  ;;  %3966 = vmatprep.mubr.msk.bf16.mxu0 %vm4287_vm5, %v4286_v5 }
0x102f   : > { %3964 = vmatprep.subr.bf16.mxu0 %v4286_v5 }
0x1030   : > { %v2288_v1 = vpop.permute.xlu1 %2287 }
0x1031   : > { %v1937_v35 = vpop.permute.xlu0 %1936  ;;  %2296 = vst.msk [vmem:[#allocation3 + $0x18] sm:$0xff] %vm1573_vm10, %v2288_v1 }
0x1032   : > { %1944 = vst.msk [vmem:[#allocation3 + $0x10] sm:$0xff] %vm1941_vm12, %v1937_v35  ;;  %3965 = vmatpush3.bf16.msra.mxu0 %v4101_v32 }
0x1033   : > { %3994 = vmatprep.subr.bf16.mxu0 %v4286_v5 }
0x1034   : > { %v2471_v8 = vpop.permute.xlu1 %2470  ;;  %v2666_v12 = vld [vmem:[#allocation3 + $0x8] sm:$0xff] }
0x1035   : > { %v2290_v36 = vpop.permute.xlu0 %2289  ;;  %2479 = vst.msk [vmem:[#allocation3 + $0x18] sm:$0xff] %vm1757_vm11, %v2471_v8  ;;  %v2671_v37 = vpack.c.bf16 %v2666_v12, %v2665_v33  ;;  %v4249_v8 = vld [vmem:[#allocation2 + $0x28] sm:$0xff] }
0x1036   : > { %2297 = vst.msk [vmem:[#allocation3 + $0x20] sm:$0xff] %vm1573_vm10, %v2290_v36 }
0x1037   : > { %3967 = vmatmul.mubr.msk.bf16.vlgmr.msra.gmra.mxu0 %vm1018_vm4, %v2671_v37 }
0x1038   : > { %v2292_v40 = vpop.permute.xlu1 %2291  ;;  %3970 = vmatprep.mubr.msk.bf16.mxu0 %vm4287_vm5, %v4286_v5 }
0x1039   : > { %v2473_v41 = vpop.permute.xlu0 %2472  ;;  %2298 = vst.msk [vmem:[#allocation3 + $0x28] sm:$0xff] %vm1573_vm10, %v2292_v40  ;;  %v2667_v15 = vld [vmem:[#allocation3 + $0x10] sm:$0xff] }
0x103a   : > { %2480 = vst.msk [vmem:[#allocation3 + $0x20] sm:$0xff] %vm1757_vm11, %v2473_v41  ;;  %v4102_v41 = vld [vmem:[%s4466_s5 + $0x8] sm:$0xff]  }
0x103b   : > { %3979 = vmatpush3.bf16.msra.mxu1 %v4102_v41 }
0x103c   : > { %3980 = vmatprep.subr.bf16.mxu1 %v4286_v5 }
0x10ed   : > { %v3960_v45 = vpop.f32.mrf.mxu0 }
0x10ef   : > { %v2636_v47 = vpop.f32.mrf.mxu0 }
0x10f0   : > { %2653 = vrot.lane.b32.xlu1 %v2636_v47, %s4301_s24 }
0x10f1   : > { %v3961_v49 = vpop.f32.mrf.mxu0 }
0x10f3   : > { %v2639_v52 = vpop.f32.mrf.mxu0 }
0x10f4   : > { %2474 = vrot.lane.b32.xlu1 %v4911_v42, %s4300_s20  ;;  %2655 = vrot.lane.b32.xlu0 %v2639_v52, %s4301_s24 }
0x10f7   : > { %v2740_v53 = vpop.f32.mrf.mxu0 }
0x10f8   : > { %2657 = vrot.lane.b32.xlu1 %v3960_v45, %s4301_s24  ;;  %v2741_v0 = vadd.f32 %v3657_v63, %v2740_v53  ;;  %v4103_v45 = vld [vmem:[%s4466_s5] sm:$0xff]  }
0x10f9   : > { %v3968_v54 = vpop.f32.mrf.mxu0  ;;  %3981 = vmatpush3.bf16.msra.mxu1 %v4103_v45 }
0x10fa   : > { %v4987_v3 = vadd.f32 %v4244_v2, %v2741_v0 }
0x10fb   : > { %v2743_v57 = vpop.f32.mrf.mxu0 }
0x10fc   : > { %v2771_v42 = vsel %vm1018_vm4, %v4987_v3, 0.0  ;;  %v2744_v4 = vadd.f32 %v3657_v63, %v2743_v57 }
0x10fd   : > { %v3969_v61 = vpop.f32.mrf.mxu0 }
0x10fe   : > { %v4991_v7 = vadd.f32 %v4245_v6, %v2744_v4 }
0x1100   : > { %v2774_v9 = vsel %vm1018_vm4, %v4991_v7, 0.0 }
0x1113   : > { %2772 = vadd.xlane.f32.xlu0 %v2771_v42 }
0x111c   : > { %2775 = vadd.xlane.f32.xlu1 %v2774_v9 }
0x1162   : > { %v2654_v10 = vpop.permute.xlu1 %2653 }
0x1163   : > { %2662 = vst.msk [vmem:[#allocation3 + $0x18] sm:$0xff] %vm1941_vm12, %v2654_v10 }
0x1166   : > { %v2656_v11 = vpop.permute.xlu0 %2655  ;;  %v2475_v13 = vpop.permute.xlu1 %2474 }
0x1167   : > { %2663 = vst.msk [vmem:[#allocation3 + $0x20] sm:$0xff] %vm1941_vm12, %v2656_v11 }
0x1168   : > { %2481 = vst.msk [vmem:[#allocation3 + $0x28] sm:$0xff] %vm1757_vm11, %v2475_v13 }
0x116a   : > { %v2658_v14 = vpop.permute.xlu1 %2657  ;;  %v2668_v16 = vld [vmem:[#allocation3 + $0x18] sm:$0xff] }
0x116b   : > { %2664 = vst.msk [vmem:[#allocation3 + $0x28] sm:$0xff] %vm1941_vm12, %v2658_v14  ;;  %v2672_v39 = vpack.c.bf16 %v2668_v16, %v2667_v15 }
0x116d   : > { %3971 = vmatmul.mubr.msk.bf16.gmra.mxu0 %vm1018_vm4, %v2672_v39 }
0x116e   : > { %3974 = vmatprep.mubr.msk.bf16.mxu0 %vm4287_vm5, %v4286_v5  ;;  %v2669_v17 = vld [vmem:[#allocation3 + $0x20] sm:$0xff] }
0x1172   : > { %v2670_v18 = vld [vmem:[#allocation3 + $0x28] sm:$0xff] }
0x1173   : > { %v2673_v19 = vpack.c.bf16 %v2670_v18, %v2669_v17 }
0x1175   : > { %3975 = vmatmul.mubr.msk.bf16.gmra.mxu0 %vm1018_vm4, %v2673_v19 }
0x1176   : > { %4010 = vmatprep.mubr.msk.bf16.mxu0 %vm4287_vm5, %v4286_v5 }
0x119c   : > { %v2773_v34 = vpop.xlane.xlu0 %2772 }
0x119d   : > { %v2789_v59 = vmul.f32 0.03125, %v2773_v34 }
0x119f   : > { %v2795_v46 = vsub.f32 %v4987_v3, %v2789_v59 }
0x11a1   : > { %v2801_v1 = vmul.f32 %v2795_v46, %v2795_v46 }
0x11a3   : > { %v2807_v12 = vsel %vm1018_vm4, %v2801_v1, 0.0 }
0x11a5   : > { %v2776_v48 = vpop.xlane.xlu1 %2775 }
0x11a6   : > { %v2790_v22 = vmul.f32 0.03125, %v2776_v48 }
0x11a8   : > { %v2796_v30 = vsub.f32 %v4991_v7, %v2790_v22  ;;  %v4105_v22 = vld [vmem:[%s4476_s25 + $0x30] sm:$0xff]  }
0x11aa   : > { %v2802_v37 = vmul.f32 %v2796_v30, %v2796_v30 }
0x11ac   : > { %v2810_v40 = vsel %vm1018_vm4, %v2802_v37, 0.0 }
0x122d   : > { %v2748_v20 = vpop.f32.mrf.mxu0 }
0x122e   : > { %v2749_v21 = vadd.f32 %v3657_v63, %v2748_v20 }
0x122f   : > { %v3972_v56 = vpop.f32.mrf.mxu0 }
0x1230   : > { %v5005_v58 = vadd.f32 %v4246_v55, %v2749_v21  ;;  %v5057_v55 = vld [vmem:[%s787_s16] ss:$0 sm:$0xff] }
0x1231   : > { %v2751_v60 = vpop.f32.mrf.mxu0 }
0x1232   : > { %v2752_v62 = vadd.f32 %v3657_v63, %v2751_v60  ;;  %v2777_v29 = vsel %vm1018_vm4, %v5005_v58, 0.0 }
0x1233   : > { %2778 = vadd.xlane.f32.xlu0 %v2777_v29  ;;  %v3973_v50 = vpop.f32.mrf.mxu0  ;;  %v5065_v29 = vld [vmem:[%s790_s21] ss:$0 sm:$0xff]  ;;  %s5236_s21 = sld [smem:[#allocation14_spill]] (!%p3680_p6) }
0x1234   : > { %v5009_v43 = vadd.f32 %v4247_v51, %v2752_v62 }
0x1235   : > { %v2756_v44 = vpop.f32.mrf.mxu0 }
0x1236   : > { %v2757_v23 = vadd.f32 %v3657_v63, %v2756_v44  ;;  %v2780_v24 = vsel %vm1018_vm4, %v5009_v43, 0.0 }
0x1237   : > { %2781 = vadd.xlane.f32.xlu0 %v2780_v24  ;;  %v3976_v25 = vpop.f32.mrf.mxu0  ;;  %v4107_v24 = vld [vmem:[%s4476_s25 + $0x20] sm:$0xff]  }
0x1238   : > { %v5014_v27 = vadd.f32 %v4248_v26, %v2757_v23  ;;  %v4106_v23 = vld [vmem:[%s4476_s25 + $0x28] sm:$0xff]   ;;  %v4108_v25 = vld [vmem:[%s4476_s25 + $0x18] sm:$0xff]   ;;  %v4109_v26 = vld [vmem:[%s4476_s25 + $0x10] sm:$0xff]  }
0x1239   : > { %v2759_v28 = vpop.f32.mrf.mxu0 }
0x123a   : > { %v2760_v31 = vadd.f32 %v3657_v63, %v2759_v28  ;;  %v2783_v32 = vsel %vm1018_vm4, %v5014_v27, 0.0  ;;  %v4110_v28 = vld [vmem:[%s4476_s25 + $0x8] sm:$0xff]  }
0x123b   : > { %2784 = vadd.xlane.f32.xlu0 %v2783_v32  ;;  %v3977_v35 = vpop.f32.mrf.mxu0 }
0x123c   : > { %v5019_v33 = vadd.f32 %v4249_v8, %v2760_v31 }
0x123e   : > { %v2786_v36 = vsel %vm1018_vm4, %v5019_v33, 0.0 }
0x123f   : > { %2808 = vadd.xlane.f32.xlu0 %v2807_v12  ;;  %2787 = vadd.xlane.f32.xlu1 %v2786_v36 }
0x1243   : > { %2811 = vadd.xlane.f32.xlu1 %v2810_v40 }
0x12bc   : > { %v2779_v47 = vpop.xlane.xlu0 %2778 }
0x12bd   : > { %v2791_v49 = vmul.f32 0.03125, %v2779_v47 }
0x12bf   : > { %v5029_v52 = vsub.f32 %v5005_v58, %v2791_v49 }
0x12c0   : > { %v2782_v53 = vpop.xlane.xlu0 %2781 }
0x12c1   : > { %v2792_v54 = vmul.f32 0.03125, %v2782_v53  ;;  %v2803_v57 = vmul.f32 %v5029_v52, %v5029_v52 }
0x12c3   : > { %v5034_v61 = vsub.f32 %v5009_v43, %v2792_v54  ;;  %v2813_v63 = vsel %vm1018_vm4, %v2803_v57, 0.0 }
0x12c4   : > { %2814 = vadd.xlane.f32.xlu0 %v2813_v63  ;;  %v2785_v0 = vpop.xlane.xlu0 %2784 }
0x12c5   : > { %v2793_v2 = vmul.f32 0.03125, %v2785_v0  ;;  %v2804_v42 = vmul.f32 %v5034_v61, %v5034_v61 }
0x12c7   : > { %v5040_v4 = vsub.f32 %v5014_v27, %v2793_v2  ;;  %v2816_v6 = vsel %vm1018_vm4, %v2804_v42, 0.0 }
0x12c8   : > { %v2809_v9 = vpop.xlane.xlu0 %2808  ;;  %2817 = vadd.xlane.f32.xlu1 %v2816_v6  ;;  %v2788_v10 = vpop.xlane.xlu1 %2787 }
0x12c9   : > { %v2825_v11 = vmul.f32 0.03125, %v2809_v9  ;;  %v2794_v13 = vmul.f32 0.03125, %v2788_v10  ;;  %v2805_v14 = vmul.f32 %v5040_v4, %v5040_v4 }
0x12cb   : > { %v2831_v15 = vadd.f32 1e-05, %v2825_v11  ;;  %v5046_v16 = vsub.f32 %v5019_v33, %v2794_v13  ;;  %v2819_v39 = vsel %vm1018_vm4, %v2805_v14, 0.0 }
0x12cc   : > { %2820 = vadd.xlane.f32.xlu0 %v2819_v39  ;;  %v2812_v17 = vpop.xlane.xlu1 %2811 }
0x12cd   : > { %4220 = vrsqrt.f32 %v2831_v15  ;;  %v2826_v18 = vmul.f32 0.03125, %v2812_v17  ;;  %v2806_v19 = vmul.f32 %v5046_v16, %v5046_v16 }
0x12cf   : > { %v2832_v20 = vadd.f32 1e-05, %v2826_v18  ;;  %v2822_v21 = vsel %vm1018_vm4, %v2806_v19, 0.0 }
0x12d0   : > { %2823 = vadd.xlane.f32.xlu1 %v2822_v21 }
0x12d1   : > { %4222 = vrsqrt.f32 %v2832_v20 }
0x12da   : > { %v4221_v34 = vpop.eup %4220 }
0x12db   : > { %v2843_v56 = vmul.f32 %v4221_v34, %v2795_v46  ;;  %v4104_v46 = vld [vmem:[%s4476_s25 + $0x38] sm:$0xff]  }
0x12dc   : > { %3995 = vmatpush3.bf16.msra.mxu0 %v4104_v46 }
0x12dd   : > { %v2855_v62 = vmul.f32 %v5057_v55, %v2843_v56  ;;  %3996 = vmatprep.subr.bf16.mxu0 %v4286_v5 }
0x12de   : > { %v4223_v60 = vpop.eup %4222 }
0x12df   : > { %v2844_v59 = vmul.f32 %v4223_v60, %v2796_v30  ;;  %v2867_v50 = vadd.f32 %v5065_v29, %v2855_v62  ;;  %v4111_v30 = vld [vmem:[%s4476_s25] sm:$0xff]   ;;  %s5233_s25 = scalar_lea.vmem %s5192_s12, %s4426_s1 }
0x12e0   : > { %3997 = vmatpush3.bf16.msra.mxu0 %v4105_v22 }
0x12e1   : > { %v2856_v48 = vmul.f32 %v5057_v55, %v2844_v59  ;;  %3998 = vmatprep.subr.bf16.mxu0 %v4286_v5 }
0x12e3   : > { %v2868_v51 = vadd.f32 %v5065_v29, %v2856_v48 }
0x12e4   : > { %3999 = vmatpush3.bf16.msra.mxu0 %v4106_v23 }
0x12e5   : > { %v2873_v44 = vpack.c.bf16 %v2868_v51, %v2867_v50  ;;  %4000 = vmatprep.subr.bf16.mxu0 %v4286_v5 }
0x12e7   : > { %3983 = vmatmul.mubr.msk.bf16.vlgmr.msra.gmra.mxu1 %vm1018_vm4, %v2873_v44 }
0x12e8   : > { %3986 = vmatprep.mubr.msk.bf16.mxu1 %vm4287_vm5, %v4286_v5  ;;  %4001 = vmatpush3.bf16.msra.mxu0 %v4107_v24 }
0x12e9   : > { %4002 = vmatprep.subr.bf16.mxu0 %v4286_v5 }
0x12ec   : > { %4003 = vmatpush3.bf16.msra.mxu0 %v4108_v25 }
0x12ed   : > { %4004 = vmatprep.subr.bf16.mxu0 %v4286_v5 }
0x12f0   : > { %4005 = vmatpush3.bf16.msra.mxu0 %v4109_v26 }
0x12f1   : > { %4006 = vmatprep.subr.bf16.mxu0 %v4286_v5 }
0x12f4   : > { %4007 = vmatpush3.bf16.msra.mxu0 %v4110_v28 }
0x12f5   : > { %4008 = vmatprep.subr.bf16.mxu0 %v4286_v5 }
0x12f8   : > { %4009 = vmatpush3.bf16.msra.mxu0 %v4111_v30 }
0x134d   : > { %v2815_v31 = vpop.xlane.xlu0 %2814 }
0x134e   : > { %v2827_v32 = vmul.f32 0.03125, %v2815_v31 }
0x1350   : > { %v2833_v1 = vadd.f32 1e-05, %v2827_v32 }
0x1351   : > { %v2818_v35 = vpop.xlane.xlu1 %2817 }
0x1352   : > { %4224 = vrsqrt.f32 %v2833_v1  ;;  %v2828_v8 = vmul.f32 0.03125, %v2818_v35 }
0x1354   : > { %v2834_v12 = vadd.f32 1e-05, %v2828_v8 }
0x1355   : > { %v2821_v36 = vpop.xlane.xlu0 %2820 }
0x1356   : > { %4226 = vrsqrt.f32 %v2834_v12  ;;  %v2829_v37 = vmul.f32 0.03125, %v2821_v36 }
0x1358   : > { %v2835_v40 = vadd.f32 1e-05, %v2829_v37 }
0x1359   : > { %v2824_v41 = vpop.xlane.xlu1 %2823 }
0x135a   : > { %4228 = vrsqrt.f32 %v2835_v40  ;;  %v2830_v45 = vmul.f32 0.03125, %v2824_v41 }
0x135c   : > { %v2836_v47 = vadd.f32 1e-05, %v2830_v45 }
0x135e   : > { %4230 = vrsqrt.f32 %v2836_v47 }
0x135f   : > { %v4225_v49 = vpop.eup %4224 }
0x1360   : > { %v2845_v53 = vmul.f32 %v4225_v49, %v5029_v52 }
0x1362   : > { %v2857_v63 = vmul.f32 %v5057_v55, %v2845_v53 }
0x1363   : > { %v4227_v54 = vpop.eup %4226 }
0x1364   : > { %v2846_v57 = vmul.f32 %v4227_v54, %v5034_v61  ;;  %v2869_v42 = vadd.f32 %v5065_v29, %v2857_v63 }
0x1366   : > { %v2858_v0 = vmul.f32 %v5057_v55, %v2846_v57 }
0x1367   : > { %v4229_v2 = vpop.eup %4228 }
0x1368   : > { %v2870_v6 = vadd.f32 %v5065_v29, %v2858_v0  ;;  %v2847_v9 = vmul.f32 %v4229_v2, %v5040_v4  ;;  %v3665_v4 = vld [vmem:[%s5233_s25] ss:$0 sm:$0xff] }
0x136a   : > { %v2874_v10 = vpack.c.bf16 %v2870_v6, %v2869_v42  ;;  %v2859_v61 = vmul.f32 %v5057_v55, %v2847_v9 }
0x136b   : > { %v4231_v11 = vpop.eup %4230 }
0x136c   : > { %3987 = vmatmul.mubr.msk.bf16.gmra.mxu1 %vm1018_vm4, %v2874_v10  ;;  %v2848_v52 = vmul.f32 %v4231_v11, %v5046_v16  ;;  %v2871_v14 = vadd.f32 %v5065_v29, %v2859_v61 }
0x136d   : > { %3990 = vmatprep.mubr.msk.bf16.mxu1 %vm4287_vm5, %v4286_v5 }
0x136e   : > { %v2860_v13 = vmul.f32 %v5057_v55, %v2848_v52 }
0x1370   : > { %v2872_v15 = vadd.f32 %v5065_v29, %v2860_v13 }
0x1372   : > { %v2875_v39 = vpack.c.bf16 %v2872_v15, %v2871_v14 }
0x1374   : > { %3991 = vmatmul.mubr.msk.bf16.gmra.mxu1 %vm1018_vm4, %v2875_v39 }
0x13a7   : > { %v2942_v16 = vpop.f32.mrf.mxu1 }
0x13a8   : > { %v2943_v17 = vadd.f32 %v3665_v4, %v2942_v16 }
0x13a9   : > { %v3984_v18 = vpop.f32.mrf.mxu1 }
0x13aa   : > { %v2971_v19 = vmul.f32 0.044715, %v2943_v17  ;;  %v2965_v23 = vmul.f32 0.5, %v2943_v17 }
0x13ab   : > { %v2945_v20 = vpop.f32.mrf.mxu1 }
0x13ac   : > { %v2977_v21 = vmul.f32 %v2971_v19, %v2943_v17  ;;  %v2946_v34 = vadd.f32 %v3665_v4, %v2945_v20 }
0x13ad   : > { %v3985_v56 = vpop.f32.mrf.mxu1 }
0x13ae   : > { %v2983_v55 = vmul.f32 %v2977_v21, %v2943_v17  ;;  %v2972_v60 = vmul.f32 0.044715, %v2946_v34  ;;  %v2966_v24 = vmul.f32 0.5, %v2946_v34 }
0x13b0   : > { %v2989_v59 = vadd.f32 %v2983_v55, %v2943_v17  ;;  %v2978_v62 = vmul.f32 %v2972_v60, %v2946_v34 }
0x13b2   : > { %v2995_v29 = vmul.f32 0.7978846, %v2989_v59  ;;  %v2984_v48 = vmul.f32 %v2978_v62, %v2946_v34 }
0x13b4   : > { %4232 = vtanh.f32 %v2995_v29  ;;  %v2990_v50 = vadd.f32 %v2984_v48, %v2946_v34 }
0x13b6   : > { %v2996_v51 = vmul.f32 0.7978846, %v2990_v50 }
0x13b8   : > { %4234 = vtanh.f32 %v2996_v51 }
0x13c1   : > { %v4233_v44 = vpop.eup %4232 }
0x13c2   : > { %v3007_v46 = vadd.f32 1.0, %v4233_v44 }
0x13c4   : > { %v3013_v26 = vmul.f32 %v3007_v46, %v2965_v23  ;;  %v3671_v23 = vld [vmem:[%s5234_s30] ss:$0 sm:$0xff] }
0x13c5   : > { %v4235_v22 = vpop.eup %4234 }
0x13c6   : > { %v3008_v25 = vadd.f32 1.0, %v4235_v22 }
0x13c8   : > { %v3014_v28 = vmul.f32 %v3008_v25, %v2966_v24 }
0x13ca   : > { %v3019_v30 = vpack.c.bf16 %v3014_v28, %v3013_v26 }
0x13cc   : > { %4011 = vmatmul.mubr.bf16.vlgmr.msra.gmra.mxu0 %v3019_v30 }
0x13cd   : > { %4014 = vmatprep.mubr.msk.bf16.mxu0 %vm4287_vm5, %v4286_v5 }
0x142c   : > { %v2950_v31 = vpop.f32.mrf.mxu1 }
0x142d   : > { %v2951_v32 = vadd.f32 %v3665_v4, %v2950_v31 }
0x142e   : > { %v3988_v1 = vpop.f32.mrf.mxu1 }
0x142f   : > { %v2973_v35 = vmul.f32 0.044715, %v2951_v32  ;;  %v2967_v21 = vmul.f32 0.5, %v2951_v32 }
0x1430   : > { %v2953_v8 = vpop.f32.mrf.mxu1 }
0x1431   : > { %v2979_v12 = vmul.f32 %v2973_v35, %v2951_v32  ;;  %v2954_v36 = vadd.f32 %v3665_v4, %v2953_v8 }
0x1432   : > { %v3989_v37 = vpop.f32.mrf.mxu1 }
0x1433   : > { %v2985_v40 = vmul.f32 %v2979_v12, %v2951_v32  ;;  %v2974_v41 = vmul.f32 0.044715, %v2954_v36 }
0x1434   : > { %v2958_v45 = vpop.f32.mrf.mxu1 }
0x1435   : > { %v2980_v47 = vmul.f32 %v2974_v41, %v2954_v36  ;;  %v2959_v49 = vadd.f32 %v3665_v4, %v2958_v45  ;;  %v2991_v53 = vadd.f32 %v2985_v40, %v2951_v32 }
0x1436   : > { %v3992_v54 = vpop.f32.mrf.mxu1 }
0x1437   : > { %v2986_v57 = vmul.f32 %v2980_v47, %v2954_v36  ;;  %v2975_v63 = vmul.f32 0.044715, %v2959_v49  ;;  %v2997_v0 = vmul.f32 0.7978846, %v2991_v53  ;;  %v2969_v48 = vmul.f32 0.5, %v2959_v49 }
0x1438   : > { %v2961_v2 = vpop.f32.mrf.mxu1 }
0x1439   : > { %v2981_v42 = vmul.f32 %v2975_v63, %v2959_v49  ;;  %v2962_v6 = vadd.f32 %v3665_v4, %v2961_v2  ;;  %v2992_v9 = vadd.f32 %v2986_v57, %v2954_v36  ;;  %4236 = vtanh.f32 %v2997_v0 }
0x143a   : > { %v3993_v10 = vpop.f32.mrf.mxu1  ;;  %v2968_v4 = vmul.f32 0.5, %v2954_v36 }
0x143b   : > { %v2987_v11 = vmul.f32 %v2981_v42, %v2959_v49  ;;  %v2976_v52 = vmul.f32 0.044715, %v2962_v6  ;;  %v2998_v61 = vmul.f32 0.7978846, %v2992_v9  ;;  %v2970_v50 = vmul.f32 0.5, %v2962_v6 }
0x143d   : > { %v2982_v13 = vmul.f32 %v2976_v52, %v2962_v6  ;;  %4238 = vtanh.f32 %v2998_v61  ;;  %v2993_v14 = vadd.f32 %v2987_v11, %v2959_v49 }
0x143f   : > { %v2988_v15 = vmul.f32 %v2982_v13, %v2962_v6  ;;  %v2999_v39 = vmul.f32 0.7978846, %v2993_v14 }
0x1441   : > { %v2994_v16 = vadd.f32 %v2988_v15, %v2962_v6  ;;  %4240 = vtanh.f32 %v2999_v39 }
0x1443   : > { %v3000_v17 = vmul.f32 0.7978846, %v2994_v16 }
0x1445   : > { %4242 = vtanh.f32 %v3000_v17 }
0x1446   : > { %v4237_v18 = vpop.eup %4236 }
0x1447   : > { %v3009_v19 = vadd.f32 1.0, %v4237_v18 }
0x1449   : > { %v3015_v56 = vmul.f32 %v3009_v19, %v2967_v21 }
0x144a   : > { %v4239_v20 = vpop.eup %4238 }
0x144b   : > { %v3010_v34 = vadd.f32 1.0, %v4239_v20 }
0x144d   : > { %v3016_v55 = vmul.f32 %v3010_v34, %v2968_v4 }
0x144e   : > { %v4241_v60 = vpop.eup %4240 }
0x144f   : > { %v3020_v59 = vpack.c.bf16 %v3016_v55, %v3015_v56  ;;  %v3011_v62 = vadd.f32 1.0, %v4241_v60 }
0x1451   : > { %4015 = vmatmul.mubr.bf16.gmra.mxu0 %v3020_v59  ;;  %v3017_v44 = vmul.f32 %v3011_v62, %v2969_v48 }
0x1452   : > { %v4243_v29 = vpop.eup %4242  ;;  %4018 = vmatprep.mubr.msk.bf16.mxu0 %vm4287_vm5, %v4286_v5 }
0x1453   : > { %v3012_v51 = vadd.f32 1.0, %v4243_v29 }
0x1455   : > { %v3018_v46 = vmul.f32 %v3012_v51, %v2970_v50 }
0x1457   : > { %v3021_v22 = vpack.c.bf16 %v3018_v46, %v3017_v44 }
0x1459   : > { %4019 = vmatmul.mubr.bf16.gmra.mxu0 %v3021_v22 }
0x148c   : > { %v3127_v24 = vpop.f32.mrf.mxu0 }
0x148d   : > { %v3128_v25 = vadd.f32 %v3671_v23, %v3127_v24 }
0x148e   : > { %v4012_v26 = vpop.f32.mrf.mxu0 }
0x148f   : > { %v3150_v28 = vadd.f32 %v3128_v25, %v4987_v3 }
0x1490   : > { %v3130_v30 = vpop.f32.mrf.mxu0 }
0x1491   : > { %3156 = vst.msk [vmem:[#allocation2] sm:$0xff] %vm1018_vm4, %v3150_v28  ;;  %v3131_v5 = vadd.f32 %v3671_v23, %v3130_v30 }
0x1492   : > { %v4013_v31 = vpop.f32.mrf.mxu0 }
0x1493   : > { %v3151_v32 = vadd.f32 %v3131_v5, %v4991_v7 }
0x1495   : > { %3157 = vst.msk [vmem:[#allocation2 + $0x8] sm:$0xff] %vm1018_vm4, %v3151_v32 }
0x1511   : > { %v3135_v1 = vpop.f32.mrf.mxu0 }
0x1512   : > { %v3136_v35 = vadd.f32 %v3671_v23, %v3135_v1 }
0x1513   : > { %v4016_v8 = vpop.f32.mrf.mxu0 }
0x1514   : > { %v3152_v12 = vadd.f32 %v3136_v35, %v5005_v58 }
0x1515   : > { %v3138_v36 = vpop.f32.mrf.mxu0 }
0x1516   : > { %3158 = vst.msk [vmem:[#allocation2 + $0x10] sm:$0xff] %vm1018_vm4, %v3152_v12  ;;  %v3139_v37 = vadd.f32 %v3671_v23, %v3138_v36 }
0x1517   : > { %v4017_v40 = vpop.f32.mrf.mxu0 }
0x1518   : > { %v3153_v3 = vadd.f32 %v3139_v37, %v5009_v43 }
0x1519   : > { %v3143_v41 = vpop.f32.mrf.mxu0 }
0x151a   : > { %3159 = vst.msk [vmem:[#allocation2 + $0x18] sm:$0xff] %vm1018_vm4, %v3153_v3  ;;  %v3144_v45 = vadd.f32 %v3671_v23, %v3143_v41 }
0x151b   : > { %v4020_v47 = vpop.f32.mrf.mxu0 }
0x151c   : > { %v3154_v7 = vadd.f32 %v3144_v45, %v5014_v27 }
0x151d   : > { %v3146_v49 = vpop.f32.mrf.mxu0 }
0x151e   : > { %3160 = vst.msk [vmem:[#allocation2 + $0x20] sm:$0xff] %vm1018_vm4, %v3154_v7  ;;  %v3147_v53 = vadd.f32 %v3671_v23, %v3146_v49  ;;  %3165 = sbr.rel (%p3680_p6) target bundleno = 5930 (0x172a), region = 104 }
0x151f   : > { %v4021_v54 = vpop.f32.mrf.mxu0 }
0x1520   : > { %v3155_v58 = vadd.f32 %v3147_v53, %v5019_v33 }
0x1522   : > { %3161 = vst.msk [vmem:[#allocation2 + $0x28] sm:$0xff] %vm1018_vm4, %v3155_v58 }
0x1523   : > { %vm3168_vm13 = vcmask 253952   ;;  %v4250_v52 = vld [vmem:[%s5197_s17 + $0x14] ss:$8 sps:$4 sm:$0xff]   ;;  %v4252_v61 = vld [vmem:[%s5197_s17 + $0x10] ss:$8 sps:$4 sm:$0xff]   ;;  %v4302_v15 = vmov 0  }
0x1524   : > { %v3169_v43 = vsel %vm3168_vm13, %v3150_v28, 0.0  ;;  %v3290_v57 = vsel %vm3168_vm13, %v3153_v3, 0.0  ;;  %v4253_v13 = vld [vmem:[%s5197_s17 + $0x4] ss:$8 sps:$4 sm:$0xff]   ;;  %3236 = vmatprep.subr.bf16.mxu0 %v4250_v52  ;;  %3357 = vmatprep.subr.bf16.mxu1 %v4250_v52  ;;  %v4255_v14 = vld [vmem:[%s5197_s17] ss:$8 sps:$4 sm:$0xff]  }
0x1525   : > { %3170 = vadd.xlane.f32.xlu0 %v3169_v43  ;;  %3237 = vmatpush1.bf16.msra.mxu0 %v4252_v61  ;;  %v3166_v4 = vld [vmem:[%s5235_s29] sm:$0x1]  ;;  %v3212_v22 = vshrl.u32 %v1214_v38, 7  ;;  %v4303_v25 = vmov 1966171168   ;;  %vm3285_vm14 = vcmp.lt.s32.totalorder %v1214_v38, 256 }
0x1526   : > { %3358 = vmatpush1.bf16.msra.mxu1 %v4252_v61  ;;  %3238 = vmatprep.subr.bf16.mxu0 %v4253_v13  ;;  %v3167_v56 = vld [vmem:[%s5236_s21] sm:$0x1]  ;;  %v3269_v26 = vunpack.c.l.s4 %v4303_v25 }
0x1527   : > { %3256 = vmatprep.mubr.bf16.mxu0 %v4302_v15  ;;  %3359 = vmatprep.subr.bf16.mxu1 %v4253_v13  ;;  %v3288_v59 = vld [vmem:[%s5235_s29] sm:$0x1]  ;;  %v3213_v23 = vsub.s32 0, %v3212_v22  ;;  %v3217_v24 = vsub.s32 1, %v3212_v22 }
0x1528   : > { %3377 = vmatprep.mubr.bf16.mxu1 %v4302_v15  ;;  %v3289_v48 = vld [vmem:[%s5236_s21] sm:$0x1]  ;;  %v3270_v31 = vunpack.c.0.s8 %v3269_v26 }
0x1529   : > { %3291 = vadd.xlane.f32.xlu0 %v3290_v57  ;;  %3239 = vmatpush1.bf16.msra.mxu0 %v4255_v14  ;;  %v3310_v32 = vld [vmem:[%s5237_s28] sm:$0x3] }
0x152a   : > { %3360 = vmatpush1.bf16.msra.mxu1 %v4255_v14  ;;  %v3335_v8 = vrot.slane %v3310_v32, %v3213_v23  ;;  %v3273_v37 = vsub.s32 %v3270_v31, %v3212_v22  ;;  %v3339_v40 = vrot.slane %v3310_v32, %v3217_v24 }
0x15ae   : > { %v3171_v63 = vpop.xlane.xlu0 %3170 }
0x15af   : > { %v3172_v0 = vmul.f32 0.03125, %v3171_v63 }
0x15b1   : > { %v3173_v27 = vsub.f32 %v3150_v28, %v3172_v0  ;;  %v3189_v28 = vld [vmem:[%s5237_s28] sm:$0x3] }
0x15b2   : > { %v3292_v2 = vpop.xlane.xlu0 %3291  ;;  %v3214_v30 = vrot.slane %v3189_v28, %v3213_v23  ;;  %v3218_v5 = vrot.slane %v3189_v28, %v3217_v24 }
0x15b3   : > { %v3293_v42 = vmul.f32 0.03125, %v3292_v2  ;;  %v3174_v6 = vmul.f32 %v3173_v27, %v3173_v27 }
0x15b5   : > { %v3294_v9 = vsub.f32 %v3153_v3, %v3293_v42  ;;  %v3175_v10 = vsel %vm3168_vm13, %v3174_v6, 0.0 }
0x15b6   : > { %3176 = vadd.xlane.f32.xlu1 %v3175_v10 }
0x15b7   : > { %v3295_v33 = vmul.f32 %v3294_v9, %v3294_v9 }
0x15b9   : > { %v3296_v11 = vsel %vm3168_vm13, %v3295_v33, 0.0 }
0x15ba   : > { %3297 = vadd.xlane.f32.xlu1 %v3296_v11 }
0x163f   : > { %v3177_v39 = vpop.xlane.xlu1 %3176 }
0x1640   : > { %v3178_v16 = vmul.f32 0.03125, %v3177_v39 }
0x1642   : > { %v3179_v17 = vadd.f32 1e-05, %v3178_v16 }
0x1643   : > { %v3298_v18 = vpop.xlane.xlu1 %3297 }
0x1644   : > { %4256 = vrsqrt.f32 %v3179_v17  ;;  %v3299_v19 = vmul.f32 0.03125, %v3298_v18 }
0x1646   : > { %v3300_v20 = vadd.f32 1e-05, %v3299_v19 }
0x1648   : > { %4258 = vrsqrt.f32 %v3300_v20 }
0x1651   : > { %v4257_v21 = vpop.eup %4256 }
0x1652   : > { %v3181_v34 = vmul.f32 %v4257_v21, %v3173_v27 }
0x1654   : > { %v3182_v55 = vmul.f32 %v3181_v34, %v3166_v4 }
0x1655   : > { %v4259_v60 = vpop.eup %4258 }
0x1656   : > { %v3183_v62 = vadd.f32 %v3182_v55, %v3167_v56  ;;  %v3302_v29 = vmul.f32 %v4259_v60, %v3294_v9 }
0x1658   : > { %v3184_v50 = vpack.c.bf16 %v3183_v62, %v3183_v62  ;;  %v3303_v51 = vmul.f32 %v3302_v29, %v3288_v59 }
0x165a   : > { %3685 = vmatmul.mubr.msk.bf16.vlgmr.msra.gmra.mxu0 %vm1018_vm4, %v3184_v50  ;;  %v3304_v44 = vadd.f32 %v3303_v51, %v3289_v48 }
0x165c   : > { %v3305_v46 = vpack.c.bf16 %v3304_v44, %v3304_v44 }
0x165e   : > { %3690 = vmatmul.mubr.msk.bf16.vlgmr.msra.gmra.mxu1 %vm1018_vm4, %v3305_v46 }
0x171a   : > { %v3258_v1 = vpop.f32.mrf.mxu0 }
0x171b   : > { %v3259_v12 = vadd.f32 %v3258_v1, %v3214_v30 }
0x171c   : > { %v3260_v35 = vpop.f32.mrf.mxu0 }
0x171d   : > { %v3261_v36 = vadd.f32 %v3260_v35, %v3218_v5 }
0x171e   : > { %v3262_v3 = vpop.f32.mrf.mxu0  ;;  %v3379_v41 = vpop.f32.mrf.mxu1 }
0x171f   : > { %v3267_v45 = vcombine.low %v3259_v12, %v3261_v36  ;;  %v3380_v53 = vadd.f32 %v3379_v41, %v3335_v8 }
0x1720   : > { %v3263_v47 = vpop.f32.mrf.mxu0  ;;  %v3381_v7 = vpop.f32.mrf.mxu1 }
0x1721   : > { %v3274_v49 = vrot.slane %v3267_v45, %v3273_v37  ;;  %v3382_v54 = vadd.f32 %v3381_v7, %v3339_v40 }
0x1722   : > { %v3383_v58 = vpop.f32.mrf.mxu1 }
0x1723   : > { %v3281_v43 = vrot.slane %v3274_v49, %v3273_v37  ;;  %v3388_v57 = vcombine.low %v3380_v53, %v3382_v54 }
0x1724   : > { %v3384_v63 = vpop.f32.mrf.mxu1 }
0x1725   : > { %3287 = vst.msk [vmem:[%s5238_s23] sm:$0x3] %vm3285_vm14, %v3281_v43  ;;  %v3395_v0 = vrot.slane %v3388_v57, %v3273_v37 }
0x1727   : > { %v3402_v27 = vrot.slane %v3395_v0, %v3273_v37 }
0x1729   : > { %3691 = vst.msk [vmem:[%s5238_s23 + $0x2] sm:$0x3] %vm3285_vm14, %v3402_v27 }
0x172a PF: > { %s5239_s27 = sld [smem:[#allocation5_spill]] }
0x172b   : > { %s5240_s0 = sld [smem:[#allocation4_spill]] }
0x172c   : > { %s5241_s30 = sld [smem:[#allocation6_spill]] }
0x1730   : > { %s29_s20 = sadd.s32 1, %s5239_s27  }
0x1731   : > { %p26_p7 = scmp.ge.s32.totalorder %s29_s20, 4  }
0x1733   :  { %28 = sbr.rel (!%p26_p7) target bundleno = 11 (0xb), region = 172 }

</bundles_post_ra>
